<compile_context>
chip_gen: v7x
topology: tpu7x:2x2x1
jax: 0.10.0
libtpu: 0.0.40
codegen_flags: <defaults>
</compile_context>

<pallas_src>
from functools import partial

import jax
import jax.numpy as jnp
import numpy as np
from jax import lax
from jax.experimental import pallas as pl
from jax.experimental.pallas import tpu as pltpu

EPS = 1e-5                      # PyTorch BatchNorm2d default eps
VMEM_LIMIT = 32 * 1024 * 1024   # safe on v5e/v6e/v7x; raise toward 64-96 MiB on
                                # v5e/v6e for bigger row tiles, keep <~48 MiB on v7x.


# --------------------------------------------------------------------------
# Kernels
# --------------------------------------------------------------------------
def _conv1x1_stats_kernel(x_ref, w_ref, h_ref, st_ref, *, compute_dtype):
    """h = x @ w (MXU, low-precision operands / f32 acc); per-tile (sum, sum_sq)."""
    h = jnp.dot(x_ref[...].astype(compute_dtype), w_ref[...],
                preferred_element_type=jnp.float32)
    h_ref[...] = h
    s = jnp.sum(h, axis=0, keepdims=True)
    q = jnp.sum(h * h, axis=0, keepdims=True)
    st_ref[...] = jnp.concatenate([s, q], axis=0).reshape(1, 2, -1)


def _bn_relu_conv1x1_stats_kernel(h_ref, sc_ref, sh_ref, w_ref, o_ref, st_ref,
                                  *, compute_dtype):
    """o = ReLU(h * scale + shift) @ w ; per-tile (sum, sum_sq) of o."""
    y = jnp.maximum(h_ref[...] * sc_ref[...] + sh_ref[...], 0.0)      # f32 BN+ReLU
    o = jnp.dot(y.astype(compute_dtype), w_ref[...],
                preferred_element_type=jnp.float32)
    o_ref[...] = o
    s = jnp.sum(o, axis=0, keepdims=True)
    q = jnp.sum(o * o, axis=0, keepdims=True)
    st_ref[...] = jnp.concatenate([s, q], axis=0).reshape(1, 2, -1)


def _conv_kxk_stats_kernel(h1_ref, sc_ref, sh_ref, w_ref, h2_ref, st_ref,
                           pad_ref, *, H, W, C, K, P, compute_dtype):
    """One image: ReLU(BN1(h1)) -> zero-padded KxK conv as a single im2col
    matmul with contraction K*K*C; emits per-image (sum, sum_sq)."""
    Hp, Wp = H + 2 * P, W + 2 * P

    # BN1 (folded affine) + ReLU in f32.
    y = jnp.maximum(h1_ref[...].reshape(H, W, C) * sc_ref[...] + sh_ref[...], 0.0)

    # Zero only the P-wide halo of the persistent scratch.  Re-done every grid
    # step on purpose: with a "parallel" grid axis each TensorCore owns its own
    # scratch, so a program_id()==0 one-shot init would be wrong under megacore.
    if P > 0:
        zrow = jnp.zeros((P, Wp, C), jnp.float32)
        pad_ref[0:P, :, :] = zrow
        pad_ref[P + H:Hp, :, :] = zrow
        zcol = jnp.zeros((Hp, P, C), jnp.float32)
        pad_ref[:, 0:P, :] = zcol
        pad_ref[:, P + W:Wp, :] = zcol
    pad_ref[P:P + H, P:P + W, :] = y

    # im2col -> (H*W, K*K*C), then ONE fat MXU matmul (contraction K*K*C).
    cols = [pad_ref[dh:dh + H, dw:dw + W, :].astype(compute_dtype).reshape(H * W, C)
            for dh in range(K) for dw in range(K)]
    col = jnp.concatenate(cols, axis=-1)
    h2 = jnp.dot(col, w_ref[...], preferred_element_type=jnp.float32)

    h2_ref[...] = h2.reshape(1, H, W, C)
    s = jnp.sum(h2, axis=0, keepdims=True)
    q = jnp.sum(h2 * h2, axis=0, keepdims=True)
    st_ref[...] = jnp.concatenate([s, q], axis=0).reshape(1, 2, -1)


def _bn_residual_relu_kernel(h_ref, x_ref, sc_ref, sh_ref, o_ref):
    """out = ReLU(h * scale + shift + identity)."""
    y = h_ref[...] * sc_ref[...] + sh_ref[...] + x_ref[...].astype(jnp.float32)
    o_ref[...] = jnp.maximum(y, 0.0).astype(o_ref.dtype)


# --------------------------------------------------------------------------
# Wrapper
# --------------------------------------------------------------------------
def _pick_row_tile(rows, max_tile):
    """Largest power-of-two tile <= max_tile dividing `rows` (prefers >= 2 tiles)."""
    t = max_tile
    while t > 8 and (rows % t != 0 or rows // t < 2):
        t //= 2
    return t if rows % t == 0 else rows


def _fold_bn(partial_stats, gamma, beta, count):
    """Reduce per-tile (sum, sum_sq) into per-channel scale/shift with the BN
    affine folded in (training-mode batch statistics, biased variance)."""
    s = jnp.sum(partial_stats.astype(jnp.float32), axis=0)        # (2, C)
    mean = s[0] / count
    var = s[1] / count - mean * mean
    scale = gamma.reshape(-1).astype(jnp.float32) * lax.rsqrt(var + EPS)
    shift = beta.reshape(-1).astype(jnp.float32) - mean * scale
    return scale.reshape(1, -1), shift.reshape(1, -1)


@partial(jax.jit, static_argnames=("kernel_size", "compute_dtype", "max_row_tile"))
def bottleblock(x_nhwc, params, *, kernel_size, compute_dtype=jnp.bfloat16,
                max_row_tile=512):
    """BottleBlock forward.  x_nhwc: (N,H,W,Cin).
    params = (w1, w2, w3, g1, b1, g2, b2, g3, b3) with
      w1: (Cin, Cmid), w2: (K, K, Cmid, Cmid) HWIO, w3: (Cmid, Cout)."""
    N, H, W, Cin = x_nhwc.shape
    w1, w2, w3, g1, b1, g2, b2, g3, b3 = params
    Cmid, Cout = w1.shape[1], w3.shape[1]
    assert Cin == Cout, "identity residual requires in_channels == out_channels"
    K = kernel_size
    P = (K - 1) // 2
    rows = N * H * W
    tr = _pick_row_tile(rows, max_row_tile)   # v5e/v6e: 512-1024 rows; v7x: halve
    nt = rows // tr

    cparams = pltpu.CompilerParams(dimension_semantics=("parallel",),
                                   vmem_limit_bytes=VMEM_LIMIT)

    x2d = x_nhwc.reshape(rows, Cin)
    w1c = w1.astype(compute_dtype)
    w2c = w2.reshape(K * K * Cmid, Cmid).astype(compute_dtype)    # im2col weight
    w3c = w3.astype(compute_dtype)

    row_spec = lambda c: pl.BlockSpec((tr, c), lambda i: (i, 0))
    chan_spec = lambda c: pl.BlockSpec((1, c), lambda i: (0, 0))
    stat_spec = lambda c: pl.BlockSpec((1, 2, c), lambda i: (i, 0, 0))

    # ---- stage 1: conv1 (1x1 matmul) + partial BN1 stats -------------------
    h1_raw, st1 = pl.pallas_call(
        partial(_conv1x1_stats_kernel, compute_dtype=compute_dtype),
        grid=(nt,),
        in_specs=[row_spec(Cin),
                  pl.BlockSpec((Cin, Cmid), lambda i: (0, 0))],
        out_specs=(row_spec(Cmid), stat_spec(Cmid)),
        out_shape=(jax.ShapeDtypeStruct((rows, Cmid), jnp.float32),
                   jax.ShapeDtypeStruct((nt, 2, Cmid), jnp.float32)),
        compiler_params=cparams,
    )(x2d, w1c)
    sc1, sh1 = _fold_bn(st1, g1, b1, rows)

    # ---- stage 2: BN1+ReLU fused into conv2 (KxK im2col) + BN2 stats -------
    h2_raw, st2 = pl.pallas_call(
        partial(_conv_kxk_stats_kernel, H=H, W=W, C=Cmid, K=K, P=P,
                compute_dtype=compute_dtype),
        grid=(N,),
        in_specs=[pl.BlockSpec((1, H, W, Cmid), lambda n: (n, 0, 0, 0)),
                  chan_spec(Cmid), chan_spec(Cmid),
                  pl.BlockSpec((K * K * Cmid, Cmid), lambda n: (0, 0))],
        out_specs=(pl.BlockSpec((1, H, W, Cmid), lambda n: (n, 0, 0, 0)),
                   stat_spec(Cmid)),
        out_shape=(jax.ShapeDtypeStruct((N, H, W, Cmid), jnp.float32),
                   jax.ShapeDtypeStruct((N, 2, Cmid), jnp.float32)),
        scratch_shapes=[pltpu.VMEM((H + 2 * P, W + 2 * P, Cmid), jnp.float32)],
        compiler_params=cparams,
    )(h1_raw.reshape(N, H, W, Cmid), sc1, sh1, w2c)
    sc2, sh2 = _fold_bn(st2, g2, b2, rows)

    # ---- stage 3: BN2+ReLU fused into conv3 (1x1) + BN3 stats --------------
    h3_raw, st3 = pl.pallas_call(
        partial(_bn_relu_conv1x1_stats_kernel, compute_dtype=compute_dtype),
        grid=(nt,),
        in_specs=[row_spec(Cmid), chan_spec(Cmid), chan_spec(Cmid),
                  pl.BlockSpec((Cmid, Cout), lambda i: (0, 0))],
        out_specs=(row_spec(Cout), stat_spec(Cout)),
        out_shape=(jax.ShapeDtypeStruct((rows, Cout), jnp.float32),
                   jax.ShapeDtypeStruct((nt, 2, Cout), jnp.float32)),
        compiler_params=cparams,
    )(h2_raw.reshape(rows, Cmid), sc2, sh2, w3c)
    sc3, sh3 = _fold_bn(st3, g3, b3, rows)

    # ---- stage 4: BN3 + residual add + ReLU --------------------------------
    y2d = pl.pallas_call(
        _bn_residual_relu_kernel,
        grid=(nt,),
        in_specs=[row_spec(Cout), row_spec(Cout), chan_spec(Cout), chan_spec(Cout)],
        out_specs=row_spec(Cout),
        out_shape=jax.ShapeDtypeStruct((rows, Cout), x_nhwc.dtype),
        compiler_params=cparams,
    )(h3_raw, x2d, sc3, sh3)

    return y2d.reshape(N, H, W, Cout)


# --------------------------------------------------------------------------
# Pure-JAX reference (same math: low-precision matmul operands, f32 acc,
# training-mode BatchNorm), for validation.
# --------------------------------------------------------------------------
def reference(x_nhwc, params, kernel_size, compute_dtype=jnp.bfloat16):
    w1, w2, w3, g1, b1, g2, b2, g3, b3 = params
    p = (kernel_size - 1) // 2

    def conv(x, w, padding):
        return lax.conv_general_dilated(
            x.astype(compute_dtype), w.astype(compute_dtype), (1, 1), padding,
            dimension_numbers=("NHWC", "HWIO", "NHWC"),
            preferred_element_type=jnp.float32)

    def bn(h, g, b):
        mean = jnp.mean(h, axis=(0, 1, 2), keepdims=True)
        var = jnp.mean((h - mean) ** 2, axis=(0, 1, 2), keepdims=True)
        return (h - mean) * lax.rsqrt(var + EPS) * g.reshape(1, 1, 1, -1) \
            + b.reshape(1, 1, 1, -1)

    h = jax.nn.relu(bn(conv(x_nhwc, w1.reshape(1, 1, *w1.shape), "VALID"), g1, b1))
    h = jax.nn.relu(bn(conv(h, w2, [(p, p), (p, p)]), g2, b2))
    h = bn(conv(h, w3.reshape(1, 1, *w3.shape), "VALID"), g3, b3)
    return jax.nn.relu(h + x_nhwc.astype(jnp.float32))


if __name__ == "__main__":
    key = jax.random.PRNGKey(0)
    N, Cin, H, W = 2, 8, 16, 16
    Cout, K, stride = Cin, 3, 1               # downsample=None => Cin == Cout
    Cmid = Cin // 2 if stride == 1 else Cin   # BottleBlock.__init__ rule

    ks = jax.random.split(key, 10)
    # PyTorch-layout tensors: x NCHW, weights (O, I, kh, kw).
    x_nchw = jax.random.normal(ks[0], (N, Cin, H, W), jnp.float32)
    w1_t = jax.random.normal(ks[1], (Cmid, Cin, 1, 1), jnp.float32) * 0.2
    w2_t = jax.random.normal(ks[2], (Cmid, Cmid, K, K), jnp.float32) * 0.2
    w3_t = jax.random.normal(ks[3], (Cout, Cmid, 1, 1), jnp.float32) * 0.2
    g1 = 1.0 + 0.1 * jax.random.normal(ks[4], (Cmid,), jnp.float32)
    b1 = 0.1 * jax.random.normal(ks[5], (Cmid,), jnp.float32)
    g2 = 1.0 + 0.1 * jax.random.normal(ks[6], (Cmid,), jnp.float32)
    b2 = 0.1 * jax.random.normal(ks[7], (Cmid,), jnp.float32)
    g3 = 1.0 + 0.1 * jax.random.normal(ks[8], (Cout,), jnp.float32)
    b3 = 0.1 * jax.random.normal(ks[9], (Cout,), jnp.float32)

    # Layout glue (pure data movement): NCHW -> NHWC, OIHW -> HWIO / (I, O).
    x = jnp.transpose(x_nchw, (0, 2, 3, 1))
    w1 = w1_t[:, :, 0, 0].T
    w2 = jnp.transpose(w2_t, (2, 3, 1, 0))
    w3 = w3_t[:, :, 0, 0].T
    params = (w1, w2, w3, g1, b1, g2, b2, g3, b3)

    out_nhwc = bottleblock(x, params, kernel_size=K)
    jax.block_until_ready(out_nhwc)
    out_nchw = jnp.transpose(out_nhwc, (0, 3, 1, 2))

    ref_nchw = jnp.transpose(reference(x, params, K), (0, 3, 1, 2))
    # bf16 operands are rounded at independent points in the kernel vs the
    # XLA reference, so allow a small (post-BN-amplified) tolerance.
    np.testing.assert_allclose(np.asarray(out_nchw), np.asarray(ref_nchw),
                               rtol=2e-2, atol=2e-2)
    print("KERNEL_OK")
</pallas_src>

<mosaic_0001>
module attributes {stable_mosaic.version = 11 : i64} {
  func.func @_conv1x1_stats_kernel(%arg0: i32, %arg1: memref<256x8xf32, #tpu.memory_space<vmem>>, %arg2: memref<8x4xbf16, #tpu.memory_space<vmem>>, %arg3: memref<256x4xf32, #tpu.memory_space<vmem>>, %arg4: memref<1x2x4xf32, #tpu.memory_space<vmem>>) attributes {dimension_semantics = [#tpu.dimension_semantics<parallel>], iteration_bounds = array<i64: 2>, scalar_prefetch = 0 : i64, scratch_operands = 0 : i64, tpu.core_type = #tpu.core_type<tc>, window_params = [{transform_indices = @transform_0, window_bounds = array<i64: 256, 8>}, {pipeline_mode = #tpu.pipeline_mode<synchronous>, transform_indices = @transform_1, window_bounds = array<i64: 8, 4>}, {transform_indices = @transform_2, window_bounds = array<i64: 256, 4>}, {transform_indices = @transform_3, window_bounds = array<i64: 1, 2, 4>}]} {
    %c0 = arith.constant 0 : index
    %c0_0 = arith.constant 0 : index
    %0 = vector.load %arg1[%c0, %c0_0] : memref<256x8xf32, #tpu.memory_space<vmem>>, vector<256x8xf32>
    %1 = arith.truncf %0 : vector<256x8xf32> to vector<256x8xbf16>
    %c0_1 = arith.constant 0 : index
    %c0_2 = arith.constant 0 : index
    %2 = vector.load %arg2[%c0_1, %c0_2] : memref<8x4xbf16, #tpu.memory_space<vmem>>, vector<8x4xbf16>
    %cst = arith.constant dense<0.000000e+00> : vector<256x4xf32>
    %3 = tpu.matmul %1, %2, %cst {dimension_numbers = #tpu.dot_dimension_numbers<[1], [0], [0], [1], [0, 0, 1, 1], [], []>} : vector<256x8xbf16>, vector<8x4xbf16>, vector<256x4xf32> -> vector<256x4xf32>
    %c0_3 = arith.constant 0 : index
    %c0_4 = arith.constant 0 : index
    %4 = vector.load %arg3[%c0_3, %c0_4] : memref<256x4xf32, #tpu.memory_space<vmem>>, vector<256x4xf32>
    tpu.vector_store %arg3[%c0_3, %c0_4], %3 {strides = array<i32>} : memref<256x4xf32, #tpu.memory_space<vmem>>, vector<256x4xf32>,
    %cst_5 = arith.constant dense<0.000000e+00> : vector<4xf32>
    %5 = vector.multi_reduction <add>, %3, %cst_5 [0] : vector<256x4xf32> to vector<4xf32>
    %6 = vector.shape_cast %5 : vector<4xf32> to vector<1x4xf32>
    %7 = arith.mulf %3, %3 : vector<256x4xf32>
    %cst_6 = arith.constant dense<0.000000e+00> : vector<4xf32>
    %8 = vector.multi_reduction <add>, %7, %cst_6 [0] : vector<256x4xf32> to vector<4xf32>
    %9 = vector.shape_cast %8 : vector<4xf32> to vector<1x4xf32>
    %10 = tpu.concatenate %6, %9 in 0 : vector<1x4xf32>, vector<1x4xf32> -> vector<2x4xf32>
    %11 = vector.shape_cast %10 : vector<2x4xf32> to vector<1x2x4xf32>
    %c0_7 = arith.constant 0 : index
    %c0_8 = arith.constant 0 : index
    %c0_9 = arith.constant 0 : index
    %12 = vector.load %arg4[%c0_7, %c0_8, %c0_9] : memref<1x2x4xf32, #tpu.memory_space<vmem>>, vector<1x2x4xf32>
    tpu.vector_store %arg4[%c0_7, %c0_8, %c0_9], %11 {strides = array<i32>} : memref<1x2x4xf32, #tpu.memory_space<vmem>>, vector<1x2x4xf32>,
    return
  }
  func.func @transform_0(%arg0: i32) -> (i32, i32) {
    %c0_i32 = arith.constant 0 : i32
    %c0_i32_0 = arith.constant 0 : i32
    return %arg0, %c0_i32 : i32, i32
  }
  func.func @transform_1(%arg0: i32) -> (i32, i32) {
    %c0_i32 = arith.constant 0 : i32
    %c0_i32_0 = arith.constant 0 : i32
    %c0_i32_1 = arith.constant 0 : i32
    return %c0_i32, %c0_i32_0 : i32, i32
  }
  func.func @transform_2(%arg0: i32) -> (i32, i32) {
    %c0_i32 = arith.constant 0 : i32
    %c0_i32_0 = arith.constant 0 : i32
    return %arg0, %c0_i32 : i32, i32
  }
  func.func @transform_3(%arg0: i32) -> (i32, i32, i32) {
    %c0_i32 = arith.constant 0 : i32
    %c0_i32_0 = arith.constant 0 : i32
    %c0_i32_1 = arith.constant 0 : i32
    return %arg0, %c0_i32, %c0_i32_0 : i32, i32, i32
  }
}

module attributes {stable_mosaic.version = 11 : i64} {
  func.func @_conv_kxk_stats_kernel(%arg0: i32, %arg1: memref<1x16x16x4xf32, #tpu.memory_space<vmem>>, %arg2: memref<1x4xf32, #tpu.memory_space<vmem>>, %arg3: memref<1x4xf32, #tpu.memory_space<vmem>>, %arg4: memref<36x4xbf16, #tpu.memory_space<vmem>>, %arg5: memref<1x16x16x4xf32, #tpu.memory_space<vmem>>, %arg6: memref<1x2x4xf32, #tpu.memory_space<vmem>>, %arg7: memref<18x18x4xf32, #tpu.memory_space<vmem>>) attributes {dimension_semantics = [#tpu.dimension_semantics<parallel>], iteration_bounds = array<i64: 2>, scalar_prefetch = 0 : i64, scratch_operands = 1 : i64, tpu.core_type = #tpu.core_type<tc>, window_params = [{transform_indices = @transform_0, window_bounds = array<i64: 1, 16, 16, 4>}, {pipeline_mode = #tpu.pipeline_mode<synchronous>, transform_indices = @transform_1, window_bounds = array<i64: 1, 4>}, {pipeline_mode = #tpu.pipeline_mode<synchronous>, transform_indices = @transform_2, window_bounds = array<i64: 1, 4>}, {pipeline_mode = #tpu.pipeline_mode<synchronous>, transform_indices = @transform_3, window_bounds = array<i64: 36, 4>}, {transform_indices = @transform_4, window_bounds = array<i64: 1, 16, 16, 4>}, {transform_indices = @transform_5, window_bounds = array<i64: 1, 2, 4>}]} {
    %c0 = arith.constant 0 : index
    %c0_0 = arith.constant 0 : index
    %c0_1 = arith.constant 0 : index
    %c0_2 = arith.constant 0 : index
    %0 = vector.load %arg1[%c0, %c0_0, %c0_1, %c0_2] : memref<1x16x16x4xf32, #tpu.memory_space<vmem>>, vector<1x16x16x4xf32>
    %1 = vector.shape_cast %0 : vector<1x16x16x4xf32> to vector<16x16x4xf32>
    %c0_3 = arith.constant 0 : index
    %c0_4 = arith.constant 0 : index
    %2 = vector.load %arg2[%c0_3, %c0_4] : memref<1x4xf32, #tpu.memory_space<vmem>>, vector<1x4xf32>
    %3 = vector.shape_cast %2 : vector<1x4xf32> to vector<1x1x4xf32>
    %4 = vector.broadcast %3 : vector<1x1x4xf32> to vector<16x16x4xf32>
    %5 = arith.mulf %1, %4 : vector<16x16x4xf32>
    %c0_5 = arith.constant 0 : index
    %c0_6 = arith.constant 0 : index
    %6 = vector.load %arg3[%c0_5, %c0_6] : memref<1x4xf32, #tpu.memory_space<vmem>>, vector<1x4xf32>
    %7 = vector.shape_cast %6 : vector<1x4xf32> to vector<1x1x4xf32>
    %8 = vector.broadcast %7 : vector<1x1x4xf32> to vector<16x16x4xf32>
    %9 = arith.addf %5, %8 : vector<16x16x4xf32>
    %cst = arith.constant 0.000000e+00 : f32
    %10 = vector.broadcast %cst : f32 to vector<16x16x4xf32>
    %11 = arith.maximumf %9, %10 : vector<16x16x4xf32>
    %cst_7 = arith.constant 0.000000e+00 : f32
    %12 = vector.broadcast %cst_7 : f32 to vector<1x18x4xf32>
    %c0_8 = arith.constant 0 : index
    %c0_9 = arith.constant 0 : index
    %c0_10 = arith.constant 0 : index
    %13 = vector.load %arg7[%c0_8, %c0_9, %c0_10] : memref<18x18x4xf32, #tpu.memory_space<vmem>>, vector<1x18x4xf32>
    tpu.vector_store %arg7[%c0_8, %c0_9, %c0_10], %12 {strides = array<i32>} : memref<18x18x4xf32, #tpu.memory_space<vmem>>, vector<1x18x4xf32>,
    %c17 = arith.constant 17 : index
    %c0_11 = arith.constant 0 : index
    %c0_12 = arith.constant 0 : index
    %14 = vector.load %arg7[%c17, %c0_11, %c0_12] : memref<18x18x4xf32, #tpu.memory_space<vmem>>, vector<1x18x4xf32>
    tpu.vector_store %arg7[%c17, %c0_11, %c0_12], %12 {strides = array<i32>} : memref<18x18x4xf32, #tpu.memory_space<vmem>>, vector<1x18x4xf32>,
    %cst_13 = arith.constant 0.000000e+00 : f32
    %15 = vector.broadcast %cst_13 : f32 to vector<18x1x4xf32>
    %c0_14 = arith.constant 0 : index
    %c0_15 = arith.constant 0 : index
    %c0_16 = arith.constant 0 : index
    %16 = vector.load %arg7[%c0_14, %c0_15, %c0_16] : memref<18x18x4xf32, #tpu.memory_space<vmem>>, vector<18x1x4xf32>
    tpu.vector_store %arg7[%c0_14, %c0_15, %c0_16], %15 {strides = array<i32>} : memref<18x18x4xf32, #tpu.memory_space<vmem>>, vector<18x1x4xf32>,
    %c0_17 = arith.constant 0 : index
    %c17_18 = arith.constant 17 : index
    %c0_19 = arith.constant 0 : index
    %17 = vector.load %arg7[%c0_17, %c17_18, %c0_19] : memref<18x18x4xf32, #tpu.memory_space<vmem>>, vector<18x1x4xf32>
    tpu.vector_store %arg7[%c0_17, %c17_18, %c0_19], %15 {strides = array<i32>} : memref<18x18x4xf32, #tpu.memory_space<vmem>>, vector<18x1x4xf32>,
    %c1 = arith.constant 1 : index
    %c1_20 = arith.constant 1 : index
    %c0_21 = arith.constant 0 : index
    %18 = vector.load %arg7[%c1, %c1_20, %c0_21] : memref<18x18x4xf32, #tpu.memory_space<vmem>>, vector<16x16x4xf32>
    tpu.vector_store %arg7[%c1, %c1_20, %c0_21], %11 {strides = array<i32>} : memref<18x18x4xf32, #tpu.memory_space<vmem>>, vector<16x16x4xf32>,
    %c0_22 = arith.constant 0 : index
    %c0_23 = arith.constant 0 : index
    %c0_24 = arith.constant 0 : index
    %19 = vector.load %arg7[%c0_22, %c0_23, %c0_24] : memref<18x18x4xf32, #tpu.memory_space<vmem>>, vector<16x16x4xf32>
    %20 = arith.truncf %19 : vector<16x16x4xf32> to vector<16x16x4xbf16>
    %21 = vector.shape_cast %20 : vector<16x16x4xbf16> to vector<256x4xbf16>
    %c0_25 = arith.constant 0 : index
    %c1_26 = arith.constant 1 : index
    %c0_27 = arith.constant 0 : index
    %22 = vector.load %arg7[%c0_25, %c1_26, %c0_27] : memref<18x18x4xf32, #tpu.memory_space<vmem>>, vector<16x16x4xf32>
    %23 = arith.truncf %22 : vector<16x16x4xf32> to vector<16x16x4xbf16>
    %24 = vector.shape_cast %23 : vector<16x16x4xbf16> to vector<256x4xbf16>
    %c0_28 = arith.constant 0 : index
    %c2 = arith.constant 2 : index
    %c0_29 = arith.constant 0 : index
    %25 = vector.load %arg7[%c0_28, %c2, %c0_29] : memref<18x18x4xf32, #tpu.memory_space<vmem>>, vector<16x16x4xf32>
    %26 = arith.truncf %25 : vector<16x16x4xf32> to vector<16x16x4xbf16>
    %27 = vector.shape_cast %26 : vector<16x16x4xbf16> to vector<256x4xbf16>
    %c1_30 = arith.constant 1 : index
    %c0_31 = arith.constant 0 : index
    %c0_32 = arith.constant 0 : index
    %28 = vector.load %arg7[%c1_30, %c0_31, %c0_32] : memref<18x18x4xf32, #tpu.memory_space<vmem>>, vector<16x16x4xf32>
    %29 = arith.truncf %28 : vector<16x16x4xf32> to vector<16x16x4xbf16>
    %30 = vector.shape_cast %29 : vector<16x16x4xbf16> to vector<256x4xbf16>
    %c1_33 = arith.constant 1 : index
    %c1_34 = arith.constant 1 : index
    %c0_35 = arith.constant 0 : index
    %31 = vector.load %arg7[%c1_33, %c1_34, %c0_35] : memref<18x18x4xf32, #tpu.memory_space<vmem>>, vector<16x16x4xf32>
    %32 = arith.truncf %31 : vector<16x16x4xf32> to vector<16x16x4xbf16>
    %33 = vector.shape_cast %32 : vector<16x16x4xbf16> to vector<256x4xbf16>
    %c1_36 = arith.constant 1 : index
    %c2_37 = arith.constant 2 : index
    %c0_38 = arith.constant 0 : index
    %34 = vector.load %arg7[%c1_36, %c2_37, %c0_38] : memref<18x18x4xf32, #tpu.memory_space<vmem>>, vector<16x16x4xf32>
    %35 = arith.truncf %34 : vector<16x16x4xf32> to vector<16x16x4xbf16>
    %36 = vector.shape_cast %35 : vector<16x16x4xbf16> to vector<256x4xbf16>
    %c2_39 = arith.constant 2 : index
    %c0_40 = arith.constant 0 : index
    %c0_41 = arith.constant 0 : index
    %37 = vector.load %arg7[%c2_39, %c0_40, %c0_41] : memref<18x18x4xf32, #tpu.memory_space<vmem>>, vector<16x16x4xf32>
    %38 = arith.truncf %37 : vector<16x16x4xf32> to vector<16x16x4xbf16>
    %39 = vector.shape_cast %38 : vector<16x16x4xbf16> to vector<256x4xbf16>
    %c2_42 = arith.constant 2 : index
    %c1_43 = arith.constant 1 : index
    %c0_44 = arith.constant 0 : index
    %40 = vector.load %arg7[%c2_42, %c1_43, %c0_44] : memref<18x18x4xf32, #tpu.memory_space<vmem>>, vector<16x16x4xf32>
    %41 = arith.truncf %40 : vector<16x16x4xf32> to vector<16x16x4xbf16>
    %42 = vector.shape_cast %41 : vector<16x16x4xbf16> to vector<256x4xbf16>
    %c2_45 = arith.constant 2 : index
    %c2_46 = arith.constant 2 : index
    %c0_47 = arith.constant 0 : index
    %43 = vector.load %arg7[%c2_45, %c2_46, %c0_47] : memref<18x18x4xf32, #tpu.memory_space<vmem>>, vector<16x16x4xf32>
    %44 = arith.truncf %43 : vector<16x16x4xf32> to vector<16x16x4xbf16>
    %45 = vector.shape_cast %44 : vector<16x16x4xbf16> to vector<256x4xbf16>
    %46 = tpu.concatenate %21, %24, %27, %30, %33, %36, %39, %42, %45 in 1 : vector<256x4xbf16>, vector<256x4xbf16>, vector<256x4xbf16>, vector<256x4xbf16>, vector<256x4xbf16>, vector<256x4xbf16>, vector<256x4xbf16>, vector<256x4xbf16>, vector<256x4xbf16> -> vector<256x36xbf16>
    %c0_48 = arith.constant 0 : index
    %c0_49 = arith.constant 0 : index
    %47 = vector.load %arg4[%c0_48, %c0_49] : memref<36x4xbf16, #tpu.memory_space<vmem>>, vector<36x4xbf16>
    %cst_50 = arith.constant dense<0.000000e+00> : vector<256x4xf32>
    %48 = tpu.matmul %46, %47, %cst_50 {dimension_numbers = #tpu.dot_dimension_numbers<[1], [0], [0], [1], [0, 0, 1, 1], [], []>} : vector<256x36xbf16>, vector<36x4xbf16>, vector<256x4xf32> -> vector<256x4xf32>
    %49 = vector.shape_cast %48 : vector<256x4xf32> to vector<1x16x16x4xf32>
    %c0_51 = arith.constant 0 : index
    %c0_52 = arith.constant 0 : index
    %c0_53 = arith.constant 0 : index
    %c0_54 = arith.constant 0 : index
    %50 = vector.load %arg5[%c0_51, %c0_52, %c0_53, %c0_54] : memref<1x16x16x4xf32, #tpu.memory_space<vmem>>, vector<1x16x16x4xf32>
    tpu.vector_store %arg5[%c0_51, %c0_52, %c0_53, %c0_54], %49 {strides = array<i32>} : memref<1x16x16x4xf32, #tpu.memory_space<vmem>>, vector<1x16x16x4xf32>,
    %cst_55 = arith.constant dense<0.000000e+00> : vector<4xf32>
    %51 = vector.multi_reduction <add>, %48, %cst_55 [0] : vector<256x4xf32> to vector<4xf32>
    %52 = vector.shape_cast %51 : vector<4xf32> to vector<1x4xf32>
    %53 = arith.mulf %48, %48 : vector<256x4xf32>
    %cst_56 = arith.constant dense<0.000000e+00> : vector<4xf32>
    %54 = vector.multi_reduction <add>, %53, %cst_56 [0] : vector<256x4xf32> to vector<4xf32>
    %55 = vector.shape_cast %54 : vector<4xf32> to vector<1x4xf32>
    %56 = tpu.concatenate %52, %55 in 0 : vector<1x4xf32>, vector<1x4xf32> -> vector<2x4xf32>
    %57 = vector.shape_cast %56 : vector<2x4xf32> to vector<1x2x4xf32>
    %c0_57 = arith.constant 0 : index
    %c0_58 = arith.constant 0 : index
    %c0_59 = arith.constant 0 : index
    %58 = vector.load %arg6[%c0_57, %c0_58, %c0_59] : memref<1x2x4xf32, #tpu.memory_space<vmem>>, vector<1x2x4xf32>
    tpu.vector_store %arg6[%c0_57, %c0_58, %c0_59], %57 {strides = array<i32>} : memref<1x2x4xf32, #tpu.memory_space<vmem>>, vector<1x2x4xf32>,
    return
  }
  func.func @transform_0(%arg0: i32) -> (i32, i32, i32, i32) {
    %c0_i32 = arith.constant 0 : i32
    %c0_i32_0 = arith.constant 0 : i32
    %c0_i32_1 = arith.constant 0 : i32
    %c0_i32_2 = arith.constant 0 : i32
    return %arg0, %c0_i32, %c0_i32_0, %c0_i32_1 : i32, i32, i32, i32
  }
  func.func @transform_1(%arg0: i32) -> (i32, i32) {
    %c0_i32 = arith.constant 0 : i32
    %c0_i32_0 = arith.constant 0 : i32
    %c0_i32_1 = arith.constant 0 : i32
    return %c0_i32, %c0_i32_0 : i32, i32
  }
  func.func @transform_2(%arg0: i32) -> (i32, i32) {
    %c0_i32 = arith.constant 0 : i32
    %c0_i32_0 = arith.constant 0 : i32
    %c0_i32_1 = arith.constant 0 : i32
    return %c0_i32, %c0_i32_0 : i32, i32
  }
  func.func @transform_3(%arg0: i32) -> (i32, i32) {
    %c0_i32 = arith.constant 0 : i32
    %c0_i32_0 = arith.constant 0 : i32
    %c0_i32_1 = arith.constant 0 : i32
    return %c0_i32, %c0_i32_0 : i32, i32
  }
  func.func @transform_4(%arg0: i32) -> (i32, i32, i32, i32) {
    %c0_i32 = arith.constant 0 : i32
    %c0_i32_0 = arith.constant 0 : i32
    %c0_i32_1 = arith.constant 0 : i32
    %c0_i32_2 = arith.constant 0 : i32
    return %arg0, %c0_i32, %c0_i32_0, %c0_i32_1 : i32, i32, i32, i32
  }
  func.func @transform_5(%arg0: i32) -> (i32, i32, i32) {
    %c0_i32 = arith.constant 0 : i32
    %c0_i32_0 = arith.constant 0 : i32
    %c0_i32_1 = arith.constant 0 : i32
    return %arg0, %c0_i32, %c0_i32_0 : i32, i32, i32
  }
}

module attributes {stable_mosaic.version = 11 : i64} {
  func.func @_bn_relu_conv1x1_stats_kernel(%arg0: i32, %arg1: memref<256x4xf32, #tpu.memory_space<vmem>>, %arg2: memref<1x4xf32, #tpu.memory_space<vmem>>, %arg3: memref<1x4xf32, #tpu.memory_space<vmem>>, %arg4: memref<4x8xbf16, #tpu.memory_space<vmem>>, %arg5: memref<256x8xf32, #tpu.memory_space<vmem>>, %arg6: memref<1x2x8xf32, #tpu.memory_space<vmem>>) attributes {dimension_semantics = [#tpu.dimension_semantics<parallel>], iteration_bounds = array<i64: 2>, scalar_prefetch = 0 : i64, scratch_operands = 0 : i64, tpu.core_type = #tpu.core_type<tc>, window_params = [{transform_indices = @transform_0, window_bounds = array<i64: 256, 4>}, {pipeline_mode = #tpu.pipeline_mode<synchronous>, transform_indices = @transform_1, window_bounds = array<i64: 1, 4>}, {pipeline_mode = #tpu.pipeline_mode<synchronous>, transform_indices = @transform_2, window_bounds = array<i64: 1, 4>}, {pipeline_mode = #tpu.pipeline_mode<synchronous>, transform_indices = @transform_3, window_bounds = array<i64: 4, 8>}, {transform_indices = @transform_4, window_bounds = array<i64: 256, 8>}, {transform_indices = @transform_5, window_bounds = array<i64: 1, 2, 8>}]} {
    %c0 = arith.constant 0 : index
    %c0_0 = arith.constant 0 : index
    %0 = vector.load %arg1[%c0, %c0_0] : memref<256x4xf32, #tpu.memory_space<vmem>>, vector<256x4xf32>
    %c0_1 = arith.constant 0 : index
    %c0_2 = arith.constant 0 : index
    %1 = vector.load %arg2[%c0_1, %c0_2] : memref<1x4xf32, #tpu.memory_space<vmem>>, vector<1x4xf32>
    %2 = vector.broadcast %1 : vector<1x4xf32> to vector<256x4xf32>
    %3 = arith.mulf %0, %2 : vector<256x4xf32>
    %c0_3 = arith.constant 0 : index
    %c0_4 = arith.constant 0 : index
    %4 = vector.load %arg3[%c0_3, %c0_4] : memref<1x4xf32, #tpu.memory_space<vmem>>, vector<1x4xf32>
    %5 = vector.broadcast %4 : vector<1x4xf32> to vector<256x4xf32>
    %6 = arith.addf %3, %5 : vector<256x4xf32>
    %cst = arith.constant 0.000000e+00 : f32
    %7 = vector.broadcast %cst : f32 to vector<256x4xf32>
    %8 = arith.maximumf %6, %7 : vector<256x4xf32>
    %9 = arith.truncf %8 : vector<256x4xf32> to vector<256x4xbf16>
    %c0_5 = arith.constant 0 : index
    %c0_6 = arith.constant 0 : index
    %10 = vector.load %arg4[%c0_5, %c0_6] : memref<4x8xbf16, #tpu.memory_space<vmem>>, vector<4x8xbf16>
    %cst_7 = arith.constant dense<0.000000e+00> : vector<256x8xf32>
    %11 = tpu.matmul %9, %10, %cst_7 {dimension_numbers = #tpu.dot_dimension_numbers<[1], [0], [0], [1], [0, 0, 1, 1], [], []>} : vector<256x4xbf16>, vector<4x8xbf16>, vector<256x8xf32> -> vector<256x8xf32>
    %c0_8 = arith.constant 0 : index
    %c0_9 = arith.constant 0 : index
    %12 = vector.load %arg5[%c0_8, %c0_9] : memref<256x8xf32, #tpu.memory_space<vmem>>, vector<256x8xf32>
    tpu.vector_store %arg5[%c0_8, %c0_9], %11 {strides = array<i32>} : memref<256x8xf32, #tpu.memory_space<vmem>>, vector<256x8xf32>,
    %cst_10 = arith.constant dense<0.000000e+00> : vector<8xf32>
    %13 = vector.multi_reduction <add>, %11, %cst_10 [0] : vector<256x8xf32> to vector<8xf32>
    %14 = vector.shape_cast %13 : vector<8xf32> to vector<1x8xf32>
    %15 = arith.mulf %11, %11 : vector<256x8xf32>
    %cst_11 = arith.constant dense<0.000000e+00> : vector<8xf32>
    %16 = vector.multi_reduction <add>, %15, %cst_11 [0] : vector<256x8xf32> to vector<8xf32>
    %17 = vector.shape_cast %16 : vector<8xf32> to vector<1x8xf32>
    %18 = tpu.concatenate %14, %17 in 0 : vector<1x8xf32>, vector<1x8xf32> -> vector<2x8xf32>
    %19 = vector.shape_cast %18 : vector<2x8xf32> to vector<1x2x8xf32>
    %c0_12 = arith.constant 0 : index
    %c0_13 = arith.constant 0 : index
    %c0_14 = arith.constant 0 : index
    %20 = vector.load %arg6[%c0_12, %c0_13, %c0_14] : memref<1x2x8xf32, #tpu.memory_space<vmem>>, vector<1x2x8xf32>
    tpu.vector_store %arg6[%c0_12, %c0_13, %c0_14], %19 {strides = array<i32>} : memref<1x2x8xf32, #tpu.memory_space<vmem>>, vector<1x2x8xf32>,
    return
  }
  func.func @transform_0(%arg0: i32) -> (i32, i32) {
    %c0_i32 = arith.constant 0 : i32
    %c0_i32_0 = arith.constant 0 : i32
    return %arg0, %c0_i32 : i32, i32
  }
  func.func @transform_1(%arg0: i32) -> (i32, i32) {
    %c0_i32 = arith.constant 0 : i32
    %c0_i32_0 = arith.constant 0 : i32
    %c0_i32_1 = arith.constant 0 : i32
    return %c0_i32, %c0_i32_0 : i32, i32
  }
  func.func @transform_2(%arg0: i32) -> (i32, i32) {
    %c0_i32 = arith.constant 0 : i32
    %c0_i32_0 = arith.constant 0 : i32
    %c0_i32_1 = arith.constant 0 : i32
    return %c0_i32, %c0_i32_0 : i32, i32
  }
  func.func @transform_3(%arg0: i32) -> (i32, i32) {
    %c0_i32 = arith.constant 0 : i32
    %c0_i32_0 = arith.constant 0 : i32
    %c0_i32_1 = arith.constant 0 : i32
    return %c0_i32, %c0_i32_0 : i32, i32
  }
  func.func @transform_4(%arg0: i32) -> (i32, i32) {
    %c0_i32 = arith.constant 0 : i32
    %c0_i32_0 = arith.constant 0 : i32
    return %arg0, %c0_i32 : i32, i32
  }
  func.func @transform_5(%arg0: i32) -> (i32, i32, i32) {
    %c0_i32 = arith.constant 0 : i32
    %c0_i32_0 = arith.constant 0 : i32
    %c0_i32_1 = arith.constant 0 : i32
    return %arg0, %c0_i32, %c0_i32_0 : i32, i32, i32
  }
}

module attributes {stable_mosaic.version = 11 : i64} {
  func.func @_bn_residual_relu_kernel(%arg0: i32, %arg1: memref<256x8xf32, #tpu.memory_space<vmem>>, %arg2: memref<256x8xf32, #tpu.memory_space<vmem>>, %arg3: memref<1x8xf32, #tpu.memory_space<vmem>>, %arg4: memref<1x8xf32, #tpu.memory_space<vmem>>, %arg5: memref<256x8xf32, #tpu.memory_space<vmem>>) attributes {dimension_semantics = [#tpu.dimension_semantics<parallel>], iteration_bounds = array<i64: 2>, scalar_prefetch = 0 : i64, scratch_operands = 0 : i64, tpu.core_type = #tpu.core_type<tc>, window_params = [{transform_indices = @transform_0, window_bounds = array<i64: 256, 8>}, {transform_indices = @transform_1, window_bounds = array<i64: 256, 8>}, {pipeline_mode = #tpu.pipeline_mode<synchronous>, transform_indices = @transform_2, window_bounds = array<i64: 1, 8>}, {pipeline_mode = #tpu.pipeline_mode<synchronous>, transform_indices = @transform_3, window_bounds = array<i64: 1, 8>}, {transform_indices = @transform_4, window_bounds = array<i64: 256, 8>}]} {
    %c0 = arith.constant 0 : index
    %c0_0 = arith.constant 0 : index
    %0 = vector.load %arg1[%c0, %c0_0] : memref<256x8xf32, #tpu.memory_space<vmem>>, vector<256x8xf32>
    %c0_1 = arith.constant 0 : index
    %c0_2 = arith.constant 0 : index
    %1 = vector.load %arg3[%c0_1, %c0_2] : memref<1x8xf32, #tpu.memory_space<vmem>>, vector<1x8xf32>
    %2 = vector.broadcast %1 : vector<1x8xf32> to vector<256x8xf32>
    %3 = arith.mulf %0, %2 : vector<256x8xf32>
    %c0_3 = arith.constant 0 : index
    %c0_4 = arith.constant 0 : index
    %4 = vector.load %arg4[%c0_3, %c0_4] : memref<1x8xf32, #tpu.memory_space<vmem>>, vector<1x8xf32>
    %5 = vector.broadcast %4 : vector<1x8xf32> to vector<256x8xf32>
    %6 = arith.addf %3, %5 : vector<256x8xf32>
    %c0_5 = arith.constant 0 : index
    %c0_6 = arith.constant 0 : index
    %7 = vector.load %arg2[%c0_5, %c0_6] : memref<256x8xf32, #tpu.memory_space<vmem>>, vector<256x8xf32>
    %8 = arith.addf %6, %7 : vector<256x8xf32>
    %cst = arith.constant 0.000000e+00 : f32
    %9 = vector.broadcast %cst : f32 to vector<256x8xf32>
    %10 = arith.maximumf %8, %9 : vector<256x8xf32>
    %c0_7 = arith.constant 0 : index
    %c0_8 = arith.constant 0 : index
    %11 = vector.load %arg5[%c0_7, %c0_8] : memref<256x8xf32, #tpu.memory_space<vmem>>, vector<256x8xf32>
    tpu.vector_store %arg5[%c0_7, %c0_8], %10 {strides = array<i32>} : memref<256x8xf32, #tpu.memory_space<vmem>>, vector<256x8xf32>,
    return
  }
  func.func @transform_0(%arg0: i32) -> (i32, i32) {
    %c0_i32 = arith.constant 0 : i32
    %c0_i32_0 = arith.constant 0 : i32
    return %arg0, %c0_i32 : i32, i32
  }
  func.func @transform_1(%arg0: i32) -> (i32, i32) {
    %c0_i32 = arith.constant 0 : i32
    %c0_i32_0 = arith.constant 0 : i32
    return %arg0, %c0_i32 : i32, i32
  }
  func.func @transform_2(%arg0: i32) -> (i32, i32) {
    %c0_i32 = arith.constant 0 : i32
    %c0_i32_0 = arith.constant 0 : i32
    %c0_i32_1 = arith.constant 0 : i32
    return %c0_i32, %c0_i32_0 : i32, i32
  }
  func.func @transform_3(%arg0: i32) -> (i32, i32) {
    %c0_i32 = arith.constant 0 : i32
    %c0_i32_0 = arith.constant 0 : i32
    %c0_i32_1 = arith.constant 0 : i32
    return %c0_i32, %c0_i32_0 : i32, i32
  }
  func.func @transform_4(%arg0: i32) -> (i32, i32) {
    %c0_i32 = arith.constant 0 : i32
    %c0_i32_0 = arith.constant 0 : i32
    return %arg0, %c0_i32 : i32, i32
  }
}

</mosaic_0001>

<bundles_post_ra>
// kernel: bottleblock.4
= control target key start
LH: loop header
LB: loop body
LE: loop exit
PB: predicated region body
PF: predicated region fallthrough
CT: control target
= control target key end

     0   :  { %s862_s12 = smov 0   ;;  %s1173_s0 = inlined_call_operand.vmem [shape: f32[512,8], index: 0, kind: input, shape index: {}]   ;;  %s1174_s1 = inlined_call_operand.vmem [shape: bf16[8,4], index: 1, kind: input, shape index: {}]   ;;  %s1175_s2 = inlined_call_operand.vmem [shape: f32[512,4], index: 2, kind: output, shape index: {0}]   ;;  %s1176_s3 = inlined_call_operand.vmem [shape: f32[2,2,4], index: 3, kind: output, shape index: {1}]  }
   0x1 LB: > { %s868_s13 = sadd.s32 4294967295, %s840_s12   ;;  %p747_p0 = scmp.ge.s32.totalorder %s840_s12, 1  ;;  %s840_s12 = sphi %s862_s12, %s14_s12  }
   0x2   : > { %p141_p1 = scmp.lt.s32.totalorder %s840_s12, 3 }
   0x4   : > { %p142_p2 = pnand %p747_p0, %p141_p1 }
   0x5   : > { %v234_v0 = vld [vmem:[%s1174_s1] sm:$0xf] (!%p142_p2)  ;;  %vm284_vm0 = vcmask (!%p142_p2), 1043456   ;;  %s748_s16 = sshll.u32 (!%p142_p2), %s868_s13, 5  ;;  %vm235_vm1 = vcmask (!%p142_p2), 64512   ;;  %vm449_vm2 = vcmask (!%p142_p2), 31744  }
   0x6   : > { %145 = sbr.rel (%p142_p2) target bundleno = 314 (0x13a), region = 28  ;;  %824 = vmatprep.subr.msk.bf16.mxu0 (!%p142_p2), %vm284_vm0, %v234_v0  ;;  %v286_v1 = vsel (!%p142_p2), %vm284_vm0, %v234_v0, 0  ;;  %p170_p3 = scmp.lt.s32.totalorder (!%p142_p2), %s748_s16, 63  ;;  %825 = vmatprep.subr.msk.bf16.mxu1 (!%p142_p2), %vm284_vm0, %v234_v0  ;;  %vm652_vm3 = vcmask (!%p142_p2), 1040384   ;;  %vm654_vm4 = vcmask (!%p142_p2), 25600  }
   0x7   : > { %789 = vmatpush3.bf16.msra.mxu0 (!%p142_p2), %v286_v1  ;;  %823 = vmatpush3.bf16.msra.mxu1 (!%p142_p2), %v286_v1  ;;  %p181_p4 = scmp.lt.s32.totalorder (!%p142_p2), %s868_s13, 1 }
   0xd   : > { %s1178_s16 = smov (!%p170_p3, %s748_s16), 63  ;;  %s1180_s13 = smov (!%p181_p4, %s868_s13), 1 }
   0xe   : > { %s749_s17 = sshll.u32 %s1178_s16, 3  ;;  %s752_s24 = sshll.u32 %s1180_s13, 1 }
   0xf   : > { %s884_s20 = scalar_lea.vmem %s1173_s0, %s749_s17  ;;  %s939_s23 = scalar_lea.vmem %s1175_s2, %s749_s17 }
  0x10   : > { %v186_v2 = vld [vmem:[%s884_s20] sm:$0xff]  ;;  %v187_v3 = vld [vmem:[%s884_s20 + $0x8] sm:$0xff]  ;;  %v188_v4 = vld [vmem:[%s884_s20 + $0x10] sm:$0xff]  ;;  %s184_s27 = scalar_lea.vmem %s1176_s3, %s752_s24 }
  0x11   : > { %v218_v5 = vpack.c.bf16 %v187_v3, %v186_v2  ;;  %v189_v6 = vld [vmem:[%s884_s20 + $0x18] sm:$0xff]  ;;  %v190_v7 = vld [vmem:[%s884_s20 + $0x20] sm:$0xff]  ;;  %v191_v8 = vld [vmem:[%s884_s20 + $0x28] sm:$0xff] }
  0x12   : > { %v219_v9 = vpack.c.bf16 %v189_v6, %v188_v4  ;;  %v220_v10 = vpack.c.bf16 %v191_v8, %v190_v7  ;;  %v192_v11 = vld [vmem:[%s884_s20 + $0x30] sm:$0xff]  ;;  %v193_v12 = vld [vmem:[%s884_s20 + $0x38] sm:$0xff]  ;;  %v194_v13 = vld [vmem:[%s884_s20 + $0x40] sm:$0xff] }
  0x13   : > { %790 = vmatprep.mubr.msk.bf16.mxu0 %vm235_vm1, %v218_v5  ;;  %v195_v14 = vld [vmem:[%s884_s20 + $0x48] sm:$0xff]  ;;  %v202_v15 = vld [vmem:[%s884_s20 + $0x80] sm:$0xff]  ;;  %v204_v18 = vld [vmem:[%s884_s20 + $0x90] sm:$0xff]  ;;  %v221_v23 = vpack.c.bf16 %v193_v12, %v192_v11 }
  0x14   : > { %791 = vmatmul.mubr.msk.bf16.vlgmr.msra.gmra.mrb[0].mxu0 %vm235_vm1, %v219_v9  ;;  %v203_v16 = vld [vmem:[%s884_s20 + $0x88] sm:$0xff]  ;;  %v205_v19 = vld [vmem:[%s884_s20 + $0x98] sm:$0xff]  ;;  %v206_v20 = vld [vmem:[%s884_s20 + $0xa0] sm:$0xff]  ;;  %v222_v25 = vpack.c.bf16 %v195_v14, %v194_v13 }
  0x15   : > { %794 = vmatprep.mubr.msk.bf16.mxu0 %vm235_vm1, %v220_v10  ;;  %v226_v17 = vpack.c.bf16 %v203_v16, %v202_v15  ;;  %v227_v21 = vpack.c.bf16 %v205_v19, %v204_v18  ;;  %v207_v22 = vld [vmem:[%s884_s20 + $0xa8] sm:$0xff]  ;;  %v208_v26 = vld [vmem:[%s884_s20 + $0xb0] sm:$0xff]  ;;  %v209_v27 = vld [vmem:[%s884_s20 + $0xb8] sm:$0xff] }
  0x16   : > { %v228_v24 = vpack.c.bf16 %v207_v22, %v206_v20  ;;  %v210_v28 = vld [vmem:[%s884_s20 + $0xc0] sm:$0xff]  ;;  %v211_v29 = vld [vmem:[%s884_s20 + $0xc8] sm:$0xff]  ;;  %v196_v30 = vld [vmem:[%s884_s20 + $0x50] sm:$0xff]  ;;  %v229_v32 = vpack.c.bf16 %v209_v27, %v208_v26 }
  0x17   : > { %806 = vmatprep.mubr.msk.bf16.mxu1 %vm235_vm1, %v226_v17  ;;  %v197_v31 = vld [vmem:[%s884_s20 + $0x58] sm:$0xff]  ;;  %v198_v33 = vld [vmem:[%s884_s20 + $0x60] sm:$0xff]  ;;  %v199_v34 = vld [vmem:[%s884_s20 + $0x68] sm:$0xff]  ;;  %v230_v35 = vpack.c.bf16 %v211_v29, %v210_v28 }
  0x18   : > { %807 = vmatmul.mubr.msk.bf16.vlgmr.msra.gmra.mrb[0].mxu1 %vm235_vm1, %v227_v21  ;;  %v223_v36 = vpack.c.bf16 %v197_v31, %v196_v30  ;;  %v224_v37 = vpack.c.bf16 %v199_v34, %v198_v33  ;;  %v212_v38 = vld [vmem:[%s884_s20 + $0xd0] sm:$0xff]  ;;  %v213_v39 = vld [vmem:[%s884_s20 + $0xd8] sm:$0xff]  ;;  %v214_v40 = vld [vmem:[%s884_s20 + $0xe0] sm:$0xff] }
  0x19   : > { %810 = vmatprep.mubr.msk.bf16.mxu1 %vm235_vm1, %v228_v24  ;;  %v215_v41 = vld [vmem:[%s884_s20 + $0xe8] sm:$0xff]  ;;  %v200_v42 = vld [vmem:[%s884_s20 + $0x70] sm:$0xff]  ;;  %v201_v43 = vld [vmem:[%s884_s20 + $0x78] sm:$0xff]  ;;  %v231_v44 = vpack.c.bf16 %v213_v39, %v212_v38 }
  0x1a   : > { %v232_v45 = vpack.c.bf16 %v215_v41, %v214_v40  ;;  %v225_v46 = vpack.c.bf16 %v201_v43, %v200_v42  ;;  %v216_v47 = vld [vmem:[%s884_s20 + $0xf0] sm:$0xff]  ;;  %v217_v48 = vld [vmem:[%s884_s20 + $0xf8] sm:$0xff] }
  0x1b   : > { %v233_v49 = vpack.c.bf16 %v217_v48, %v216_v47 }
  0x1c   : > { %795 = vmatmul.mubr.msk.bf16.gmra.mrb[4].mxu0 %vm235_vm1, %v221_v23 }
  0x1d   : > { %798 = vmatprep.mubr.msk.bf16.mxu0 %vm235_vm1, %v222_v25 }
  0x20   : > { %811 = vmatmul.mubr.msk.bf16.gmra.mrb[4].mxu1 %vm235_vm1, %v229_v32 }
  0x21   : > { %814 = vmatprep.mubr.msk.bf16.mxu1 %vm235_vm1, %v230_v35 }
  0x24   : > { %799 = vmatmul.mubr.msk.bf16.gmra.mrb[8].mxu0 %vm235_vm1, %v223_v36 }
  0x25   : > { %802 = vmatprep.mubr.msk.bf16.mxu0 %vm235_vm1, %v224_v37 }
  0x28   : > { %815 = vmatmul.mubr.msk.bf16.gmra.mrb[8].mxu1 %vm235_vm1, %v231_v44 }
  0x29   : > { %818 = vmatprep.mubr.msk.bf16.mxu1 %vm235_vm1, %v232_v45 }
  0x2c   : > { %803 = vmatmul.mubr.msk.bf16.gmra.mrb[12].mxu0 %vm235_vm1, %v225_v46 }
  0x30   : > { %819 = vmatmul.mubr.msk.bf16.gmra.mrb[12].mxu1 %vm235_vm1, %v233_v49 }
  0xe7   : > { %v792_v50 = vpop.f32.mrb[0].mxu0 }
  0xe8   : > { %452 = vst.msk [vmem:[%s939_s23 + $0x10] sm:$0xff] %vm449_vm2, %v792_v50  ;;  %v322_v51 = vpop.f32.mrb[1].mxu0  ;;  %v553_v55 = vmul.f32 %v792_v50, %v792_v50  ;;  %v485_v61 = vsel %vm449_vm2, %v792_v50, 0.0 }
  0xe9   : > { %450 = vst.msk [vmem:[%s939_s23] sm:$0xff] %vm449_vm2, %v322_v51  ;;  %v551_v52 = vmul.f32 %v322_v51, %v322_v51  ;;  %v793_v53 = vpop.f32.mrb[2].mxu0  ;;  %v482_v56 = vsel %vm449_vm2, %v322_v51, 0.0 }
  0xea   : > { %453 = vst.msk [vmem:[%s939_s23 + $0x18] sm:$0xff] %vm449_vm2, %v793_v53  ;;  %v325_v54 = vpop.f32.mrb[3].mxu0  ;;  %v554_v63 = vmul.f32 %v793_v53, %v793_v53  ;;  %v586_v5 = vsel %vm449_vm2, %v553_v55, 0.0  ;;  %v487_v6 = vsel %vm449_vm2, %v793_v53, 0.0 }
  0xeb   : > { %451 = vst.msk [vmem:[%s939_s23 + $0x8] sm:$0xff] %vm449_vm2, %v325_v54  ;;  %v483_v57 = vsel %vm449_vm2, %v325_v54, 0.0  ;;  %v552_v58 = vmul.f32 %v325_v54, %v325_v54  ;;  %v951_v60 = vpop.f32.mrb[0].mxu1  ;;  %v583_v62 = vsel %vm449_vm2, %v551_v52, 0.0 }
  0xec   : > { %v484_v59 = vadd.f32 %v483_v57, %v482_v56  ;;  %468 = vst.msk [vmem:[%s939_s23 + $0x90] sm:$0xff] %vm449_vm2, %v951_v60  ;;  %v959_v1 = vpop.f32.mrb[1].mxu1  ;;  %v588_v12 = vsel %vm449_vm2, %v554_v63, 0.0 }
  0xed   : > { %v584_v0 = vsel %vm449_vm2, %v552_v58, 0.0  ;;  %466 = vst.msk [vmem:[%s939_s23 + $0x80] sm:$0xff] %vm449_vm2, %v959_v1  ;;  %v964_v4 = vpop.f32.mrb[2].mxu1 }
  0xee   : > { %v486_v2 = vadd.f32 %v485_v61, %v484_v59  ;;  %v585_v3 = vadd.f32 %v584_v0, %v583_v62  ;;  %469 = vst.msk [vmem:[%s939_s23 + $0x98] sm:$0xff] %vm449_vm2, %v964_v4  ;;  %v971_v8 = vpop.f32.mrb[3].mxu1 }
  0xef   : > { %v796_v7 = vpop.f32.mrb[4].mxu0  ;;  %467 = vst.msk [vmem:[%s939_s23 + $0x88] sm:$0xff] %vm449_vm2, %v971_v8 }
  0xf0   : > { %v587_v9 = vadd.f32 %v586_v5, %v585_v3  ;;  %456 = vst.msk [vmem:[%s939_s23 + $0x30] sm:$0xff] %vm449_vm2, %v796_v7  ;;  %v338_v10 = vpop.f32.mrb[5].mxu0  ;;  %v488_v11 = vadd.f32 %v487_v6, %v486_v2  ;;  %v557_v19 = vmul.f32 %v796_v7, %v796_v7  ;;  %v493_v26 = vsel %vm449_vm2, %v796_v7, 0.0 }
  0xf1   : > { %454 = vst.msk [vmem:[%s939_s23 + $0x20] sm:$0xff] %vm449_vm2, %v338_v10  ;;  %v489_v13 = vsel %vm449_vm2, %v338_v10, 0.0  ;;  %v555_v14 = vmul.f32 %v338_v10, %v338_v10  ;;  %v797_v15 = vpop.f32.mrb[6].mxu0 }
  0xf2   : > { %v490_v16 = vadd.f32 %v489_v13, %v488_v11  ;;  %v589_v17 = vadd.f32 %v588_v12, %v587_v9  ;;  %457 = vst.msk [vmem:[%s939_s23 + $0x38] sm:$0xff] %vm449_vm2, %v797_v15  ;;  %v341_v18 = vpop.f32.mrb[7].mxu0  ;;  %v558_v27 = vmul.f32 %v797_v15, %v797_v15  ;;  %v594_v33 = vsel %vm449_vm2, %v557_v19, 0.0 }
  0xf3   : > { %v590_v20 = vsel %vm449_vm2, %v555_v14, 0.0  ;;  %455 = vst.msk [vmem:[%s939_s23 + $0x28] sm:$0xff] %vm449_vm2, %v341_v18  ;;  %v491_v21 = vsel %vm449_vm2, %v341_v18, 0.0  ;;  %v556_v22 = vmul.f32 %v341_v18, %v341_v18  ;;  %v988_v25 = vpop.f32.mrb[4].mxu1  ;;  %v495_v34 = vsel %vm449_vm2, %v797_v15, 0.0 }
  0xf4   : > { %v591_v23 = vadd.f32 %v590_v20, %v589_v17  ;;  %v492_v24 = vadd.f32 %v491_v21, %v490_v16  ;;  %472 = vst.msk [vmem:[%s939_s23 + $0xb0] sm:$0xff] %vm449_vm2, %v988_v25  ;;  %v995_v29 = vpop.f32.mrb[5].mxu1  ;;  %v596_v40 = vsel %vm449_vm2, %v558_v27, 0.0 }
  0xf5   : > { %v592_v28 = vsel %vm449_vm2, %v556_v22, 0.0  ;;  %470 = vst.msk [vmem:[%s939_s23 + $0xa0] sm:$0xff] %vm449_vm2, %v995_v29  ;;  %v1000_v32 = vpop.f32.mrb[6].mxu1 }
  0xf6   : > { %v494_v30 = vadd.f32 %v493_v26, %v492_v24  ;;  %v593_v31 = vadd.f32 %v592_v28, %v591_v23  ;;  %473 = vst.msk [vmem:[%s939_s23 + $0xb8] sm:$0xff] %vm449_vm2, %v1000_v32  ;;  %v1007_v36 = vpop.f32.mrb[7].mxu1  ;;  %v567_v26 = vmul.f32 %v959_v1, %v959_v1 }
  0xf7   : > { %v800_v35 = vpop.f32.mrb[8].mxu0  ;;  %471 = vst.msk [vmem:[%s939_s23 + $0xa8] sm:$0xff] %vm449_vm2, %v1007_v36 }
  0xf8   : > { %v595_v37 = vadd.f32 %v594_v33, %v593_v31  ;;  %460 = vst.msk [vmem:[%s939_s23 + $0x50] sm:$0xff] %vm449_vm2, %v800_v35  ;;  %v354_v38 = vpop.f32.mrb[9].mxu0  ;;  %v496_v39 = vadd.f32 %v495_v34, %v494_v30  ;;  %v561_v47 = vmul.f32 %v800_v35, %v800_v35  ;;  %v501_v54 = vsel %vm449_vm2, %v800_v35, 0.0 }
  0xf9   : > { %458 = vst.msk [vmem:[%s939_s23 + $0x40] sm:$0xff] %vm449_vm2, %v354_v38  ;;  %v497_v41 = vsel %vm449_vm2, %v354_v38, 0.0  ;;  %v559_v42 = vmul.f32 %v354_v38, %v354_v38  ;;  %v801_v43 = vpop.f32.mrb[10].mxu0  ;;  %v513_v31 = vsel %vm449_vm2, %v959_v1, 0.0 }
  0xfa   : > { %v498_v44 = vadd.f32 %v497_v41, %v496_v39  ;;  %v597_v45 = vadd.f32 %v596_v40, %v595_v37  ;;  %461 = vst.msk [vmem:[%s939_s23 + $0x58] sm:$0xff] %vm449_vm2, %v801_v43  ;;  %v357_v46 = vpop.f32.mrb[11].mxu0  ;;  %v562_v55 = vmul.f32 %v801_v43, %v801_v43  ;;  %v602_v62 = vsel %vm449_vm2, %v561_v47, 0.0 }
  0xfb   : > { %v598_v48 = vsel %vm449_vm2, %v559_v42, 0.0  ;;  %459 = vst.msk [vmem:[%s939_s23 + $0x48] sm:$0xff] %vm449_vm2, %v357_v46  ;;  %v499_v49 = vsel %vm449_vm2, %v357_v46, 0.0  ;;  %v560_v50 = vmul.f32 %v357_v46, %v357_v46  ;;  %v1024_v53 = vpop.f32.mrb[8].mxu1  ;;  %v503_v63 = vsel %vm449_vm2, %v801_v43, 0.0 }
  0xfc   : > { %v599_v51 = vadd.f32 %v598_v48, %v597_v45  ;;  %v500_v52 = vadd.f32 %v499_v49, %v498_v44  ;;  %476 = vst.msk [vmem:[%s939_s23 + $0xd0] sm:$0xff] %vm449_vm2, %v1024_v53  ;;  %v1031_v57 = vpop.f32.mrb[9].mxu1  ;;  %v604_v7 = vsel %vm449_vm2, %v562_v55, 0.0  ;;  %v614_v42 = vsel %vm449_vm2, %v567_v26, 0.0 }
  0xfd   : > { %v600_v56 = vsel %vm449_vm2, %v560_v50, 0.0  ;;  %474 = vst.msk [vmem:[%s939_s23 + $0xc0] sm:$0xff] %vm449_vm2, %v1031_v57  ;;  %v1036_v61 = vpop.f32.mrb[10].mxu1  ;;  %v568_v43 = vmul.f32 %v971_v8, %v971_v8  ;;  %v569_v47 = vmul.f32 %v951_v60, %v951_v60  ;;  %v515_v48 = vsel %vm449_vm2, %v971_v8, 0.0 }
  0xfe   : > { %v502_v58 = vadd.f32 %v501_v54, %v500_v52  ;;  %v601_v59 = vadd.f32 %v600_v56, %v599_v51  ;;  %477 = vst.msk [vmem:[%s939_s23 + $0xd8] sm:$0xff] %vm449_vm2, %v1036_v61  ;;  %v1043_v2 = vpop.f32.mrb[11].mxu1  ;;  %v517_v51 = vsel %vm449_vm2, %v951_v60, 0.0  ;;  %v570_v52 = vmul.f32 %v964_v4, %v964_v4 }
  0xff   : > { %v804_v0 = vpop.f32.mrb[12].mxu0  ;;  %475 = vst.msk [vmem:[%s939_s23 + $0xc8] sm:$0xff] %vm449_vm2, %v1043_v2  ;;  %v616_v54 = vsel %vm449_vm2, %v568_v43, 0.0  ;;  %v571_v55 = vmul.f32 %v995_v29, %v995_v29  ;;  %v519_v8 = vsel %vm449_vm2, %v964_v4, 0.0  ;;  %v523_v4 = vsel %vm449_vm2, %v1007_v36, 0.0 }
 0x100   : > { %v603_v3 = vadd.f32 %v602_v62, %v601_v59  ;;  %464 = vst.msk [vmem:[%s939_s23 + $0x70] sm:$0xff] %vm449_vm2, %v804_v0  ;;  %v370_v5 = vpop.f32.mrb[13].mxu0  ;;  %v504_v6 = vadd.f32 %v503_v63, %v502_v58  ;;  %v565_v15 = vmul.f32 %v804_v0, %v804_v0  ;;  %v509_v22 = vsel %vm449_vm2, %v804_v0, 0.0 }
 0x101   : > { %462 = vst.msk [vmem:[%s939_s23 + $0x60] sm:$0xff] %vm449_vm2, %v370_v5  ;;  %v505_v9 = vsel %vm449_vm2, %v370_v5, 0.0  ;;  %v563_v10 = vmul.f32 %v370_v5, %v370_v5  ;;  %v805_v11 = vpop.f32.mrb[14].mxu0  ;;  %v618_v59 = vsel %vm449_vm2, %v569_v47, 0.0  ;;  %v521_v62 = vsel %vm449_vm2, %v995_v29, 0.0 }
 0x102   : > { %v506_v12 = vadd.f32 %v505_v9, %v504_v6  ;;  %v605_v13 = vadd.f32 %v604_v7, %v603_v3  ;;  %465 = vst.msk [vmem:[%s939_s23 + $0x78] sm:$0xff] %vm449_vm2, %v805_v11  ;;  %v373_v14 = vpop.f32.mrb[15].mxu0  ;;  %v566_v23 = vmul.f32 %v805_v11, %v805_v11  ;;  %v610_v34 = vsel %vm449_vm2, %v565_v15, 0.0 }
 0x103   : > { %v606_v16 = vsel %vm449_vm2, %v563_v10, 0.0  ;;  %463 = vst.msk [vmem:[%s939_s23 + $0x68] sm:$0xff] %vm449_vm2, %v373_v14  ;;  %v507_v17 = vsel %vm449_vm2, %v373_v14, 0.0  ;;  %v564_v18 = vmul.f32 %v373_v14, %v373_v14  ;;  %v1060_v21 = vpop.f32.mrb[12].mxu1  ;;  %v511_v35 = vsel %vm449_vm2, %v805_v11, 0.0 }
 0x104   : > { %v607_v19 = vadd.f32 %v606_v16, %v605_v13  ;;  %v508_v20 = vadd.f32 %v507_v17, %v506_v12  ;;  %480 = vst.msk [vmem:[%s939_s23 + $0xf0] sm:$0xff] %vm449_vm2, %v1060_v21  ;;  %v1069_v27 = vpop.f32.mrb[13].mxu1  ;;  %v612_v1 = vsel %vm449_vm2, %v566_v23, 0.0  ;;  %v620_v0 = vsel %vm449_vm2, %v570_v52, 0.0 }
 0x105   : > { %v608_v24 = vsel %vm449_vm2, %v564_v18, 0.0  ;;  %478 = vst.msk [vmem:[%s939_s23 + $0xe0] sm:$0xff] %vm449_vm2, %v1069_v27  ;;  %v821_v33 = vpop.f32.mrb[14].mxu1  ;;  %v622_v3 = vsel %vm449_vm2, %v571_v55, 0.0  ;;  %v572_v5 = vmul.f32 %v1007_v36, %v1007_v36  ;;  %v573_v9 = vmul.f32 %v988_v25, %v988_v25 }
 0x106   : > { %v510_v28 = vadd.f32 %v509_v22, %v508_v20  ;;  %v609_v30 = vadd.f32 %v608_v24, %v607_v19  ;;  %481 = vst.msk [vmem:[%s939_s23 + $0xf8] sm:$0xff] %vm449_vm2, %v821_v33  ;;  %v1081_v37 = vsel %vm449_vm2, %v821_v33, 0.0  ;;  %v582_v38 = vmul.f32 %v821_v33, %v821_v33  ;;  %v1083_v39 = vpop.f32.mrb[15].mxu1 }
 0x107   : > { %479 = vst.msk [vmem:[%s939_s23 + $0xe8] sm:$0xff] %vm449_vm2, %v1083_v39  ;;  %v525_v29 = vsel %vm449_vm2, %v988_v25, 0.0  ;;  %v574_v12 = vmul.f32 %v1000_v32, %v1000_v32  ;;  %v624_v13 = vsel %vm449_vm2, %v572_v5, 0.0  ;;  %v575_v14 = vmul.f32 %v1031_v57, %v1031_v57 }
 0x108   : > { %v611_v40 = vadd.f32 %v610_v34, %v609_v30  ;;  %v512_v41 = vadd.f32 %v511_v35, %v510_v28  ;;  %v1093_v44 = vsel %vm449_vm2, %v582_v38, 0.0  ;;  %v626_v17 = vsel %vm449_vm2, %v573_v9, 0.0 }
 0x109   : > { %v527_v36 = vsel %vm449_vm2, %v1000_v32, 0.0  ;;  %v529_v18 = vsel %vm449_vm2, %v1031_v57, 0.0  ;;  %v628_v20 = vsel %vm449_vm2, %v574_v12, 0.0  ;;  %v630_v22 = vsel %vm449_vm2, %v575_v14, 0.0 }
 0x10a   : > { %v514_v45 = vadd.f32 %v513_v31, %v512_v41  ;;  %v613_v46 = vadd.f32 %v612_v1, %v611_v40  ;;  %v576_v23 = vmul.f32 %v1043_v2, %v1043_v2  ;;  %v577_v28 = vmul.f32 %v1024_v53, %v1024_v53 }
 0x10b   : > { %v531_v32 = vsel %vm449_vm2, %v1043_v2, 0.0  ;;  %v533_v57 = vsel %vm449_vm2, %v1024_v53, 0.0  ;;  %v578_v33 = vmul.f32 %v1036_v61, %v1036_v61  ;;  %v579_v35 = vmul.f32 %v1069_v27, %v1069_v27 }
 0x10c   : > { %v615_v49 = vadd.f32 %v614_v42, %v613_v46  ;;  %v516_v50 = vadd.f32 %v515_v48, %v514_v45  ;;  %v632_v34 = vsel %vm449_vm2, %v576_v23, 0.0  ;;  %v634_v41 = vsel %vm449_vm2, %v577_v28, 0.0 }
 0x10d   : > { %v535_v2 = vsel %vm449_vm2, %v1036_v61, 0.0  ;;  %v537_v1 = vsel %vm449_vm2, %v1069_v27, 0.0  ;;  %v636_v43 = vsel %vm449_vm2, %v578_v33, 0.0  ;;  %v638_v45 = vsel %vm449_vm2, %v579_v35, 0.0 }
 0x10e   : > { %v518_v56 = vadd.f32 %v517_v51, %v516_v50  ;;  %v617_v58 = vadd.f32 %v616_v54, %v615_v49  ;;  %v580_v46 = vmul.f32 %v1083_v39, %v1083_v39  ;;  %v581_v49 = vmul.f32 %v1060_v21, %v1060_v21 }
 0x10f   : > { %v539_v61 = vsel %vm449_vm2, %v1083_v39, 0.0  ;;  %v541_v51 = vsel %vm449_vm2, %v1060_v21, 0.0 }
 0x110   : > { %v619_v63 = vadd.f32 %v618_v59, %v617_v58  ;;  %v520_v60 = vadd.f32 %v519_v8, %v518_v56  ;;  %v640_v52 = vsel %vm449_vm2, %v580_v46, 0.0  ;;  %v642_v56 = vsel %vm449_vm2, %v581_v49, 0.0 }
 0x112   : > { %v522_v6 = vadd.f32 %v521_v62, %v520_v60  ;;  %v621_v7 = vadd.f32 %v620_v0, %v619_v63 }
 0x114   : > { %v623_v10 = vadd.f32 %v622_v3, %v621_v7  ;;  %v524_v11 = vadd.f32 %v523_v4, %v522_v6 }
 0x116   : > { %v526_v15 = vadd.f32 %v525_v29, %v524_v11  ;;  %v625_v16 = vadd.f32 %v624_v13, %v623_v10 }
 0x118   : > { %v627_v19 = vadd.f32 %v626_v17, %v625_v16  ;;  %v528_v25 = vadd.f32 %v527_v36, %v526_v15 }
 0x11a   : > { %v530_v24 = vadd.f32 %v529_v18, %v528_v25  ;;  %v629_v26 = vadd.f32 %v628_v20, %v627_v19 }
 0x11c   : > { %v631_v30 = vadd.f32 %v630_v22, %v629_v26  ;;  %v532_v31 = vadd.f32 %v531_v32, %v530_v24 }
 0x11e   : > { %v534_v38 = vadd.f32 %v533_v57, %v532_v31  ;;  %v633_v40 = vadd.f32 %v632_v34, %v631_v30 }
 0x120   : > { %v635_v42 = vadd.f32 %v634_v41, %v633_v40  ;;  %v536_v53 = vadd.f32 %v535_v2, %v534_v38 }
 0x122   : > { %v538_v47 = vadd.f32 %v537_v1, %v536_v53  ;;  %v637_v48 = vadd.f32 %v636_v43, %v635_v42 }
 0x124   : > { %v639_v50 = vadd.f32 %v638_v45, %v637_v48  ;;  %v540_v27 = vadd.f32 %v539_v61, %v538_v47 }
 0x126   : > { %v542_v54 = vadd.f32 %v541_v51, %v540_v27  ;;  %v641_v55 = vadd.f32 %v640_v52, %v639_v50 }
 0x128   : > { %v544_v58 = vadd.f32 %v1081_v37, %v542_v54  ;;  %v643_v59 = vadd.f32 %v642_v56, %v641_v55 }
 0x12a   : > { %v545_v8 = vrot.slane %v544_v58, 4  ;;  %v645_v62 = vadd.f32 %v1093_v44, %v643_v59 }
 0x12c   : > { %v546_v39 = vadd.f32 %v545_v8, %v544_v58  ;;  %v646_v63 = vrot.slane %v645_v62, 4 }
 0x12e   : > { %v547_v60 = vrot.slane %v546_v39, 2  ;;  %v647_v0 = vadd.f32 %v646_v63, %v645_v62 }
 0x130   : > { %v548_v3 = vadd.f32 %v547_v60, %v546_v39  ;;  %v648_v21 = vrot.slane %v647_v0, 2 }
 0x132   : > { %v549_v5 = vrot.slane %v548_v3, 1  ;;  %v649_v6 = vadd.f32 %v648_v21, %v647_v0 }
 0x134   : > { %v650_v7 = vrot.slane %v649_v6, 1  ;;  %v550_v37 = vadd.f32 %v549_v5, %v548_v3 }
 0x136   : > { %v651_v9 = vadd.f32 %v650_v7, %v649_v6 }
 0x138   : > { %v653_v44 = vsel %vm652_vm3, %v550_v37, %v651_v9 }
 0x139   : > { %655 = vst.msk [vmem:[%s184_s27] sm:$0x3] %vm654_vm4, %v653_v44 }
 0x13a PF: > { %s14_s12 = sadd.s32 1, %s840_s12  }
 0x13b   : > { %p11_p5 = scmp.ge.s32.totalorder %s14_s12, 4  }
 0x13d   :  { %13 = sbr.rel (!%p11_p5) target bundleno = 1 (0x1), region = 70 }

// kernel: bottleblock.7
= control target key start
LH: loop header
LB: loop body
LE: loop exit
PB: predicated region body
PF: predicated region fallthrough
CT: control target
= control target key end

     0   :  { %s586_s15 = smov 0   ;;  %s819_s0 = inlined_call_operand.vmem [shape: f32[512,8], index: 0, kind: input, shape index: {}]   ;;  %s820_s1 = inlined_call_operand.vmem [shape: f32[512,8], index: 1, kind: input, shape index: {}]   ;;  %s821_s2 = inlined_call_operand.vmem [shape: f32[1,8], index: 2, kind: input, shape index: {}]   ;;  %s822_s3 = inlined_call_operand.vmem [shape: f32[1,8], index: 3, kind: input, shape index: {}]   ;;  %s823_s4 = inlined_call_operand.vmem [shape: f32[512,8], index: 4, kind: output, shape index: {}]  }
   0x1 LB: > { %s530_s16 = sadd.s32 4294967295, %s559_s15   ;;  %p534_p0 = scmp.ge.s32.totalorder %s559_s15, 1  ;;  %s559_s15 = sphi %s586_s15, %s14_s15  }
   0x2   : > { %p174_p1 = scmp.lt.s32.totalorder %s559_s15, 3 }
   0x4   : > { %p175_p2 = pnand %p534_p0, %p174_p1 }
   0x5   : > { %s535_s17 = sshll.u32 (!%p175_p2), %s530_s16, 5  ;;  %v599_v0 = vld [vmem:[%s821_s2] ss:$0 sm:$0xff] (!%p175_p2)  ;;  %vm429_vm0 = vcmask (!%p175_p2), 64512  }
   0x6   : > { %178 = sbr.rel (%p175_p2) target bundleno = 55 (0x37), region = 36  ;;  %p206_p3 = scmp.lt.s32.totalorder (!%p175_p2), %s535_s17, 63  ;;  %v617_v2 = vld [vmem:[%s822_s3] ss:$0 sm:$0xff] (!%p175_p2) }
   0xd   : > { %s825_s17 = smov (!%p206_p3, %s535_s17), 63 }
   0xe   : > { %s594_s18 = sshll.u32 %s825_s17, 3 }
   0xf   : > { %s605_s23 = scalar_lea.vmem %s819_s0, %s594_s18  ;;  %s611_s26 = scalar_lea.vmem %s820_s1, %s594_s18 }
  0x10   : > { %v223_v1 = vld [vmem:[%s605_s23] sm:$0xff]  ;;  %v224_v3 = vld [vmem:[%s605_s23 + $0x8] sm:$0xff]  ;;  %v225_v7 = vld [vmem:[%s605_s23 + $0x10] sm:$0xff]  ;;  %s647_s5 = scalar_lea.vmem %s823_s4, %s594_s18 }
  0x11   : > { %v262_v4 = vmul.f32 %v599_v0, %v223_v1  ;;  %v333_v5 = vld [vmem:[%s611_s26] sm:$0xff]  ;;  %v263_v6 = vmul.f32 %v599_v0, %v224_v3  ;;  %v334_v8 = vld [vmem:[%s611_s26 + $0x8] sm:$0xff]  ;;  %v264_v9 = vmul.f32 %v599_v0, %v225_v7  ;;  %v226_v10 = vld [vmem:[%s605_s23 + $0x18] sm:$0xff] }
  0x12   : > { %v227_v11 = vld [vmem:[%s605_s23 + $0x20] sm:$0xff]  ;;  %v335_v14 = vld [vmem:[%s611_s26 + $0x10] sm:$0xff]  ;;  %v265_v15 = vmul.f32 %v599_v0, %v226_v10  ;;  %v336_v16 = vld [vmem:[%s611_s26 + $0x18] sm:$0xff] }
  0x13   : > { %v301_v12 = vadd.f32 %v617_v2, %v262_v4  ;;  %v302_v13 = vadd.f32 %v617_v2, %v263_v6  ;;  %v266_v17 = vmul.f32 %v599_v0, %v227_v11  ;;  %v228_v18 = vld [vmem:[%s605_s23 + $0x28] sm:$0xff]  ;;  %v303_v19 = vadd.f32 %v617_v2, %v264_v9  ;;  %v337_v20 = vld [vmem:[%s611_s26 + $0x20] sm:$0xff]  ;;  %v229_v22 = vld [vmem:[%s605_s23 + $0x30] sm:$0xff] }
  0x14   : > { %v267_v21 = vmul.f32 %v599_v0, %v228_v18  ;;  %v230_v23 = vld [vmem:[%s605_s23 + $0x38] sm:$0xff]  ;;  %v304_v26 = vadd.f32 %v617_v2, %v265_v15  ;;  %v338_v28 = vld [vmem:[%s611_s26 + $0x28] sm:$0xff]  ;;  %v268_v31 = vmul.f32 %v599_v0, %v229_v22  ;;  %v231_v33 = vld [vmem:[%s605_s23 + $0x40] sm:$0xff] }
  0x15   : > { %v365_v24 = vadd.f32 %v333_v5, %v301_v12  ;;  %v366_v25 = vadd.f32 %v334_v8, %v302_v13  ;;  %v305_v27 = vadd.f32 %v617_v2, %v266_v17  ;;  %v367_v29 = vadd.f32 %v335_v14, %v303_v19  ;;  %v232_v34 = vld [vmem:[%s605_s23 + $0x48] sm:$0xff]  ;;  %v339_v39 = vld [vmem:[%s611_s26 + $0x30] sm:$0xff]  ;;  %v340_v40 = vld [vmem:[%s611_s26 + $0x38] sm:$0xff] }
  0x16   : > { %v306_v30 = vadd.f32 %v617_v2, %v267_v21  ;;  %v269_v32 = vmul.f32 %v599_v0, %v230_v23  ;;  %v368_v37 = vadd.f32 %v336_v16, %v304_v26  ;;  %v233_v41 = vld [vmem:[%s605_s23 + $0x50] sm:$0xff]  ;;  %v307_v44 = vadd.f32 %v617_v2, %v268_v31  ;;  %v234_v46 = vld [vmem:[%s605_s23 + $0x58] sm:$0xff]  ;;  %v235_v47 = vld [vmem:[%s605_s23 + $0x60] sm:$0xff] }
  0x17   : > { %v397_v35 = vmax.f32 %v365_v24, 0.0  ;;  %v398_v36 = vmax.f32 %v366_v25, 0.0  ;;  %v369_v38 = vadd.f32 %v337_v20, %v305_v27  ;;  %v399_v42 = vmax.f32 %v367_v29, 0.0  ;;  %v236_v52 = vld [vmem:[%s605_s23 + $0x68] sm:$0xff]  ;;  %v341_v56 = vld [vmem:[%s611_s26 + $0x40] sm:$0xff]  ;;  %v343_v61 = vld [vmem:[%s611_s26 + $0x50] sm:$0xff] }
  0x18   : > { %v370_v43 = vadd.f32 %v338_v28, %v306_v30  ;;  %v308_v45 = vadd.f32 %v617_v2, %v269_v32  ;;  %v400_v48 = vmax.f32 %v368_v37, 0.0  ;;  %v270_v50 = vmul.f32 %v599_v0, %v231_v33  ;;  %v342_v57 = vld [vmem:[%s611_s26 + $0x48] sm:$0xff]  ;;  %v237_v1 = vld [vmem:[%s605_s23 + $0x70] sm:$0xff]  ;;  %v238_v3 = vld [vmem:[%s605_s23 + $0x78] sm:$0xff] }
  0x19   : > { %430 = vst.msk [vmem:[%s647_s5] sm:$0xff] %vm429_vm0, %v397_v35  ;;  %431 = vst.msk [vmem:[%s647_s5 + $0x8] sm:$0xff] %vm429_vm0, %v398_v36  ;;  %v401_v49 = vmax.f32 %v369_v38, 0.0  ;;  %v271_v51 = vmul.f32 %v599_v0, %v232_v34  ;;  %v371_v54 = vadd.f32 %v339_v39, %v307_v44  ;;  %v272_v58 = vmul.f32 %v599_v0, %v233_v41  ;;  %v344_v7 = vld [vmem:[%s611_s26 + $0x58] sm:$0xff]  ;;  %v345_v8 = vld [vmem:[%s611_s26 + $0x60] sm:$0xff] }
  0x1a   : > { %432 = vst.msk [vmem:[%s647_s5 + $0x10] sm:$0xff] %vm429_vm0, %v399_v42  ;;  %v402_v53 = vmax.f32 %v370_v43, 0.0  ;;  %v372_v55 = vadd.f32 %v340_v40, %v308_v45  ;;  %433 = vst.msk [vmem:[%s647_s5 + $0x18] sm:$0xff] %vm429_vm0, %v400_v48  ;;  %v309_v59 = vadd.f32 %v617_v2, %v270_v50  ;;  %v273_v62 = vmul.f32 %v599_v0, %v234_v46  ;;  %v346_v14 = vld [vmem:[%s611_s26 + $0x68] sm:$0xff]  ;;  %v239_v19 = vld [vmem:[%s605_s23 + $0x80] sm:$0xff] }
  0x1b   : > { %434 = vst.msk [vmem:[%s647_s5 + $0x20] sm:$0xff] %vm429_vm0, %v401_v49  ;;  %v310_v60 = vadd.f32 %v617_v2, %v271_v51  ;;  %v274_v63 = vmul.f32 %v599_v0, %v235_v47  ;;  %v403_v4 = vmax.f32 %v371_v54, 0.0  ;;  %v311_v6 = vadd.f32 %v617_v2, %v272_v58  ;;  %v240_v20 = vld [vmem:[%s605_s23 + $0x88] sm:$0xff]  ;;  %v347_v25 = vld [vmem:[%s611_s26 + $0x70] sm:$0xff]  ;;  %v348_v26 = vld [vmem:[%s611_s26 + $0x78] sm:$0xff] }
  0x1c   : > { %435 = vst.msk [vmem:[%s647_s5 + $0x28] sm:$0xff] %vm429_vm0, %v402_v53  ;;  %v404_v5 = vmax.f32 %v372_v55, 0.0  ;;  %v275_v9 = vmul.f32 %v599_v0, %v236_v52  ;;  %v373_v10 = vadd.f32 %v341_v56, %v309_v59  ;;  %v312_v12 = vadd.f32 %v617_v2, %v273_v62  ;;  %v241_v27 = vld [vmem:[%s605_s23 + $0x90] sm:$0xff]  ;;  %v242_v32 = vld [vmem:[%s605_s23 + $0x98] sm:$0xff]  ;;  %v243_v33 = vld [vmem:[%s605_s23 + $0xa0] sm:$0xff] }
  0x1d   : > { %v374_v11 = vadd.f32 %v342_v57, %v310_v60  ;;  %v313_v13 = vadd.f32 %v617_v2, %v274_v63  ;;  %436 = vst.msk [vmem:[%s647_s5 + $0x30] sm:$0xff] %vm429_vm0, %v403_v4  ;;  %v375_v15 = vadd.f32 %v343_v61, %v311_v6  ;;  %v276_v17 = vmul.f32 %v599_v0, %v237_v1  ;;  %v244_v38 = vld [vmem:[%s605_s23 + $0xa8] sm:$0xff]  ;;  %v349_v42 = vld [vmem:[%s611_s26 + $0x80] sm:$0xff]  ;;  %v351_v47 = vld [vmem:[%s611_s26 + $0x90] sm:$0xff] }
  0x1e   : > { %437 = vst.msk [vmem:[%s647_s5 + $0x38] sm:$0xff] %vm429_vm0, %v404_v5  ;;  %v314_v16 = vadd.f32 %v617_v2, %v275_v9  ;;  %v277_v18 = vmul.f32 %v599_v0, %v238_v3  ;;  %v405_v21 = vmax.f32 %v373_v10, 0.0  ;;  %v376_v23 = vadd.f32 %v344_v7, %v312_v12  ;;  %v350_v43 = vld [vmem:[%s611_s26 + $0x88] sm:$0xff]  ;;  %v245_v50 = vld [vmem:[%s605_s23 + $0xb0] sm:$0xff]  ;;  %v246_v51 = vld [vmem:[%s605_s23 + $0xb8] sm:$0xff] }
  0x1f   : > { %v406_v22 = vmax.f32 %v374_v11, 0.0  ;;  %v377_v24 = vadd.f32 %v345_v8, %v313_v13  ;;  %v407_v28 = vmax.f32 %v375_v15, 0.0  ;;  %v315_v30 = vadd.f32 %v617_v2, %v276_v17  ;;  %v352_v55 = vld [vmem:[%s611_s26 + $0x98] sm:$0xff]  ;;  %v353_v56 = vld [vmem:[%s611_s26 + $0xa0] sm:$0xff]  ;;  %v354_v62 = vld [vmem:[%s611_s26 + $0xa8] sm:$0xff] }
  0x20   : > { %v378_v29 = vadd.f32 %v346_v14, %v314_v16  ;;  %v316_v31 = vadd.f32 %v617_v2, %v277_v18  ;;  %438 = vst.msk [vmem:[%s647_s5 + $0x40] sm:$0xff] %vm429_vm0, %v405_v21  ;;  %v408_v34 = vmax.f32 %v376_v23, 0.0  ;;  %v278_v36 = vmul.f32 %v599_v0, %v239_v19  ;;  %v247_v5 = vld [vmem:[%s605_s23 + $0xc0] sm:$0xff]  ;;  %v248_v6 = vld [vmem:[%s605_s23 + $0xc8] sm:$0xff]  ;;  %v355_v11 = vld [vmem:[%s611_s26 + $0xb0] sm:$0xff] }
  0x21   : > { %439 = vst.msk [vmem:[%s647_s5 + $0x48] sm:$0xff] %vm429_vm0, %v406_v22  ;;  %v409_v35 = vmax.f32 %v377_v24, 0.0  ;;  %v279_v37 = vmul.f32 %v599_v0, %v240_v20  ;;  %440 = vst.msk [vmem:[%s647_s5 + $0x50] sm:$0xff] %vm429_vm0, %v407_v28  ;;  %v379_v40 = vadd.f32 %v347_v25, %v315_v30  ;;  %v280_v44 = vmul.f32 %v599_v0, %v241_v27  ;;  %v356_v12 = vld [vmem:[%s611_s26 + $0xb8] sm:$0xff]  ;;  %v249_v13 = vld [vmem:[%s605_s23 + $0xd0] sm:$0xff] }
  0x22   : > { %v410_v39 = vmax.f32 %v378_v29, 0.0  ;;  %v380_v41 = vadd.f32 %v348_v26, %v316_v31  ;;  %441 = vst.msk [vmem:[%s647_s5 + $0x58] sm:$0xff] %vm429_vm0, %v408_v34  ;;  %v317_v45 = vadd.f32 %v617_v2, %v278_v36  ;;  %v281_v48 = vmul.f32 %v599_v0, %v242_v32  ;;  %v250_v18 = vld [vmem:[%s605_s23 + $0xd8] sm:$0xff]  ;;  %v251_v19 = vld [vmem:[%s605_s23 + $0xe0] sm:$0xff]  ;;  %v252_v24 = vld [vmem:[%s605_s23 + $0xe8] sm:$0xff] }
  0x23   : > { %442 = vst.msk [vmem:[%s647_s5 + $0x60] sm:$0xff] %vm429_vm0, %v409_v35  ;;  %v318_v46 = vadd.f32 %v617_v2, %v279_v37  ;;  %v282_v49 = vmul.f32 %v599_v0, %v243_v33  ;;  %v411_v52 = vmax.f32 %v379_v40, 0.0  ;;  %v319_v54 = vadd.f32 %v617_v2, %v280_v44  ;;  %v357_v28 = vld [vmem:[%s611_s26 + $0xc0] sm:$0xff]  ;;  %v358_v29 = vld [vmem:[%s611_s26 + $0xc8] sm:$0xff]  ;;  %v359_v33 = vld [vmem:[%s611_s26 + $0xd0] sm:$0xff] }
  0x24   : > { %443 = vst.msk [vmem:[%s647_s5 + $0x68] sm:$0xff] %vm429_vm0, %v410_v39  ;;  %v412_v53 = vmax.f32 %v380_v41, 0.0  ;;  %v283_v57 = vmul.f32 %v599_v0, %v244_v38  ;;  %v381_v58 = vadd.f32 %v349_v42, %v317_v45  ;;  %v320_v60 = vadd.f32 %v617_v2, %v281_v48  ;;  %v253_v36 = vld [vmem:[%s605_s23 + $0xf0] sm:$0xff]  ;;  %v254_v37 = vld [vmem:[%s605_s23 + $0xf8] sm:$0xff]  ;;  %v361_v42 = vld [vmem:[%s611_s26 + $0xe0] sm:$0xff] }
  0x25   : > { %v382_v59 = vadd.f32 %v350_v43, %v318_v46  ;;  %v321_v61 = vadd.f32 %v617_v2, %v282_v49  ;;  %444 = vst.msk [vmem:[%s647_s5 + $0x70] sm:$0xff] %vm429_vm0, %v411_v52  ;;  %v383_v63 = vadd.f32 %v351_v47, %v319_v54  ;;  %v284_v3 = vmul.f32 %v599_v0, %v245_v50  ;;  %v360_v41 = vld [vmem:[%s611_s26 + $0xd8] sm:$0xff]  ;;  %v362_v48 = vld [vmem:[%s611_s26 + $0xe8] sm:$0xff] }
  0x26   : > { %445 = vst.msk [vmem:[%s647_s5 + $0x78] sm:$0xff] %vm429_vm0, %v412_v53  ;;  %v322_v1 = vadd.f32 %v617_v2, %v283_v57  ;;  %v285_v4 = vmul.f32 %v599_v0, %v246_v51  ;;  %v413_v7 = vmax.f32 %v381_v58, 0.0  ;;  %v384_v9 = vadd.f32 %v352_v55, %v320_v60  ;;  %v363_v57 = vld [vmem:[%s611_s26 + $0xf0] sm:$0xff]  ;;  %v364_v58 = vld [vmem:[%s611_s26 + $0xf8] sm:$0xff] }
  0x27   : > { %v414_v8 = vmax.f32 %v382_v59, 0.0  ;;  %v385_v10 = vadd.f32 %v353_v56, %v321_v61  ;;  %v415_v14 = vmax.f32 %v383_v63, 0.0  ;;  %v323_v16 = vadd.f32 %v617_v2, %v284_v3 }
  0x28   : > { %v386_v15 = vadd.f32 %v354_v62, %v322_v1  ;;  %v324_v17 = vadd.f32 %v617_v2, %v285_v4  ;;  %446 = vst.msk [vmem:[%s647_s5 + $0x80] sm:$0xff] %vm429_vm0, %v413_v7  ;;  %v416_v20 = vmax.f32 %v384_v9, 0.0  ;;  %v286_v22 = vmul.f32 %v599_v0, %v247_v5 }
  0x29   : > { %447 = vst.msk [vmem:[%s647_s5 + $0x88] sm:$0xff] %vm429_vm0, %v414_v8  ;;  %v417_v21 = vmax.f32 %v385_v10, 0.0  ;;  %v287_v23 = vmul.f32 %v599_v0, %v248_v6  ;;  %448 = vst.msk [vmem:[%s647_s5 + $0x90] sm:$0xff] %vm429_vm0, %v415_v14  ;;  %v387_v26 = vadd.f32 %v355_v11, %v323_v16  ;;  %v288_v30 = vmul.f32 %v599_v0, %v249_v13 }
  0x2a   : > { %v418_v25 = vmax.f32 %v386_v15, 0.0  ;;  %v388_v27 = vadd.f32 %v356_v12, %v324_v17  ;;  %449 = vst.msk [vmem:[%s647_s5 + $0x98] sm:$0xff] %vm429_vm0, %v416_v20  ;;  %v325_v31 = vadd.f32 %v617_v2, %v286_v22  ;;  %v289_v34 = vmul.f32 %v599_v0, %v250_v18 }
  0x2b   : > { %450 = vst.msk [vmem:[%s647_s5 + $0xa0] sm:$0xff] %vm429_vm0, %v417_v21  ;;  %v326_v32 = vadd.f32 %v617_v2, %v287_v23  ;;  %v290_v35 = vmul.f32 %v599_v0, %v251_v19  ;;  %v419_v38 = vmax.f32 %v387_v26, 0.0  ;;  %v327_v40 = vadd.f32 %v617_v2, %v288_v30 }
  0x2c   : > { %451 = vst.msk [vmem:[%s647_s5 + $0xa8] sm:$0xff] %vm429_vm0, %v418_v25  ;;  %v420_v39 = vmax.f32 %v388_v27, 0.0  ;;  %v291_v43 = vmul.f32 %v599_v0, %v252_v24  ;;  %v389_v44 = vadd.f32 %v357_v28, %v325_v31  ;;  %v328_v46 = vadd.f32 %v617_v2, %v289_v34 }
  0x2d   : > { %v390_v45 = vadd.f32 %v358_v29, %v326_v32  ;;  %v329_v47 = vadd.f32 %v617_v2, %v290_v35  ;;  %452 = vst.msk [vmem:[%s647_s5 + $0xb0] sm:$0xff] %vm429_vm0, %v419_v38  ;;  %v391_v49 = vadd.f32 %v359_v33, %v327_v40  ;;  %v292_v51 = vmul.f32 %v599_v0, %v253_v36 }
  0x2e   : > { %453 = vst.msk [vmem:[%s647_s5 + $0xb8] sm:$0xff] %vm429_vm0, %v420_v39  ;;  %v330_v50 = vadd.f32 %v617_v2, %v291_v43  ;;  %v293_v52 = vmul.f32 %v599_v0, %v254_v37  ;;  %v421_v53 = vmax.f32 %v389_v44, 0.0  ;;  %v392_v55 = vadd.f32 %v360_v41, %v328_v46 }
  0x2f   : > { %v422_v54 = vmax.f32 %v390_v45, 0.0  ;;  %v393_v56 = vadd.f32 %v361_v42, %v329_v47  ;;  %v423_v59 = vmax.f32 %v391_v49, 0.0  ;;  %v331_v61 = vadd.f32 %v617_v2, %v292_v51 }
  0x30   : > { %v394_v60 = vadd.f32 %v362_v48, %v330_v50  ;;  %v332_v62 = vadd.f32 %v617_v2, %v293_v52  ;;  %454 = vst.msk [vmem:[%s647_s5 + $0xc0] sm:$0xff] %vm429_vm0, %v421_v53  ;;  %v424_v0 = vmax.f32 %v392_v55, 0.0 }
  0x31   : > { %455 = vst.msk [vmem:[%s647_s5 + $0xc8] sm:$0xff] %vm429_vm0, %v422_v54  ;;  %v425_v63 = vmax.f32 %v393_v56, 0.0  ;;  %456 = vst.msk [vmem:[%s647_s5 + $0xd0] sm:$0xff] %vm429_vm0, %v423_v59  ;;  %v395_v3 = vadd.f32 %v363_v57, %v331_v61 }
  0x32   : > { %v426_v1 = vmax.f32 %v394_v60, 0.0  ;;  %v396_v4 = vadd.f32 %v364_v58, %v332_v62  ;;  %457 = vst.msk [vmem:[%s647_s5 + $0xd8] sm:$0xff] %vm429_vm0, %v424_v0 }
  0x33   : > { %458 = vst.msk [vmem:[%s647_s5 + $0xe0] sm:$0xff] %vm429_vm0, %v425_v63  ;;  %v427_v5 = vmax.f32 %v395_v3, 0.0 }
  0x34   : > { %459 = vst.msk [vmem:[%s647_s5 + $0xe8] sm:$0xff] %vm429_vm0, %v426_v1  ;;  %v428_v6 = vmax.f32 %v396_v4, 0.0 }
  0x35   : > { %460 = vst.msk [vmem:[%s647_s5 + $0xf0] sm:$0xff] %vm429_vm0, %v427_v5 }
  0x36   : > { %461 = vst.msk [vmem:[%s647_s5 + $0xf8] sm:$0xff] %vm429_vm0, %v428_v6 }
  0x37 PF: > { %s14_s15 = sadd.s32 1, %s559_s15  }
  0x38   : > { %p11_p4 = scmp.ge.s32.totalorder %s14_s15, 4  }
  0x3a   :  { %13 = sbr.rel (!%p11_p4) target bundleno = 1 (0x1), region = 69 }

// kernel: bottleblock.6
= control target key start
LH: loop header
LB: loop body
LE: loop exit
PB: predicated region body
PF: predicated region fallthrough
CT: control target
= control target key end

     0   :  { %s1038_s18 = smov 0   ;;  %s1396_s0 = inlined_call_operand.vmem [shape: f32[512,4], index: 0, kind: input, shape index: {}]   ;;  %s1397_s1 = inlined_call_operand.vmem [shape: f32[1,4], index: 1, kind: input, shape index: {}]   ;;  %s1398_s2 = inlined_call_operand.vmem [shape: f32[1,4], index: 2, kind: input, shape index: {}]   ;;  %s1399_s3 = inlined_call_operand.vmem [shape: bf16[4,8], index: 3, kind: input, shape index: {}]   ;;  %s1400_s4 = inlined_call_operand.vmem [shape: f32[512,8], index: 4, kind: output, shape index: {0}]   ;;  %s1401_s5 = inlined_call_operand.vmem [shape: f32[2,2,8], index: 5, kind: output, shape index: {1}]  }
   0x1 LB: > { %s1044_s19 = sadd.s32 4294967295, %s1006_s18   ;;  %p911_p0 = scmp.ge.s32.totalorder %s1006_s18, 1  ;;  %s1006_s18 = sphi %s1038_s18, %s16_s18  }
   0x2   : > { %p191_p1 = scmp.lt.s32.totalorder %s1006_s18, 3 }
   0x4   : > { %p192_p2 = pnand %p911_p0, %p191_p1 }
   0x5   : > { %v398_v0 = vld [vmem:[%s1399_s3] sm:$0x3] (!%p192_p2)  ;;  %vm448_vm0 = vcmask (!%p192_p2), 1041408   ;;  %s912_s22 = sshll.u32 (!%p192_p2), %s1044_s19, 5  ;;  %vm399_vm1 = vcmask (!%p192_p2), 31744   ;;  %vm613_vm2 = vcmask (!%p192_p2), 64512  }
   0x6   : > { %195 = sbr.rel (%p192_p2) target bundleno = 320 (0x140), region = 36  ;;  %990 = vmatprep.subr.msk.bf16.mxu0 (!%p192_p2), %vm448_vm0, %v398_v0  ;;  %v450_v1 = vsel (!%p192_p2), %vm448_vm0, %v398_v0, 0  ;;  %p224_p3 = scmp.lt.s32.totalorder (!%p192_p2), %s912_s22, 63  ;;  %991 = vmatprep.subr.msk.bf16.mxu1 (!%p192_p2), %vm448_vm0, %v398_v0  ;;  %v1058_v2 = vld [vmem:[%s1397_s1] ss:$0 sm:$0xff] (!%p192_p2)  ;;  %vm816_vm3 = vcmask (!%p192_p2), 1040384  }
   0x7   : > { %955 = vmatpush3.bf16.msra.mxu0 (!%p192_p2), %v450_v1  ;;  %989 = vmatpush3.bf16.msra.mxu1 (!%p192_p2), %v450_v1  ;;  %v1070_v3 = vld [vmem:[%s1398_s2] ss:$0 sm:$0xff] (!%p192_p2)  ;;  %p235_p4 = scmp.lt.s32.totalorder (!%p192_p2), %s1044_s19, 1  ;;  %vm818_vm4 = vcmask (!%p192_p2), 58368  }
   0xd   : > { %s1403_s22 = smov (!%p224_p3, %s912_s22), 63  ;;  %s1405_s19 = smov (!%p235_p4, %s1044_s19), 1 }
   0xe   : > { %s913_s23 = sshll.u32 %s1403_s22, 3  ;;  %s916_s9 = sshll.u32 %s1405_s19, 1 }
   0xf   : > { %s1065_s28 = scalar_lea.vmem %s1396_s0, %s913_s23  ;;  %s1192_s8 = scalar_lea.vmem %s1400_s4, %s913_s23 }
  0x10   : > { %v240_v4 = vld [vmem:[%s1065_s28] sm:$0xff]  ;;  %v241_v5 = vld [vmem:[%s1065_s28 + $0x8] sm:$0xff]  ;;  %v242_v6 = vld [vmem:[%s1065_s28 + $0x10] sm:$0xff]  ;;  %s238_s12 = scalar_lea.vmem %s1401_s5, %s916_s9 }
  0x11   : > { %v279_v7 = vmul.f32 %v1058_v2, %v240_v4  ;;  %v280_v8 = vmul.f32 %v1058_v2, %v241_v5  ;;  %v243_v9 = vld [vmem:[%s1065_s28 + $0x18] sm:$0xff]  ;;  %v281_v10 = vmul.f32 %v1058_v2, %v242_v6  ;;  %v244_v11 = vld [vmem:[%s1065_s28 + $0x20] sm:$0xff]  ;;  %v245_v12 = vld [vmem:[%s1065_s28 + $0x28] sm:$0xff] }
  0x12   : > { %v282_v13 = vmul.f32 %v1058_v2, %v243_v9  ;;  %v283_v14 = vmul.f32 %v1058_v2, %v244_v11  ;;  %v284_v15 = vmul.f32 %v1058_v2, %v245_v12  ;;  %v246_v16 = vld [vmem:[%s1065_s28 + $0x30] sm:$0xff]  ;;  %v247_v17 = vld [vmem:[%s1065_s28 + $0x38] sm:$0xff]  ;;  %v248_v26 = vld [vmem:[%s1065_s28 + $0x40] sm:$0xff] }
  0x13   : > { %v318_v18 = vadd.f32 %v1070_v3, %v279_v7  ;;  %v319_v19 = vadd.f32 %v1070_v3, %v280_v8  ;;  %v320_v20 = vadd.f32 %v1070_v3, %v281_v10  ;;  %v285_v21 = vmul.f32 %v1058_v2, %v246_v16  ;;  %v249_v27 = vld [vmem:[%s1065_s28 + $0x48] sm:$0xff]  ;;  %v250_v32 = vld [vmem:[%s1065_s28 + $0x50] sm:$0xff]  ;;  %v251_v37 = vld [vmem:[%s1065_s28 + $0x58] sm:$0xff] }
  0x14   : > { %v321_v22 = vadd.f32 %v1070_v3, %v282_v13  ;;  %v322_v23 = vadd.f32 %v1070_v3, %v283_v14  ;;  %v323_v24 = vadd.f32 %v1070_v3, %v284_v15  ;;  %v286_v25 = vmul.f32 %v1058_v2, %v247_v17  ;;  %v252_v38 = vld [vmem:[%s1065_s28 + $0x60] sm:$0xff]  ;;  %v253_v43 = vld [vmem:[%s1065_s28 + $0x68] sm:$0xff]  ;;  %v254_v44 = vld [vmem:[%s1065_s28 + $0x70] sm:$0xff] }
  0x15   : > { %v350_v28 = vmax.f32 %v318_v18, 0.0  ;;  %v351_v29 = vmax.f32 %v319_v19, 0.0  ;;  %v352_v30 = vmax.f32 %v320_v20, 0.0  ;;  %v324_v31 = vadd.f32 %v1070_v3, %v285_v21  ;;  %v255_v53 = vld [vmem:[%s1065_s28 + $0x78] sm:$0xff]  ;;  %v256_v57 = vld [vmem:[%s1065_s28 + $0x80] sm:$0xff]  ;;  %v257_v62 = vld [vmem:[%s1065_s28 + $0x88] sm:$0xff] }
  0x16   : > { %v353_v33 = vmax.f32 %v321_v22, 0.0  ;;  %v354_v34 = vmax.f32 %v322_v23, 0.0  ;;  %v355_v35 = vmax.f32 %v323_v24, 0.0  ;;  %v325_v36 = vadd.f32 %v1070_v3, %v286_v25  ;;  %v258_v1 = vld [vmem:[%s1065_s28 + $0x90] sm:$0xff]  ;;  %v259_v4 = vld [vmem:[%s1065_s28 + $0x98] sm:$0xff]  ;;  %v260_v8 = vld [vmem:[%s1065_s28 + $0xa0] sm:$0xff] }
  0x17   : > { %v382_v39 = vpack.c.bf16 %v351_v29, %v350_v28  ;;  %v356_v40 = vmax.f32 %v324_v31, 0.0  ;;  %v287_v41 = vmul.f32 %v1058_v2, %v248_v26  ;;  %v288_v42 = vmul.f32 %v1058_v2, %v249_v27  ;;  %v261_v13 = vld [vmem:[%s1065_s28 + $0xa8] sm:$0xff]  ;;  %v262_v18 = vld [vmem:[%s1065_s28 + $0xb0] sm:$0xff]  ;;  %v263_v23 = vld [vmem:[%s1065_s28 + $0xb8] sm:$0xff] }
  0x18   : > { %v383_v45 = vpack.c.bf16 %v353_v33, %v352_v30  ;;  %v384_v46 = vpack.c.bf16 %v355_v35, %v354_v34  ;;  %v357_v47 = vmax.f32 %v325_v36, 0.0  ;;  %v289_v48 = vmul.f32 %v1058_v2, %v250_v32  ;;  %v264_v28 = vld [vmem:[%s1065_s28 + $0xc0] sm:$0xff]  ;;  %v265_v33 = vld [vmem:[%s1065_s28 + $0xc8] sm:$0xff] }
  0x19   : > { %956 = vmatprep.mubr.msk.bf16.mxu0 %vm399_vm1, %v382_v39  ;;  %v326_v49 = vadd.f32 %v1070_v3, %v287_v41  ;;  %v327_v50 = vadd.f32 %v1070_v3, %v288_v42  ;;  %v290_v51 = vmul.f32 %v1058_v2, %v251_v37  ;;  %v291_v52 = vmul.f32 %v1058_v2, %v252_v38  ;;  %v266_v38 = vld [vmem:[%s1065_s28 + $0xd0] sm:$0xff] }
  0x1a   : > { %957 = vmatmul.mubr.msk.bf16.vlgmr.msra.gmra.mrb[0].mxu0 %vm399_vm1, %v383_v45  ;;  %v328_v54 = vadd.f32 %v1070_v3, %v289_v48  ;;  %v292_v55 = vmul.f32 %v1058_v2, %v253_v43  ;;  %v293_v56 = vmul.f32 %v1058_v2, %v254_v44  ;;  %v294_v0 = vmul.f32 %v1058_v2, %v255_v53  ;;  %v267_v43 = vld [vmem:[%s1065_s28 + $0xd8] sm:$0xff]  ;;  %v268_v48 = vld [vmem:[%s1065_s28 + $0xe0] sm:$0xff] }
  0x1b   : > { %960 = vmatprep.mubr.msk.bf16.mxu0 %vm399_vm1, %v384_v46  ;;  %v358_v58 = vmax.f32 %v326_v49, 0.0  ;;  %v359_v59 = vmax.f32 %v327_v50, 0.0  ;;  %v329_v60 = vadd.f32 %v1070_v3, %v290_v51  ;;  %v330_v61 = vadd.f32 %v1070_v3, %v291_v52  ;;  %v269_v49 = vld [vmem:[%s1065_s28 + $0xe8] sm:$0xff] }
  0x1c   : > { %v331_v63 = vadd.f32 %v1070_v3, %v292_v55  ;;  %v385_v5 = vpack.c.bf16 %v357_v47, %v356_v40  ;;  %v360_v6 = vmax.f32 %v328_v54, 0.0  ;;  %v295_v7 = vmul.f32 %v1058_v2, %v256_v57 }
  0x1d   : > { %v386_v9 = vpack.c.bf16 %v359_v59, %v358_v58  ;;  %v361_v10 = vmax.f32 %v329_v60, 0.0  ;;  %v1128_v11 = vadd.f32 %v1070_v3, %v293_v56  ;;  %v296_v12 = vmul.f32 %v1058_v2, %v257_v62 }
  0x1e   : > { %v362_v14 = vmax.f32 %v330_v61, 0.0  ;;  %v334_v15 = vadd.f32 %v1070_v3, %v295_v7  ;;  %v297_v16 = vmul.f32 %v1058_v2, %v258_v1  ;;  %v298_v17 = vmul.f32 %v1058_v2, %v259_v4 }
  0x1f   : > { %v363_v19 = vmax.f32 %v331_v63, 0.0  ;;  %v333_v20 = vadd.f32 %v1070_v3, %v294_v0  ;;  %v335_v21 = vadd.f32 %v1070_v3, %v296_v12  ;;  %v299_v22 = vmul.f32 %v1058_v2, %v260_v8  ;;  %v270_v8 = vld [vmem:[%s1065_s28 + $0xf0] sm:$0xff] }
  0x20   : > { %v366_v24 = vmax.f32 %v334_v15, 0.0  ;;  %v336_v25 = vadd.f32 %v1070_v3, %v297_v16  ;;  %v337_v26 = vadd.f32 %v1070_v3, %v298_v17  ;;  %v300_v27 = vmul.f32 %v1058_v2, %v261_v13 }
  0x21   : > { %v387_v29 = vpack.c.bf16 %v361_v10, %v360_v6  ;;  %v367_v30 = vmax.f32 %v335_v21, 0.0  ;;  %v338_v31 = vadd.f32 %v1070_v3, %v299_v22  ;;  %v301_v32 = vmul.f32 %v1058_v2, %v262_v18 }
  0x22   : > { %961 = vmatmul.mubr.msk.bf16.gmra.mrb[4].mxu0 %vm399_vm1, %v385_v5  ;;  %v368_v34 = vmax.f32 %v336_v25, 0.0  ;;  %v369_v35 = vmax.f32 %v337_v26, 0.0  ;;  %v339_v36 = vadd.f32 %v1070_v3, %v300_v27  ;;  %v302_v37 = vmul.f32 %v1058_v2, %v263_v23 }
  0x23   : > { %964 = vmatprep.mubr.msk.bf16.mxu0 %vm399_vm1, %v386_v9  ;;  %v390_v39 = vpack.c.bf16 %v367_v30, %v366_v24  ;;  %v370_v40 = vmax.f32 %v338_v31, 0.0  ;;  %v340_v41 = vadd.f32 %v1070_v3, %v301_v32  ;;  %v303_v42 = vmul.f32 %v1058_v2, %v264_v28  ;;  %v271_v9 = vld [vmem:[%s1065_s28 + $0xf8] sm:$0xff] }
  0x24   : > { %v391_v44 = vpack.c.bf16 %v369_v35, %v368_v34  ;;  %v371_v45 = vmax.f32 %v339_v36, 0.0  ;;  %v341_v46 = vadd.f32 %v1070_v3, %v302_v37  ;;  %v304_v47 = vmul.f32 %v1058_v2, %v265_v33 }
  0x25   : > { %v388_v50 = vpack.c.bf16 %v363_v19, %v362_v14  ;;  %972 = vmatprep.mubr.msk.bf16.mxu1 %vm399_vm1, %v390_v39  ;;  %v372_v51 = vmax.f32 %v340_v41, 0.0  ;;  %v342_v52 = vadd.f32 %v1070_v3, %v303_v42  ;;  %v305_v53 = vmul.f32 %v1058_v2, %v266_v38 }
  0x26   : > { %973 = vmatmul.mubr.msk.bf16.vlgmr.msra.gmra.mrb[0].mxu1 %vm399_vm1, %v391_v44  ;;  %v392_v54 = vpack.c.bf16 %v371_v45, %v370_v40  ;;  %v373_v55 = vmax.f32 %v341_v46, 0.0  ;;  %v343_v56 = vadd.f32 %v1070_v3, %v304_v47  ;;  %v306_v57 = vmul.f32 %v1058_v2, %v267_v43 }
  0x27   : > { %v374_v58 = vmax.f32 %v342_v52, 0.0  ;;  %v307_v59 = vmul.f32 %v1058_v2, %v268_v48  ;;  %v308_v60 = vmul.f32 %v1058_v2, %v269_v49  ;;  %v364_v62 = vmax.f32 %v1128_v11, 0.0 }
  0x28   : > { %976 = vmatprep.mubr.msk.bf16.mxu1 %vm399_vm1, %v392_v54  ;;  %v375_v61 = vmax.f32 %v343_v56, 0.0  ;;  %v365_v63 = vmax.f32 %v333_v20, 0.0  ;;  %v393_v0 = vpack.c.bf16 %v373_v55, %v372_v51  ;;  %v344_v1 = vadd.f32 %v1070_v3, %v305_v53 }
  0x29   : > { %v345_v4 = vadd.f32 %v1070_v3, %v306_v57  ;;  %v346_v6 = vadd.f32 %v1070_v3, %v307_v59  ;;  %v347_v7 = vadd.f32 %v1070_v3, %v308_v60  ;;  %v309_v13 = vmul.f32 %v1058_v2, %v270_v8 }
  0x2a   : > { %965 = vmatmul.mubr.msk.bf16.gmra.mrb[8].mxu0 %vm399_vm1, %v387_v29  ;;  %v394_v5 = vpack.c.bf16 %v375_v61, %v374_v58  ;;  %v389_v10 = vpack.c.bf16 %v365_v63, %v364_v62  ;;  %v376_v12 = vmax.f32 %v344_v1, 0.0  ;;  %v310_v14 = vmul.f32 %v1058_v2, %v271_v9 }
  0x2b   : > { %968 = vmatprep.mubr.msk.bf16.mxu0 %vm399_vm1, %v388_v50  ;;  %v377_v11 = vmax.f32 %v345_v4, 0.0  ;;  %v378_v15 = vmax.f32 %v346_v6, 0.0  ;;  %v379_v16 = vmax.f32 %v347_v7, 0.0  ;;  %v348_v18 = vadd.f32 %v1070_v3, %v309_v13 }
  0x2c   : > { %v349_v19 = vadd.f32 %v1070_v3, %v310_v14 }
  0x2d   : > { %v395_v17 = vpack.c.bf16 %v377_v11, %v376_v12  ;;  %v396_v20 = vpack.c.bf16 %v379_v16, %v378_v15  ;;  %v380_v21 = vmax.f32 %v348_v18, 0.0 }
  0x2e   : > { %977 = vmatmul.mubr.msk.bf16.gmra.mrb[4].mxu1 %vm399_vm1, %v393_v0  ;;  %v381_v22 = vmax.f32 %v349_v19, 0.0 }
  0x2f   : > { %980 = vmatprep.mubr.msk.bf16.mxu1 %vm399_vm1, %v394_v5 }
  0x30   : > { %v397_v23 = vpack.c.bf16 %v381_v22, %v380_v21 }
  0x32   : > { %969 = vmatmul.mubr.msk.bf16.gmra.mrb[12].mxu0 %vm399_vm1, %v389_v10 }
  0x36   : > { %981 = vmatmul.mubr.msk.bf16.gmra.mrb[8].mxu1 %vm399_vm1, %v395_v17 }
  0x37   : > { %984 = vmatprep.mubr.msk.bf16.mxu1 %vm399_vm1, %v396_v20 }
  0x3e   : > { %985 = vmatmul.mubr.msk.bf16.gmra.mrb[12].mxu1 %vm399_vm1, %v397_v23 }
  0xed   : > { %v958_v2 = vpop.f32.mrb[0].mxu0 }
  0xee   : > { %616 = vst.msk [vmem:[%s1192_s8 + $0x10] sm:$0xff] %vm613_vm2, %v958_v2  ;;  %v486_v3 = vpop.f32.mrb[1].mxu0  ;;  %v717_v27 = vmul.f32 %v958_v2, %v958_v2  ;;  %v649_v32 = vsel %vm613_vm2, %v958_v2, 0.0 }
  0xef   : > { %614 = vst.msk [vmem:[%s1192_s8] sm:$0xff] %vm613_vm2, %v486_v3  ;;  %v715_v24 = vmul.f32 %v486_v3, %v486_v3  ;;  %v959_v25 = vpop.f32.mrb[2].mxu0  ;;  %v646_v28 = vsel %vm613_vm2, %v486_v3, 0.0 }
  0xf0   : > { %617 = vst.msk [vmem:[%s1192_s8 + $0x18] sm:$0xff] %vm613_vm2, %v959_v25  ;;  %v489_v26 = vpop.f32.mrb[3].mxu0  ;;  %v718_v34 = vmul.f32 %v959_v25, %v959_v25  ;;  %v750_v38 = vsel %vm613_vm2, %v717_v27, 0.0  ;;  %v651_v39 = vsel %vm613_vm2, %v959_v25, 0.0 }
  0xf1   : > { %615 = vst.msk [vmem:[%s1192_s8 + $0x8] sm:$0xff] %vm613_vm2, %v489_v26  ;;  %v647_v29 = vsel %vm613_vm2, %v489_v26, 0.0  ;;  %v716_v30 = vmul.f32 %v489_v26, %v489_v26  ;;  %v747_v33 = vsel %vm613_vm2, %v715_v24, 0.0 }
  0xf2   : > { %v648_v31 = vadd.f32 %v647_v29, %v646_v28  ;;  %v752_v44 = vsel %vm613_vm2, %v718_v34, 0.0 }
  0xf3   : > { %v748_v35 = vsel %vm613_vm2, %v716_v30, 0.0 }
  0xf4   : > { %v650_v36 = vadd.f32 %v649_v32, %v648_v31  ;;  %v749_v37 = vadd.f32 %v748_v35, %v747_v33 }
  0xf5   : > { %v962_v40 = vpop.f32.mrb[4].mxu0 }
  0xf6   : > { %v751_v41 = vadd.f32 %v750_v38, %v749_v37  ;;  %620 = vst.msk [vmem:[%s1192_s8 + $0x30] sm:$0xff] %vm613_vm2, %v962_v40  ;;  %v502_v42 = vpop.f32.mrb[5].mxu0  ;;  %v652_v43 = vadd.f32 %v651_v39, %v650_v36  ;;  %v721_v51 = vmul.f32 %v962_v40, %v962_v40  ;;  %v657_v58 = vsel %vm613_vm2, %v962_v40, 0.0 }
  0xf7   : > { %618 = vst.msk [vmem:[%s1192_s8 + $0x20] sm:$0xff] %vm613_vm2, %v502_v42  ;;  %v653_v45 = vsel %vm613_vm2, %v502_v42, 0.0  ;;  %v719_v46 = vmul.f32 %v502_v42, %v502_v42  ;;  %v963_v47 = vpop.f32.mrb[6].mxu0 }
  0xf8   : > { %v654_v48 = vadd.f32 %v653_v45, %v652_v43  ;;  %v753_v49 = vadd.f32 %v752_v44, %v751_v41  ;;  %621 = vst.msk [vmem:[%s1192_s8 + $0x38] sm:$0xff] %vm613_vm2, %v963_v47  ;;  %v505_v50 = vpop.f32.mrb[7].mxu0  ;;  %v722_v59 = vmul.f32 %v963_v47, %v963_v47  ;;  %v758_v1 = vsel %vm613_vm2, %v721_v51, 0.0 }
  0xf9   : > { %v754_v52 = vsel %vm613_vm2, %v719_v46, 0.0  ;;  %619 = vst.msk [vmem:[%s1192_s8 + $0x28] sm:$0xff] %vm613_vm2, %v505_v50  ;;  %v655_v53 = vsel %vm613_vm2, %v505_v50, 0.0  ;;  %v720_v54 = vmul.f32 %v505_v50, %v505_v50  ;;  %v1221_v57 = vpop.f32.mrb[0].mxu1  ;;  %v659_v4 = vsel %vm613_vm2, %v963_v47, 0.0 }
  0xfa   : > { %v755_v55 = vadd.f32 %v754_v52, %v753_v49  ;;  %v656_v56 = vadd.f32 %v655_v53, %v654_v48  ;;  %632 = vst.msk [vmem:[%s1192_s8 + $0x90] sm:$0xff] %vm613_vm2, %v1221_v57  ;;  %v1228_v61 = vpop.f32.mrb[1].mxu1  ;;  %v760_v10 = vsel %vm613_vm2, %v722_v59, 0.0 }
  0xfb   : > { %v756_v60 = vsel %vm613_vm2, %v720_v54, 0.0  ;;  %630 = vst.msk [vmem:[%s1192_s8 + $0x80] sm:$0xff] %vm613_vm2, %v1228_v61  ;;  %v1233_v0 = vpop.f32.mrb[2].mxu1  ;;  %v731_v53 = vmul.f32 %v1228_v61, %v1228_v61 }
  0xfc   : > { %v658_v62 = vadd.f32 %v657_v58, %v656_v56  ;;  %v757_v63 = vadd.f32 %v756_v60, %v755_v55  ;;  %633 = vst.msk [vmem:[%s1192_s8 + $0x98] sm:$0xff] %vm613_vm2, %v1233_v0  ;;  %v1240_v6 = vpop.f32.mrb[3].mxu1 }
  0xfd   : > { %v966_v5 = vpop.f32.mrb[8].mxu0  ;;  %631 = vst.msk [vmem:[%s1192_s8 + $0x88] sm:$0xff] %vm613_vm2, %v1240_v6 }
  0xfe   : > { %v759_v7 = vadd.f32 %v758_v1, %v757_v63  ;;  %624 = vst.msk [vmem:[%s1192_s8 + $0x50] sm:$0xff] %vm613_vm2, %v966_v5  ;;  %v518_v8 = vpop.f32.mrb[9].mxu0  ;;  %v660_v9 = vadd.f32 %v659_v4, %v658_v62  ;;  %v725_v17 = vmul.f32 %v966_v5, %v966_v5  ;;  %v665_v2 = vsel %vm613_vm2, %v966_v5, 0.0 }
  0xff   : > { %622 = vst.msk [vmem:[%s1192_s8 + $0x40] sm:$0xff] %vm613_vm2, %v518_v8  ;;  %v661_v12 = vsel %vm613_vm2, %v518_v8, 0.0  ;;  %v723_v11 = vmul.f32 %v518_v8, %v518_v8  ;;  %v967_v13 = vpop.f32.mrb[10].mxu0  ;;  %v677_v62 = vsel %vm613_vm2, %v1228_v61, 0.0  ;;  %v732_v8 = vmul.f32 %v1240_v6, %v1240_v6 }
 0x100   : > { %v662_v14 = vadd.f32 %v661_v12, %v660_v9  ;;  %v761_v15 = vadd.f32 %v760_v10, %v759_v7  ;;  %625 = vst.msk [vmem:[%s1192_s8 + $0x58] sm:$0xff] %vm613_vm2, %v967_v13  ;;  %v521_v16 = vpop.f32.mrb[11].mxu0  ;;  %v726_v3 = vmul.f32 %v967_v13, %v967_v13  ;;  %v766_v29 = vsel %vm613_vm2, %v725_v17, 0.0 }
 0x101   : > { %v762_v18 = vsel %vm613_vm2, %v723_v11, 0.0  ;;  %623 = vst.msk [vmem:[%s1192_s8 + $0x48] sm:$0xff] %vm613_vm2, %v521_v16  ;;  %v663_v19 = vsel %vm613_vm2, %v521_v16, 0.0  ;;  %v724_v20 = vmul.f32 %v521_v16, %v521_v16  ;;  %v1257_v23 = vpop.f32.mrb[4].mxu1  ;;  %v667_v30 = vsel %vm613_vm2, %v967_v13, 0.0 }
 0x102   : > { %v763_v21 = vadd.f32 %v762_v18, %v761_v15  ;;  %v664_v22 = vadd.f32 %v663_v19, %v662_v14  ;;  %636 = vst.msk [vmem:[%s1192_s8 + $0xb0] sm:$0xff] %vm613_vm2, %v1257_v23  ;;  %v1264_v25 = vpop.f32.mrb[5].mxu1  ;;  %v768_v36 = vsel %vm613_vm2, %v726_v3, 0.0  ;;  %v778_v7 = vsel %vm613_vm2, %v731_v53, 0.0 }
 0x103   : > { %v764_v24 = vsel %vm613_vm2, %v724_v20, 0.0  ;;  %634 = vst.msk [vmem:[%s1192_s8 + $0xa0] sm:$0xff] %vm613_vm2, %v1264_v25  ;;  %v1269_v28 = vpop.f32.mrb[6].mxu1  ;;  %v733_v9 = vmul.f32 %v1221_v57, %v1221_v57  ;;  %v679_v12 = vsel %vm613_vm2, %v1240_v6, 0.0  ;;  %v681_v15 = vsel %vm613_vm2, %v1221_v57, 0.0 }
 0x104   : > { %v666_v26 = vadd.f32 %v665_v2, %v664_v22  ;;  %v765_v27 = vadd.f32 %v764_v24, %v763_v21  ;;  %637 = vst.msk [vmem:[%s1192_s8 + $0xb8] sm:$0xff] %vm613_vm2, %v1269_v28  ;;  %v1276_v32 = vpop.f32.mrb[7].mxu1  ;;  %v734_v16 = vmul.f32 %v1233_v0, %v1233_v0  ;;  %v780_v17 = vsel %vm613_vm2, %v732_v8, 0.0 }
 0x105   : > { %v970_v31 = vpop.f32.mrb[12].mxu0  ;;  %635 = vst.msk [vmem:[%s1192_s8 + $0xa8] sm:$0xff] %vm613_vm2, %v1276_v32  ;;  %v735_v18 = vmul.f32 %v1264_v25, %v1264_v25  ;;  %v782_v19 = vsel %vm613_vm2, %v733_v9, 0.0  ;;  %v683_v22 = vsel %vm613_vm2, %v1233_v0, 0.0  ;;  %v685_v2 = vsel %vm613_vm2, %v1264_v25, 0.0 }
 0x106   : > { %v767_v33 = vadd.f32 %v766_v29, %v765_v27  ;;  %628 = vst.msk [vmem:[%s1192_s8 + $0x70] sm:$0xff] %vm613_vm2, %v970_v31  ;;  %v534_v34 = vpop.f32.mrb[13].mxu0  ;;  %v668_v35 = vadd.f32 %v667_v30, %v666_v26  ;;  %v729_v43 = vmul.f32 %v970_v31, %v970_v31  ;;  %v673_v50 = vsel %vm613_vm2, %v970_v31, 0.0 }
 0x107   : > { %626 = vst.msk [vmem:[%s1192_s8 + $0x60] sm:$0xff] %vm613_vm2, %v534_v34  ;;  %v669_v37 = vsel %vm613_vm2, %v534_v34, 0.0  ;;  %v727_v38 = vmul.f32 %v534_v34, %v534_v34  ;;  %v971_v39 = vpop.f32.mrb[14].mxu0  ;;  %v784_v30 = vsel %vm613_vm2, %v734_v16, 0.0  ;;  %v786_v31 = vsel %vm613_vm2, %v735_v18, 0.0 }
 0x108   : > { %v670_v40 = vadd.f32 %v669_v37, %v668_v35  ;;  %v769_v41 = vadd.f32 %v768_v36, %v767_v33  ;;  %629 = vst.msk [vmem:[%s1192_s8 + $0x78] sm:$0xff] %vm613_vm2, %v971_v39  ;;  %v537_v42 = vpop.f32.mrb[15].mxu0  ;;  %v730_v51 = vmul.f32 %v971_v39, %v971_v39  ;;  %v774_v59 = vsel %vm613_vm2, %v729_v43, 0.0 }
 0x109   : > { %v770_v44 = vsel %vm613_vm2, %v727_v38, 0.0  ;;  %627 = vst.msk [vmem:[%s1192_s8 + $0x68] sm:$0xff] %vm613_vm2, %v537_v42  ;;  %v671_v45 = vsel %vm613_vm2, %v537_v42, 0.0  ;;  %v728_v46 = vmul.f32 %v537_v42, %v537_v42  ;;  %v1293_v49 = vpop.f32.mrb[8].mxu1  ;;  %v675_v60 = vsel %vm613_vm2, %v971_v39, 0.0 }
 0x10a   : > { %v771_v47 = vadd.f32 %v770_v44, %v769_v41  ;;  %v672_v48 = vadd.f32 %v671_v45, %v670_v40  ;;  %640 = vst.msk [vmem:[%s1192_s8 + $0xd0] sm:$0xff] %vm613_vm2, %v1293_v49  ;;  %v582_v54 = vpop.f32.mrb[9].mxu1  ;;  %v776_v5 = vsel %vm613_vm2, %v730_v51, 0.0  ;;  %v736_v0 = vmul.f32 %v1276_v32, %v1276_v32 }
 0x10b   : > { %v772_v52 = vsel %vm613_vm2, %v728_v46, 0.0  ;;  %638 = vst.msk [vmem:[%s1192_s8 + $0xc0] sm:$0xff] %vm613_vm2, %v582_v54  ;;  %v1304_v58 = vpop.f32.mrb[10].mxu1  ;;  %v737_v35 = vmul.f32 %v1257_v23, %v1257_v23  ;;  %v687_v36 = vsel %vm613_vm2, %v1276_v32, 0.0  ;;  %v689_v39 = vsel %vm613_vm2, %v1257_v23, 0.0 }
 0x10c   : > { %v674_v55 = vadd.f32 %v673_v50, %v672_v48  ;;  %v773_v56 = vadd.f32 %v772_v52, %v771_v47  ;;  %641 = vst.msk [vmem:[%s1192_s8 + $0xd8] sm:$0xff] %vm613_vm2, %v1304_v58  ;;  %v585_v63 = vpop.f32.mrb[11].mxu1  ;;  %v738_v40 = vmul.f32 %v1269_v28, %v1269_v28  ;;  %v788_v41 = vsel %vm613_vm2, %v736_v0, 0.0 }
 0x10d   : > { %639 = vst.msk [vmem:[%s1192_s8 + $0xc8] sm:$0xff] %vm613_vm2, %v585_v63  ;;  %v739_v42 = vmul.f32 %v582_v54, %v582_v54  ;;  %v790_v45 = vsel %vm613_vm2, %v737_v35, 0.0  ;;  %v691_v46 = vsel %vm613_vm2, %v1269_v28, 0.0  ;;  %v693_v32 = vsel %vm613_vm2, %v582_v54, 0.0 }
 0x10e   : > { %v775_v1 = vadd.f32 %v774_v59, %v773_v56  ;;  %v676_v4 = vadd.f32 %v675_v60, %v674_v55  ;;  %v792_v50 = vsel %vm613_vm2, %v738_v40, 0.0  ;;  %v740_v51 = vmul.f32 %v585_v63, %v585_v63 }
 0x10f   : > { %v794_v23 = vsel %vm613_vm2, %v739_v42, 0.0  ;;  %v741_v55 = vmul.f32 %v1293_v49, %v1293_v49  ;;  %v695_v56 = vsel %vm613_vm2, %v585_v63, 0.0  ;;  %v697_v28 = vsel %vm613_vm2, %v1293_v49, 0.0 }
 0x110   : > { %v678_v61 = vadd.f32 %v677_v62, %v676_v4  ;;  %v777_v10 = vadd.f32 %v776_v5, %v775_v1  ;;  %v742_v54 = vmul.f32 %v1304_v58, %v1304_v58  ;;  %v796_v62 = vsel %vm613_vm2, %v740_v51, 0.0 }
 0x111   : > { %v1323_v14 = vpop.f32.mrb[12].mxu1  ;;  %v699_v8 = vsel %vm613_vm2, %v1304_v58, 0.0 }
 0x112   : > { %v779_v11 = vadd.f32 %v778_v7, %v777_v10  ;;  %v680_v13 = vadd.f32 %v679_v12, %v678_v61  ;;  %644 = vst.msk [vmem:[%s1192_s8 + $0xf0] sm:$0xff] %vm613_vm2, %v1323_v14  ;;  %v598_v6 = vpop.f32.mrb[13].mxu1  ;;  %v798_v7 = vsel %vm613_vm2, %v741_v55, 0.0  ;;  %v800_v10 = vsel %vm613_vm2, %v742_v54, 0.0 }
 0x113   : > { %642 = vst.msk [vmem:[%s1192_s8 + $0xe0] sm:$0xff] %vm613_vm2, %v598_v6  ;;  %v987_v57 = vpop.f32.mrb[14].mxu1  ;;  %v743_v1 = vmul.f32 %v598_v6, %v598_v6  ;;  %v701_v63 = vsel %vm613_vm2, %v598_v6, 0.0  ;;  %v705_v18 = vsel %vm613_vm2, %v1323_v14, 0.0 }
 0x114   : > { %v682_v20 = vadd.f32 %v681_v15, %v680_v13  ;;  %v781_v21 = vadd.f32 %v780_v17, %v779_v11  ;;  %645 = vst.msk [vmem:[%s1192_s8 + $0xf8] sm:$0xff] %vm613_vm2, %v987_v57  ;;  %v707_v3 = vsel %vm613_vm2, %v987_v57, 0.0  ;;  %v746_v24 = vmul.f32 %v987_v57, %v987_v57  ;;  %v601_v26 = vpop.f32.mrb[15].mxu1 }
 0x115   : > { %643 = vst.msk [vmem:[%s1192_s8 + $0xe8] sm:$0xff] %vm613_vm2, %v601_v26  ;;  %v802_v49 = vsel %vm613_vm2, %v743_v1, 0.0  ;;  %v744_v12 = vmul.f32 %v601_v26, %v601_v26  ;;  %v745_v15 = vmul.f32 %v1323_v14, %v1323_v14  ;;  %v703_v16 = vsel %vm613_vm2, %v601_v26, 0.0 }
 0x116   : > { %v783_v27 = vadd.f32 %v782_v19, %v781_v21  ;;  %v684_v29 = vadd.f32 %v683_v22, %v682_v20  ;;  %v808_v33 = vsel %vm613_vm2, %v746_v24, 0.0 }
 0x117   : > { %v804_v6 = vsel %vm613_vm2, %v744_v12, 0.0  ;;  %v806_v21 = vsel %vm613_vm2, %v745_v15, 0.0 }
 0x118   : > { %v686_v25 = vadd.f32 %v685_v2, %v684_v29  ;;  %v785_v34 = vadd.f32 %v784_v30, %v783_v27 }
 0x11a   : > { %v787_v37 = vadd.f32 %v786_v31, %v785_v34  ;;  %v688_v38 = vadd.f32 %v687_v36, %v686_v25 }
 0x11c   : > { %v690_v43 = vadd.f32 %v689_v39, %v688_v38  ;;  %v789_v44 = vadd.f32 %v788_v41, %v787_v37 }
 0x11e   : > { %v791_v47 = vadd.f32 %v790_v45, %v789_v44  ;;  %v692_v48 = vadd.f32 %v691_v46, %v690_v43 }
 0x120   : > { %v694_v52 = vadd.f32 %v693_v32, %v692_v48  ;;  %v793_v53 = vadd.f32 %v792_v50, %v791_v47 }
 0x122   : > { %v795_v59 = vadd.f32 %v794_v23, %v793_v53  ;;  %v696_v60 = vadd.f32 %v695_v56, %v694_v52 }
 0x124   : > { %v698_v4 = vadd.f32 %v697_v28, %v696_v60  ;;  %v797_v5 = vadd.f32 %v796_v62, %v795_v59 }
 0x126   : > { %v799_v9 = vadd.f32 %v798_v7, %v797_v5  ;;  %v700_v61 = vadd.f32 %v699_v8, %v698_v4 }
 0x128   : > { %v702_v11 = vadd.f32 %v701_v63, %v700_v61  ;;  %v801_v13 = vadd.f32 %v800_v10, %v799_v9 }
 0x12a   : > { %v803_v17 = vadd.f32 %v802_v49, %v801_v13  ;;  %v704_v58 = vadd.f32 %v703_v16, %v702_v11 }
 0x12c   : > { %v706_v19 = vadd.f32 %v705_v18, %v704_v58  ;;  %v805_v20 = vadd.f32 %v804_v6, %v803_v17 }
 0x12e   : > { %v708_v57 = vadd.f32 %v707_v3, %v706_v19  ;;  %v807_v22 = vadd.f32 %v806_v21, %v805_v20 }
 0x130   : > { %v709_v2 = vrot.slane %v708_v57, 4  ;;  %v809_v24 = vadd.f32 %v808_v33, %v807_v22 }
 0x132   : > { %v710_v27 = vadd.f32 %v709_v2, %v708_v57  ;;  %v810_v29 = vrot.slane %v809_v24, 4 }
 0x134   : > { %v711_v26 = vrot.slane %v710_v27, 2  ;;  %v811_v30 = vadd.f32 %v810_v29, %v809_v24 }
 0x136   : > { %v712_v31 = vadd.f32 %v711_v26, %v710_v27  ;;  %v812_v0 = vrot.slane %v811_v30, 2 }
 0x138   : > { %v713_v25 = vrot.slane %v712_v31, 1  ;;  %v813_v14 = vadd.f32 %v812_v0, %v811_v30 }
 0x13a   : > { %v814_v34 = vrot.slane %v813_v14, 1  ;;  %v714_v3 = vadd.f32 %v713_v25, %v712_v31 }
 0x13c   : > { %v815_v35 = vadd.f32 %v814_v34, %v813_v14 }
 0x13e   : > { %v817_v33 = vsel %vm816_vm3, %v714_v3, %v815_v35 }
 0x13f   : > { %819 = vst.msk [vmem:[%s238_s12] sm:$0x3] %vm818_vm4, %v817_v33 }
 0x140 PF: > { %s16_s18 = sadd.s32 1, %s1006_s18  }
 0x141   : > { %p13_p5 = scmp.ge.s32.totalorder %s16_s18, 4  }
 0x143   :  { %15 = sbr.rel (!%p13_p5) target bundleno = 1 (0x1), region = 78 }

// kernel: bottleblock.5
= control target key start
LH: loop header
LB: loop body
LE: loop exit
PB: predicated region body
PF: predicated region fallthrough
CT: control target
= control target key end

     0   :  { %s2230_s18 = smov 0   ;;  %s2938_s0 = inlined_call_operand.vmem [shape: f32[2,16,16,4], index: 0, kind: input, shape index: {}]   ;;  %s2939_s1 = inlined_call_operand.vmem [shape: f32[1,4], index: 1, kind: input, shape index: {}]   ;;  %s2940_s2 = inlined_call_operand.vmem [shape: f32[1,4], index: 2, kind: input, shape index: {}]   ;;  %s2941_s3 = inlined_call_operand.vmem [shape: bf16[36,4], index: 3, kind: input, shape index: {}]   ;;  %s2942_s4 = inlined_call_operand.vmem [shape: f32[2,16,16,4], index: 4, kind: output, shape index: {0}]   ;;  %s2943_s5 = inlined_call_operand.vmem [shape: f32[2,2,4], index: 5, kind: output, shape index: {1}]  }
   0x1 LB: > { %s2063_s19 = sadd.s32 4294967295, %s2189_s18   ;;  %p2067_p0 = scmp.ge.s32.totalorder %s2189_s18, 1  ;;  %s2189_s18 = sphi %s2230_s18, %s16_s18  }
   0x2   : > { %p190_p1 = scmp.lt.s32.totalorder %s2189_s18, 3 }
   0x4   : > { %p191_p2 = pnand %p2067_p0, %p190_p1 }
   0x5   : > { %vm379_vm0 = vcmask (!%p191_p2), 31744   ;;  %vm382_vm1 = vcmask (!%p191_p2), 25600   ;;  %vm388_vm2 = vcmask (!%p191_p2), 24576   ;;  %v2191_v0 = vmov (!%p191_p2), 0.0   ;;  %p222_p3 = scmp.lt.s32.totalorder (!%p191_p2), %s2063_s19, 1  ;;  %s2192_s28 = smov (!%p191_p2), 4  }
   0x6   : > { %194 = sbr.rel (%p191_p2) target bundleno = 641 (0x281), region = 36  ;;  %380 = vst.msk [vmem:[#allocation2] sm:$0xff] (!%p191_p2), %vm379_vm0, %v2191_v0  ;;  %381 = vst.msk [vmem:[#allocation2 + $0x8] sm:$0xff] (!%p191_p2), %vm379_vm0, %v2191_v0  ;;  %v2290_v1 = vld [vmem:[%s2939_s1] ss:$0 sm:$0xff] (!%p191_p2)  ;;  %s2193_s29 = smov (!%p191_p2), 8  }
   0x7   : > { %383 = vst.msk [vmem:[#allocation2 + $0x10] sm:$0x3] (!%p191_p2), %vm382_vm1, %v2191_v0  ;;  %387 = vst.msk [vmem:[#allocation2 + $0x1a8] sm:$0x3] (!%p191_p2), %vm382_vm1, %v2191_v0  ;;  %v2302_v2 = vld [vmem:[%s2940_s2] ss:$0 sm:$0xff] (!%p191_p2) }
   0x8   : > { %385 = vst.msk [vmem:[#allocation2 + $0x198] sm:$0xff] (!%p191_p2), %vm379_vm0, %v2191_v0  ;;  %386 = vst.msk [vmem:[#allocation2 + $0x1a0] sm:$0xff] (!%p191_p2), %vm379_vm0, %v2191_v0  ;;  %s2194_s30 = smov (!%p191_p2), 12   ;;  %s2195_s6 = smov (!%p191_p2), 16   ;;  %vm1607_vm3 = vcmask (!%p191_p2), 1041408   ;;  %vm1323_vm4 = vcmask (!%p191_p2), 64512  }
   0x9   : > { %390 = vst.msk [vmem:[#allocation2 + $0x18] sm:$0x1] (!%p191_p2), %vm388_vm2, %v2191_v0  ;;  %391 = vst.msk [vmem:[#allocation2 + $0x30] sm:$0x1] (!%p191_p2), %vm388_vm2, %v2191_v0  ;;  %s2196_s7 = smov (!%p191_p2), 20   ;;  %s2197_s10 = smov (!%p191_p2), 24  }
   0xa   : > { %392 = vst.msk [vmem:[#allocation2 + $0x48] sm:$0x1] (!%p191_p2), %vm388_vm2, %v2191_v0  ;;  %393 = vst.msk [vmem:[#allocation2 + $0x60] sm:$0x1] (!%p191_p2), %vm388_vm2, %v2191_v0  ;;  %s2198_s15 = smov (!%p191_p2), 28   ;;  %s2199_s16 = smov (!%p191_p2), 32  }
   0xb   : > { %394 = vst.msk [vmem:[#allocation2 + $0x78] sm:$0x1] (!%p191_p2), %vm388_vm2, %v2191_v0  ;;  %395 = vst.msk [vmem:[#allocation2 + $0x90] sm:$0x1] (!%p191_p2), %vm388_vm2, %v2191_v0  ;;  %vm1356_vm5 = vcmask (!%p191_p2), 97280   ;;  %vm1389_vm6 = vcmask (!%p191_p2), 130048  }
   0xc   : > { %396 = vst.msk [vmem:[#allocation2 + $0xa8] sm:$0x1] (!%p191_p2), %vm388_vm2, %v2191_v0  ;;  %397 = vst.msk [vmem:[#allocation2 + $0xc0] sm:$0x1] (!%p191_p2), %vm388_vm2, %v2191_v0  ;;  %vm1422_vm7 = vcmask (!%p191_p2), 162816   ;;  %vm1455_vm8 = vcmask (!%p191_p2), 195584  }
   0xd   : > { %398 = vst.msk [vmem:[#allocation2 + $0xd8] sm:$0x1] %vm388_vm2, %v2191_v0  ;;  %399 = vst.msk [vmem:[#allocation2 + $0xf0] sm:$0x1] %vm388_vm2, %v2191_v0  ;;  %s2945_s19 = smov (!%p222_p3, %s2063_s19), 1  ;;  %v554_v6 = vld [vmem:[#allocation2 + $0x2] sm:$0xff] }
   0xe   : > { %400 = vst.msk [vmem:[#allocation2 + $0x108] sm:$0x1] %vm388_vm2, %v2191_v0  ;;  %401 = vst.msk [vmem:[#allocation2 + $0x120] sm:$0x1] %vm388_vm2, %v2191_v0  ;;  %s2096_s20 = sshll.u32 %s2945_s19, 8  ;;  %v506_v7 = vld [vmem:[#allocation2 + $0x1] sm:$0xff] }
   0xf   : > { %402 = vst.msk [vmem:[#allocation2 + $0x138] sm:$0x1] %vm388_vm2, %v2191_v0  ;;  %403 = vst.msk [vmem:[#allocation2 + $0x150] sm:$0x1] %vm388_vm2, %v2191_v0  ;;  %s2297_s25 = scalar_lea.vmem %s2938_s0, %s2096_s20  ;;  %v507_v8 = vld [vmem:[#allocation2 + $0x9] sm:$0xff]  ;;  %vm1488_vm9 = vcmask 228352   ;;  %s2780_s22 = scalar_lea.vmem %s2942_s4, %s2096_s20 }
  0x10   : > { %404 = vst.msk [vmem:[#allocation2 + $0x168] sm:$0x1] %vm388_vm2, %v2191_v0  ;;  %405 = vst.msk [vmem:[#allocation2 + $0x180] sm:$0x1] %vm388_vm2, %v2191_v0  ;;  %v237_v3 = vld [vmem:[%s2297_s25] sm:$0xff]  ;;  %v238_v4 = vld [vmem:[%s2297_s25 + $0x8] sm:$0xff]  ;;  %v538_v13 = vpack.c.bf16 %v507_v8, %v506_v7 }
  0x11   : > { %408 = vst.msk [vmem:[#allocation2 + $0x29] sm:$0x1] %vm388_vm2, %v2191_v0  ;;  %409 = vst.msk [vmem:[#allocation2 + $0x41] sm:$0x1] %vm388_vm2, %v2191_v0  ;;  %v239_v5 = vld [vmem:[%s2297_s25 + $0x10] sm:$0xff]  ;;  %v276_v9 = vmul.f32 %v2290_v1, %v237_v3  ;;  %v277_v10 = vmul.f32 %v2290_v1, %v238_v4  ;;  %v240_v14 = vld [vmem:[%s2297_s25 + $0x18] sm:$0xff] }
  0x12   : > { %410 = vst.msk [vmem:[#allocation2 + $0x59] sm:$0x1] %vm388_vm2, %v2191_v0  ;;  %411 = vst.msk [vmem:[#allocation2 + $0x71] sm:$0x1] %vm388_vm2, %v2191_v0  ;;  %v278_v11 = vmul.f32 %v2290_v1, %v239_v5  ;;  %v241_v15 = vld [vmem:[%s2297_s25 + $0x20] sm:$0xff]  ;;  %v279_v19 = vmul.f32 %v2290_v1, %v240_v14  ;;  %v242_v20 = vld [vmem:[%s2297_s25 + $0x28] sm:$0xff]  ;;  %907 = vrot.lane.b32.xlu0 %v538_v13, %s2192_s28 }
  0x13   : > { %412 = vst.msk [vmem:[#allocation2 + $0x89] sm:$0x1] %vm388_vm2, %v2191_v0  ;;  %413 = vst.msk [vmem:[#allocation2 + $0xa1] sm:$0x1] %vm388_vm2, %v2191_v0  ;;  %v315_v17 = vadd.f32 %v2302_v2, %v276_v9  ;;  %v316_v18 = vadd.f32 %v2302_v2, %v277_v10  ;;  %v243_v21 = vld [vmem:[%s2297_s25 + $0x30] sm:$0xff]  ;;  %v244_v22 = vld [vmem:[%s2297_s25 + $0x38] sm:$0xff]  ;;  %v280_v24 = vmul.f32 %v2290_v1, %v241_v15 }
  0x14   : > { %414 = vst.msk [vmem:[#allocation2 + $0xb9] sm:$0x1] %vm388_vm2, %v2191_v0  ;;  %415 = vst.msk [vmem:[#allocation2 + $0xd1] sm:$0x1] %vm388_vm2, %v2191_v0  ;;  %v317_v23 = vadd.f32 %v2302_v2, %v278_v11  ;;  %v281_v25 = vmul.f32 %v2290_v1, %v242_v20  ;;  %v282_v26 = vmul.f32 %v2290_v1, %v243_v21  ;;  %v245_v27 = vld [vmem:[%s2297_s25 + $0x40] sm:$0xff]  ;;  %v246_v28 = vld [vmem:[%s2297_s25 + $0x48] sm:$0xff] }
  0x15   : > { %416 = vst.msk [vmem:[#allocation2 + $0xe9] sm:$0x1] %vm388_vm2, %v2191_v0  ;;  %417 = vst.msk [vmem:[#allocation2 + $0x101] sm:$0x1] %vm388_vm2, %v2191_v0  ;;  %v347_v29 = vmax.f32 %v315_v17, 0.0  ;;  %v348_v30 = vmax.f32 %v316_v18, 0.0  ;;  %v318_v31 = vadd.f32 %v2302_v2, %v279_v19  ;;  %v283_v32 = vmul.f32 %v2290_v1, %v244_v22 }
  0x16   : > { %418 = vst.msk [vmem:[#allocation2 + $0x119] sm:$0x1] %vm388_vm2, %v2191_v0  ;;  %419 = vst.msk [vmem:[#allocation2 + $0x131] sm:$0x1] %vm388_vm2, %v2191_v0  ;;  %v247_v33 = vld [vmem:[%s2297_s25 + $0x50] sm:$0xff]  ;;  %v349_v34 = vmax.f32 %v317_v23, 0.0  ;;  %v319_v35 = vadd.f32 %v2302_v2, %v280_v24  ;;  %v320_v36 = vadd.f32 %v2302_v2, %v281_v25  ;;  %v321_v37 = vadd.f32 %v2302_v2, %v282_v26 }
  0x17   : > { %420 = vst.msk [vmem:[#allocation2 + $0x149] sm:$0x1] %vm388_vm2, %v2191_v0  ;;  %421 = vst.msk [vmem:[#allocation2 + $0x161] sm:$0x1] %vm388_vm2, %v2191_v0  ;;  %v248_v38 = vld [vmem:[%s2297_s25 + $0x58] sm:$0xff]  ;;  %v350_v39 = vmax.f32 %v318_v31, 0.0  ;;  %v322_v40 = vadd.f32 %v2302_v2, %v283_v32  ;;  %v284_v41 = vmul.f32 %v2290_v1, %v245_v27  ;;  %v285_v42 = vmul.f32 %v2290_v1, %v246_v28 }
  0x18   : > { %422 = vst.msk [vmem:[#allocation2 + $0x179] sm:$0x1] %vm388_vm2, %v2191_v0  ;;  %423 = vst.msk [vmem:[#allocation2 + $0x191] sm:$0x1] %vm388_vm2, %v2191_v0  ;;  %v249_v43 = vld [vmem:[%s2297_s25 + $0x60] sm:$0xff]  ;;  %v250_v44 = vld [vmem:[%s2297_s25 + $0x68] sm:$0xff]  ;;  %v286_v49 = vmul.f32 %v2290_v1, %v247_v33  ;;  %v287_v54 = vmul.f32 %v2290_v1, %v248_v38 }
  0x19   : > { %407 = vst.msk [vmem:[#allocation2 + $0x11] sm:$0x1] %vm388_vm2, %v2191_v0  ;;  %389 = vst.msk [vmem:[#allocation2] sm:$0x1] %vm388_vm2, %v2191_v0  ;;  %v251_v45 = vld [vmem:[%s2297_s25 + $0x70] sm:$0xff]  ;;  %v351_v46 = vmax.f32 %v319_v35, 0.0  ;;  %v323_v52 = vadd.f32 %v2302_v2, %v284_v41  ;;  %v324_v53 = vadd.f32 %v2302_v2, %v285_v42  ;;  %v288_v56 = vmul.f32 %v2290_v1, %v249_v43 }
  0x1a   : > { %424 = vst.msk [vmem:[#allocation2 + $0x1a9] sm:$0x1] %vm388_vm2, %v2191_v0  ;;  %406 = vst.msk [vmem:[#allocation2 + $0x198] sm:$0x1] %vm388_vm2, %v2191_v0  ;;  %v352_v47 = vmax.f32 %v320_v36, 0.0  ;;  %v353_v48 = vmax.f32 %v321_v37, 0.0  ;;  %v325_v55 = vadd.f32 %v2302_v2, %v286_v49  ;;  %v289_v57 = vmul.f32 %v2290_v1, %v250_v44 }
  0x1b   : > { %426 = vst.msk [vmem:[#allocation2 + $0x19] sm:$0xff] %vm379_vm0, %v347_v29  ;;  %427 = vst.msk [vmem:[#allocation2 + $0x21] sm:$0xff] %vm379_vm0, %v348_v30  ;;  %v252_v50 = vld [vmem:[%s2297_s25 + $0x78] sm:$0xff]  ;;  %v354_v51 = vmax.f32 %v322_v40, 0.0  ;;  %v290_v58 = vmul.f32 %v2290_v1, %v251_v45  ;;  %v253_v59 = vld [vmem:[%s2297_s25 + $0x80] sm:$0xff]  ;;  %v355_v60 = vmax.f32 %v323_v52, 0.0  ;;  %v326_v62 = vadd.f32 %v2302_v2, %v287_v54 }
  0x1c   : > { %428 = vst.msk [vmem:[#allocation2 + $0x31] sm:$0xff] %vm379_vm0, %v349_v34  ;;  %429 = vst.msk [vmem:[#allocation2 + $0x39] sm:$0xff] %vm379_vm0, %v350_v39  ;;  %v356_v61 = vmax.f32 %v324_v53, 0.0  ;;  %v291_v63 = vmul.f32 %v2290_v1, %v252_v50  ;;  %v254_v0 = vld [vmem:[%s2297_s25 + $0x88] sm:$0xff]  ;;  %v357_v3 = vmax.f32 %v325_v55, 0.0  ;;  %v327_v4 = vadd.f32 %v2302_v2, %v288_v56  ;;  %v255_v10 = vld [vmem:[%s2297_s25 + $0x90] sm:$0xff] }
  0x1d   : > { %430 = vst.msk [vmem:[#allocation2 + $0x49] sm:$0xff] %vm379_vm0, %v351_v46  ;;  %431 = vst.msk [vmem:[#allocation2 + $0x51] sm:$0xff] %vm379_vm0, %v352_v47  ;;  %v328_v5 = vadd.f32 %v2302_v2, %v289_v57  ;;  %v358_v7 = vmax.f32 %v326_v62, 0.0  ;;  %v292_v9 = vmul.f32 %v2290_v1, %v253_v59  ;;  %v293_v17 = vmul.f32 %v2290_v1, %v254_v0  ;;  %v256_v28 = vld [vmem:[%s2297_s25 + $0x98] sm:$0xff]  ;;  %v2180_v50 = vld [vmem:[%s2941_s3] sm:$0xff]   ;;  %s2072_s20 = sshll.u32 %s2945_s19, 1 }
  0x1e   : > { %432 = vst.msk [vmem:[#allocation2 + $0x61] sm:$0xff] %vm379_vm0, %v353_v48  ;;  %433 = vst.msk [vmem:[#allocation2 + $0x69] sm:$0xff] %vm379_vm0, %v354_v51  ;;  %v330_v8 = vadd.f32 %v2302_v2, %v291_v63  ;;  %v359_v14 = vmax.f32 %v327_v4, 0.0  ;;  %v294_v31 = vmul.f32 %v2290_v1, %v255_v10  ;;  %v295_v36 = vmul.f32 %v2290_v1, %v256_v28  ;;  %v2181_v52 = vld [vmem:[%s2941_s3 + $0x8] sm:$0xff]   ;;  %v257_v54 = vld [vmem:[%s2297_s25 + $0xa0] sm:$0xff] }
  0x1f   : > { %434 = vst.msk [vmem:[#allocation2 + $0x79] sm:$0xff] %vm379_vm0, %v355_v60  ;;  %435 = vst.msk [vmem:[#allocation2 + $0x81] sm:$0xff] %vm379_vm0, %v356_v61  ;;  %v360_v15 = vmax.f32 %v328_v5, 0.0  ;;  %v331_v23 = vadd.f32 %v2302_v2, %v292_v9  ;;  %v332_v27 = vadd.f32 %v2302_v2, %v293_v17  ;;  %2117 = vmatprep.subr.bf16.mxu0 %v2180_v50  ;;  %v2182_v53 = vld [vmem:[%s2941_s3 + $0x10] ss:$0 sps:$4 sm:$0x33]   ;;  %2155 = vmatprep.subr.bf16.mxu1 %v2180_v50 }
  0x20   : > { %v555_v12 = vld [vmem:[#allocation2 + $0xa] sm:$0xff]  ;;  %436 = vst.msk [vmem:[#allocation2 + $0x91] sm:$0xff] %vm379_vm0, %v357_v3  ;;  %437 = vst.msk [vmem:[#allocation2 + $0x99] sm:$0xff] %vm379_vm0, %v358_v7  ;;  %v362_v22 = vmax.f32 %v330_v8, 0.0  ;;  %v333_v37 = vadd.f32 %v2302_v2, %v294_v31  ;;  %v334_v39 = vadd.f32 %v2302_v2, %v295_v36  ;;  %2118 = vmatpush3.bf16.msra.mxu0 %v2180_v50  ;;  %2158 = vmatpush3.bf16.msra.mxu1 %v2180_v50  ;;  %v260_v59 = vld [vmem:[%s2297_s25 + $0xb8] sm:$0xff]  ;;  %vm1521_vm10 = vcmask 261120  }
  0x21   : > { %v586_v16 = vpack.c.bf16 %v555_v12, %v554_v6  ;;  %v329_v6 = vadd.f32 %v2302_v2, %v290_v58  ;;  %438 = vst.msk [vmem:[#allocation2 + $0xa9] sm:$0xff] %vm379_vm0, %v359_v14  ;;  %439 = vst.msk [vmem:[#allocation2 + $0xb1] sm:$0xff] %vm379_vm0, %v360_v15  ;;  %v363_v30 = vmax.f32 %v331_v23, 0.0  ;;  %v364_v35 = vmax.f32 %v332_v27, 0.0  ;;  %v258_v55 = vld [vmem:[%s2297_s25 + $0xa8] sm:$0xff]  ;;  %2119 = vmatprep.subr.bf16.mxu0 %v2181_v52  ;;  %v259_v58 = vld [vmem:[%s2297_s25 + $0xb0] sm:$0xff] }
  0x22   : > { %v556_v11 = vld [vmem:[#allocation2 + $0x1a] sm:$0xff]  ;;  %v557_v12 = vld [vmem:[#allocation2 + $0x22] sm:$0xff]  ;;  %441 = vst.msk [vmem:[#allocation2 + $0xc9] sm:$0xff] %vm379_vm0, %v362_v22  ;;  %v365_v40 = vmax.f32 %v333_v37, 0.0  ;;  %v366_v43 = vmax.f32 %v334_v39, 0.0  ;;  %v296_v56 = vmul.f32 %v2290_v1, %v257_v54  ;;  %v297_v57 = vmul.f32 %v2290_v1, %v258_v55  ;;  %2156 = vmatprep.subr.bf16.mxu1 %v2181_v52  ;;  %v263_v37 = vld [vmem:[%s2297_s25 + $0xd0] sm:$0xff] }
  0x23   : > { %955 = vrot.lane.b32.xlu1 %v586_v16, %s2193_s29  ;;  %v508_v13 = vld [vmem:[#allocation2 + $0x19] sm:$0xff]  ;;  %v361_v16 = vmax.f32 %v329_v6, 0.0  ;;  %v587_v18 = vpack.c.bf16 %v557_v12, %v556_v11  ;;  %v509_v19 = vld [vmem:[#allocation2 + $0x21] sm:$0xff]  ;;  %v604_v20 = vld [vmem:[#allocation2 + $0x30] sm:$0xff]  ;;  %442 = vst.msk [vmem:[#allocation2 + $0xd9] sm:$0xff] %vm379_vm0, %v363_v30  ;;  %v298_v62 = vmul.f32 %v2290_v1, %v259_v58  ;;  %v299_v63 = vmul.f32 %v2290_v1, %v260_v59 }
  0x24   : > { %v602_v21 = vld [vmem:[#allocation2 + $0x18] sm:$0xff]  ;;  %v539_v24 = vpack.c.bf16 %v509_v19, %v508_v13  ;;  %v603_v26 = vld [vmem:[#allocation2 + $0x20] sm:$0xff]  ;;  %443 = vst.msk [vmem:[#allocation2 + $0xe1] sm:$0xff] %vm379_vm0, %v364_v35  ;;  %444 = vst.msk [vmem:[#allocation2 + $0xf1] sm:$0xff] %vm379_vm0, %v365_v40  ;;  %v335_v60 = vadd.f32 %v2302_v2, %v296_v56  ;;  %v336_v61 = vadd.f32 %v2302_v2, %v297_v57  ;;  %2120 = vmatpush3.bf16.msra.mxu0 %v2181_v52  ;;  %vm1574_vm11 = vcmask 293888  }
  0x25   : > { %v605_v25 = vld [vmem:[#allocation2 + $0x38] sm:$0xff]  ;;  %440 = vst.msk [vmem:[#allocation2 + $0xc1] sm:$0xff] %vm379_vm0, %v361_v16  ;;  %v2383_v32 = vpack.c.bf16 %v603_v26, %v602_v21  ;;  %445 = vst.msk [vmem:[#allocation2 + $0xf9] sm:$0xff] %vm379_vm0, %v366_v43  ;;  %v749_v45 = vld [vmem:[#allocation2 + $0x48] sm:$0xff]  ;;  %v1609_v4 = vsel %vm1607_vm3, %v2182_v53, 0  ;;  %2161 = vmatprep.subr.msk.bf16.mxu0 %vm1607_vm3, %v2182_v53  ;;  %v337_v7 = vadd.f32 %v2302_v2, %v298_v62  ;;  %2159 = vmatpush3.bf16.msra.mxu1 %v2181_v52  ;;  %vm1974_vm12 = vcmask 1040384  }
  0x26   : > { %v2378_v29 = vpack.c.bf16 %v605_v25, %v604_v20  ;;  %909 = vrot.lane.b32.xlu0 %v539_v24, %s2192_s28  ;;  %v652_v33 = vld [vmem:[#allocation2 + $0x31] sm:$0xff]  ;;  %v653_v34 = vld [vmem:[#allocation2 + $0x39] sm:$0xff]  ;;  %v797_v48 = vld [vmem:[#allocation2 + $0x49] sm:$0xff]  ;;  %v367_v5 = vmax.f32 %v335_v60, 0.0  ;;  %v368_v6 = vmax.f32 %v336_v61, 0.0  ;;  %v338_v8 = vadd.f32 %v2302_v2, %v299_v63  ;;  %2162 = vmatprep.subr.msk.bf16.mxu1 %vm1607_vm3, %v2182_v53 }
  0x27   : > { %957 = vrot.lane.b32.xlu1 %v587_v18, %s2193_s29  ;;  %v683_v38 = vpack.c.bf16 %v653_v34, %v652_v33  ;;  %v700_v41 = vld [vmem:[#allocation2 + $0x32] sm:$0xff]  ;;  %v701_v42 = vld [vmem:[#allocation2 + $0x3a] sm:$0xff]  ;;  %v845_v0 = vld [vmem:[#allocation2 + $0x4a] sm:$0xff]  ;;  %v369_v10 = vmax.f32 %v337_v7, 0.0  ;;  %v302_v39 = vmul.f32 %v2290_v1, %v263_v37 }
  0x28   : > { %v2396_v44 = vpack.c.bf16 %v701_v42, %v700_v41  ;;  %v750_v46 = vld [vmem:[#allocation2 + $0x50] sm:$0xff]  ;;  %446 = vst.msk [vmem:[#allocation2 + $0x109] sm:$0xff] %vm379_vm0, %v367_v5  ;;  %447 = vst.msk [vmem:[#allocation2 + $0x111] sm:$0xff] %vm379_vm0, %v368_v6  ;;  %v370_v11 = vmax.f32 %v338_v8, 0.0  ;;  %2122 = vmatpush3.bf16.msra.mxu0 %v1609_v4  ;;  %v608_v12 = vld [vmem:[#allocation2 + $0x60] sm:$0xff] }
  0x29   : > { %v2402_v47 = vpack.c.bf16 %v750_v46, %v749_v45  ;;  %v798_v49 = vld [vmem:[#allocation2 + $0x51] sm:$0xff]  ;;  %448 = vst.msk [vmem:[#allocation2 + $0x121] sm:$0xff] %vm379_vm0, %v369_v10  ;;  %2160 = vmatpush3.bf16.msra.mxu1 %v1609_v4  ;;  %v609_v13 = vld [vmem:[#allocation2 + $0x68] sm:$0xff]  ;;  %v261_v17 = vld [vmem:[%s2297_s25 + $0xc0] sm:$0xff]  ;;  %v341_v43 = vadd.f32 %v2302_v2, %v302_v39 }
  0x2a   : > { %1003 = vrot.lane.b32.xlu0 %v2383_v32, %s2194_s30  ;;  %v2410_v51 = vpack.c.bf16 %v798_v49, %v797_v48  ;;  %v846_v3 = vld [vmem:[#allocation2 + $0x52] sm:$0xff]  ;;  %449 = vst.msk [vmem:[#allocation2 + $0x129] sm:$0xff] %vm379_vm0, %v370_v11  ;;  %v2449_v14 = vpack.c.bf16 %v609_v13, %v608_v12  ;;  %v656_v15 = vld [vmem:[#allocation2 + $0x61] sm:$0xff]  ;;  %v657_v16 = vld [vmem:[#allocation2 + $0x69] sm:$0xff]  ;;  %v300_v19 = vmul.f32 %v2290_v1, %v261_v17 }
  0x2b   : > { %1005 = vrot.lane.b32.xlu1 %v2378_v29, %s2194_s30  ;;  %v876_v9 = vpack.c.bf16 %v846_v3, %v845_v0  ;;  %v685_v20 = vpack.c.bf16 %v657_v16, %v656_v15  ;;  %v704_v22 = vld [vmem:[#allocation2 + $0x62] sm:$0xff]  ;;  %v705_v23 = vld [vmem:[#allocation2 + $0x6a] sm:$0xff]  ;;  %v753_v30 = vld [vmem:[#allocation2 + $0x78] sm:$0xff]  ;;  %v373_v46 = vmax.f32 %v341_v43, 0.0 }
  0x2c   : > { %v733_v27 = vpack.c.bf16 %v705_v23, %v704_v22  ;;  %v754_v31 = vld [vmem:[#allocation2 + $0x80] sm:$0xff]  ;;  %v612_v49 = vld [vmem:[#allocation2 + $0x90] sm:$0xff]  ;;  %v613_v50 = vld [vmem:[#allocation2 + $0x98] sm:$0xff] }
  0x2d   : > { %v2469_v33 = vpack.c.bf16 %v754_v31, %v753_v30  ;;  %v801_v34 = vld [vmem:[#allocation2 + $0x79] sm:$0xff]  ;;  %v802_v35 = vld [vmem:[#allocation2 + $0x81] sm:$0xff]  ;;  %452 = vst.msk [vmem:[#allocation2 + $0x151] sm:$0xff] %vm379_vm0, %v373_v46  ;;  %v660_v54 = vld [vmem:[#allocation2 + $0x91] sm:$0xff] }
  0x2e   : > { %1051 = vrot.lane.b32.xlu0 %v539_v24, %s2195_s6  ;;  %v339_v24 = vadd.f32 %v2302_v2, %v300_v19  ;;  %v830_v36 = vpack.c.bf16 %v802_v35, %v801_v34  ;;  %v849_v41 = vld [vmem:[#allocation2 + $0x7a] sm:$0xff]  ;;  %v850_v42 = vld [vmem:[#allocation2 + $0x82] sm:$0xff]  ;;  %v708_v61 = vld [vmem:[#allocation2 + $0x92] sm:$0xff] }
  0x2f   : > { %1053 = vrot.lane.b32.xlu1 %v683_v38, %s2195_s6  ;;  %v878_v45 = vpack.c.bf16 %v850_v42, %v849_v41  ;;  %v265_v52 = vld [vmem:[%s2297_s25 + $0xe0] sm:$0xff]  ;;  %v266_v53 = vld [vmem:[%s2297_s25 + $0xe8] sm:$0xff]  ;;  %v758_v5 = vld [vmem:[#allocation2 + $0xb0] sm:$0xff] }
  0x30   : > { %v371_v26 = vmax.f32 %v339_v24, 0.0  ;;  %v661_v55 = vld [vmem:[#allocation2 + $0x99] sm:$0xff]  ;;  %v304_v56 = vmul.f32 %v2290_v1, %v265_v52  ;;  %v305_v57 = vmul.f32 %v2290_v1, %v266_v53  ;;  %v757_v4 = vld [vmem:[#allocation2 + $0xa8] sm:$0xff]  ;;  %v806_v8 = vld [vmem:[#allocation2 + $0xb1] sm:$0xff] }
  0x31   : > { %v687_v60 = vpack.c.bf16 %v661_v55, %v660_v54  ;;  %v709_v62 = vld [vmem:[#allocation2 + $0x9a] sm:$0xff]  ;;  %v2509_v6 = vpack.c.bf16 %v758_v5, %v757_v4  ;;  %v805_v7 = vld [vmem:[#allocation2 + $0xa9] sm:$0xff]  ;;  %v854_v16 = vld [vmem:[#allocation2 + $0xb2] sm:$0xff] }
  0x32   : > { %1099 = vrot.lane.b32.xlu0 %v587_v18, %s2196_s7  ;;  %v262_v18 = vld [vmem:[%s2297_s25 + $0xc8] sm:$0xff]  ;;  %450 = vst.msk [vmem:[#allocation2 + $0x139] sm:$0xff] %vm379_vm0, %v371_v26  ;;  %v343_v58 = vadd.f32 %v2302_v2, %v304_v56  ;;  %v344_v59 = vadd.f32 %v2302_v2, %v305_v57  ;;  %v735_v3 = vpack.c.bf16 %v709_v62, %v708_v61  ;;  %v267_v10 = vld [vmem:[%s2297_s25 + $0xf0] sm:$0xff]  ;;  %v268_v11 = vld [vmem:[%s2297_s25 + $0xf8] sm:$0xff] }
  0x33   : > { %1101 = vrot.lane.b32.xlu1 %v2396_v44, %s2196_s7  ;;  %v301_v21 = vmul.f32 %v2290_v1, %v262_v18  ;;  %v306_v12 = vmul.f32 %v2290_v1, %v267_v10  ;;  %v307_v13 = vmul.f32 %v2290_v1, %v268_v11  ;;  %v853_v15 = vld [vmem:[#allocation2 + $0xaa] sm:$0xff]  ;;  %v664_v23 = vld [vmem:[#allocation2 + $0xc1] sm:$0xff]  ;;  %v761_v30 = vld [vmem:[#allocation2 + $0xd8] sm:$0xff] }
  0x34   : > { %v375_v63 = vmax.f32 %v343_v58, 0.0  ;;  %v376_v0 = vmax.f32 %v344_v59, 0.0  ;;  %v880_v19 = vpack.c.bf16 %v854_v16, %v853_v15  ;;  %v617_v22 = vld [vmem:[#allocation2 + $0xc8] sm:$0xff]  ;;  %v762_v31 = vld [vmem:[#allocation2 + $0xe0] sm:$0xff]  ;;  %v620_v53 = vld [vmem:[#allocation2 + $0xf0] sm:$0xff] }
  0x35   : > { %v340_v25 = vadd.f32 %v2302_v2, %v301_v21  ;;  %v345_v17 = vadd.f32 %v2302_v2, %v306_v12  ;;  %v346_v18 = vadd.f32 %v2302_v2, %v307_v13  ;;  %v665_v24 = vld [vmem:[#allocation2 + $0xc9] sm:$0xff]  ;;  %v2538_v35 = vpack.c.bf16 %v762_v31, %v761_v30  ;;  %v809_v37 = vld [vmem:[#allocation2 + $0xd9] sm:$0xff]  ;;  %v668_v59 = vld [vmem:[#allocation2 + $0xf1] sm:$0xff] }
  0x36   : > { %1147 = vrot.lane.b32.xlu0 %v2378_v29, %s2197_s10  ;;  %454 = vst.msk [vmem:[#allocation2 + $0x169] sm:$0xff] %vm379_vm0, %v375_v63  ;;  %455 = vst.msk [vmem:[#allocation2 + $0x171] sm:$0xff] %vm379_vm0, %v376_v0  ;;  %v712_v26 = vld [vmem:[#allocation2 + $0xc2] sm:$0xff]  ;;  %v857_v43 = vld [vmem:[#allocation2 + $0xda] sm:$0xff] }
  0x37   : > { %1149 = vrot.lane.b32.xlu1 %v2402_v47, %s2197_s10  ;;  %v372_v28 = vmax.f32 %v340_v25, 0.0  ;;  %v378_v21 = vmax.f32 %v346_v18, 0.0  ;;  %v689_v25 = vpack.c.bf16 %v665_v24, %v664_v23  ;;  %v458_v52 = vld [vmem:[#allocation2] sm:$0xff]  ;;  %v621_v54 = vld [vmem:[#allocation2 + $0xf8] sm:$0xff]  ;;  %v765_v15 = vld [vmem:[#allocation2 + $0x108] sm:$0xff] }
  0x38   : > { %v2551_v58 = vpack.c.bf16 %v621_v54, %v620_v53  ;;  %v717_v4 = vld [vmem:[#allocation2 + $0xfa] sm:$0xff]  ;;  %v766_v16 = vld [vmem:[#allocation2 + $0x110] sm:$0xff] }
  0x39   : > { %451 = vst.msk [vmem:[#allocation2 + $0x141] sm:$0xff] %vm379_vm0, %v372_v28  ;;  %457 = vst.msk [vmem:[#allocation2 + $0x189] sm:$0xff] %vm379_vm0, %v378_v21  ;;  %v813_v24 = vld [vmem:[#allocation2 + $0x109] sm:$0xff] }
  0x3a   : > { %1195 = vrot.lane.b32.xlu0 %v683_v38, %s2198_s15  ;;  %v673_v53 = vld [vmem:[#allocation2 + $0x129] sm:$0xff] }
  0x3b   : > { %1197 = vrot.lane.b32.xlu1 %v2410_v51, %s2198_s15 }
  0x3e   : > { %1243 = vrot.lane.b32.xlu0 %v2396_v44, %s2199_s16 }
  0x3f   : > { %911 = vrot.lane.b32.xlu1 %v683_v38, %s2192_s28  ;;  %v264_v38 = vld [vmem:[%s2297_s25 + $0xd8] sm:$0xff]  ;;  %s235_s25 = scalar_lea.vmem %s2943_s5, %s2072_s20 }
  0x40   : > { %v303_v40 = vmul.f32 %v2290_v1, %v264_v38  ;;  %v616_v1 = vld [vmem:[#allocation2 + $0xc0] sm:$0xff] }
  0x41   : > { %v810_v38 = vld [vmem:[#allocation2 + $0xe1] sm:$0xff] }
  0x42   : > { %1245 = vrot.lane.b32.xlu0 %v876_v9, %s2199_s16  ;;  %v834_v39 = vpack.c.bf16 %v810_v38, %v809_v37 }
  0x43   : > { %913 = vrot.lane.b32.xlu1 %v2410_v51, %s2192_s28 }
  0x46   : > { %959 = vrot.lane.b32.xlu0 %v2396_v44, %s2193_s29  ;;  %v342_v44 = vadd.f32 %v2302_v2, %v303_v40  ;;  %v641_v2 = vpack.c.bf16 %v617_v22, %v616_v1 }
  0x47   : > { %961 = vrot.lane.b32.xlu1 %v876_v9, %s2193_s29 }
  0x48   : > { %v374_v48 = vmax.f32 %v342_v44, 0.0  ;;  %v858_v44 = vld [vmem:[#allocation2 + $0xe2] sm:$0xff] }
  0x49   : > { %v882_v46 = vpack.c.bf16 %v858_v44, %v857_v43 }
  0x4a   : > { %1007 = vrot.lane.b32.xlu0 %v2402_v47, %s2194_s30  ;;  %453 = vst.msk [vmem:[#allocation2 + $0x159] sm:$0xff] %vm379_vm0, %v374_v48 }
  0x4b   : > { %1009 = vrot.lane.b32.xlu1 %v2449_v14, %s2194_s30 }
  0x4e   : > { %1055 = vrot.lane.b32.xlu0 %v2410_v51, %s2195_s6  ;;  %v2491_v51 = vpack.c.bf16 %v613_v50, %v612_v49  ;;  %v459_v50 = vld [vmem:[#allocation2 + $0x8] sm:$0xff] }
  0x4f   : > { %1057 = vrot.lane.b32.xlu1 %v685_v20, %s2195_s6  ;;  %v490_v56 = vpack.c.bf16 %v459_v50, %v458_v52  ;;  %v672_v52 = vld [vmem:[#allocation2 + $0x121] sm:$0xff] }
  0x52   : > { %1103 = vrot.lane.b32.xlu0 %v876_v9, %s2196_s7  ;;  %v832_v9 = vpack.c.bf16 %v806_v8, %v805_v7 }
  0x53   : > { %1105 = vrot.lane.b32.xlu1 %v733_v27, %s2196_s7 }
  0x56   : > { %1151 = vrot.lane.b32.xlu0 %v2449_v14, %s2197_s10 }
  0x57   : > { %1153 = vrot.lane.b32.xlu1 %v2469_v33, %s2197_s10 }
  0x5a   : > { %1199 = vrot.lane.b32.xlu0 %v685_v20, %s2198_s15 }
  0x5b   : > { %1201 = vrot.lane.b32.xlu1 %v830_v36, %s2198_s15 }
  0x5e   : > { %1247 = vrot.lane.b32.xlu0 %v733_v27, %s2199_s16 }
  0x5f   : > { %915 = vrot.lane.b32.xlu1 %v685_v20, %s2192_s28  ;;  %v377_v20 = vmax.f32 %v345_v17, 0.0 }
  0x61   : > { %456 = vst.msk [vmem:[#allocation2 + $0x181] sm:$0xff] %vm379_vm0, %v377_v20 }
  0x62   : > { %1249 = vrot.lane.b32.xlu0 %v878_v45, %s2199_s16 }
  0x63   : > { %917 = vrot.lane.b32.xlu1 %v830_v36, %s2192_s28 }
  0x66   : > { %963 = vrot.lane.b32.xlu0 %v733_v27, %s2193_s29  ;;  %v713_v27 = vld [vmem:[#allocation2 + $0xca] sm:$0xff] }
  0x67   : > { %965 = vrot.lane.b32.xlu1 %v878_v45, %s2193_s29  ;;  %v737_v28 = vpack.c.bf16 %v713_v27, %v712_v26 }
  0x6a   : > { %1011 = vrot.lane.b32.xlu0 %v2469_v33, %s2194_s30 }
  0x6b   : > { %1013 = vrot.lane.b32.xlu1 %v2491_v51, %s2194_s30 }
  0x6e   : > { %1059 = vrot.lane.b32.xlu0 %v830_v36, %s2195_s6 }
  0x6f   : > { %1061 = vrot.lane.b32.xlu1 %v687_v60, %s2195_s6 }
  0x72   : > { %1107 = vrot.lane.b32.xlu0 %v878_v45, %s2196_s7 }
  0x73   : > { %1109 = vrot.lane.b32.xlu1 %v735_v3, %s2196_s7 }
  0x76   : > { %1155 = vrot.lane.b32.xlu0 %v2491_v51, %s2197_s10 }
  0x77   : > { %1157 = vrot.lane.b32.xlu1 %v2509_v6, %s2197_s10 }
  0x7a   : > { %1203 = vrot.lane.b32.xlu0 %v687_v60, %s2198_s15 }
  0x7b   : > { %1205 = vrot.lane.b32.xlu1 %v832_v9, %s2198_s15 }
  0x7e   : > { %1251 = vrot.lane.b32.xlu0 %v735_v3, %s2199_s16 }
  0x7f   : > { %919 = vrot.lane.b32.xlu1 %v687_v60, %s2192_s28  ;;  %v669_v60 = vld [vmem:[#allocation2 + $0xf9] sm:$0xff] }
  0x80   : > { %v691_v0 = vpack.c.bf16 %v669_v60, %v668_v59  ;;  %v720_v59 = vld [vmem:[#allocation2 + $0x122] sm:$0xff]  ;;  %v721_v60 = vld [vmem:[#allocation2 + $0x12a] sm:$0xff] }
  0x82   : > { %1253 = vrot.lane.b32.xlu0 %v880_v19, %s2199_s16 }
  0x83   : > { %921 = vrot.lane.b32.xlu1 %v832_v9, %s2192_s28 }
  0x84   : > { %v908_v36 = vpop.permute.xlu0 %907 }
  0x85   : > { %v1277_v62 = vsel %vm379_vm0, %v490_v56, %v908_v36  ;;  %v693_v56 = vpack.c.bf16 %v673_v53, %v672_v52  ;;  %v724_v52 = vld [vmem:[#allocation2 + $0x152] sm:$0xff]  ;;  %v725_v53 = vld [vmem:[#allocation2 + $0x15a] sm:$0xff] }
  0x86   : > { %967 = vrot.lane.b32.xlu0 %v735_v3, %s2193_s29  ;;  %v716_v3 = vld [vmem:[#allocation2 + $0xf2] sm:$0xff] }
  0x87   : > { %969 = vrot.lane.b32.xlu1 %v880_v19, %s2193_s29  ;;  %v739_v12 = vpack.c.bf16 %v717_v4, %v716_v3  ;;  %v741_v4 = vpack.c.bf16 %v721_v60, %v720_v59  ;;  %v743_v60 = vpack.c.bf16 %v725_v53, %v724_v52 }
  0x8a   : > { %1015 = vrot.lane.b32.xlu0 %v2509_v6, %s2194_s30 }
  0x8b   : > { %1017 = vrot.lane.b32.xlu1 %v641_v2, %s2194_s30 }
  0x8e   : > { %1063 = vrot.lane.b32.xlu0 %v832_v9, %s2195_s6 }
  0x8f   : > { %1065 = vrot.lane.b32.xlu1 %v689_v25, %s2195_s6 }
  0x92   : > { %1111 = vrot.lane.b32.xlu0 %v880_v19, %s2196_s7 }
  0x93   : > { %1113 = vrot.lane.b32.xlu1 %v737_v28, %s2196_s7 }
  0x95   : > { %v956_v34 = vpop.permute.xlu1 %955 }
  0x96   : > { %1159 = vrot.lane.b32.xlu0 %v641_v2, %s2197_s10  ;;  %v1325_v5 = vsel %vm1323_vm4, %v1277_v62, %v956_v34  ;;  %v2574_v2 = vpack.c.bf16 %v766_v16, %v765_v15 }
  0x97   : > { %1161 = vrot.lane.b32.xlu1 %v2538_v35, %s2197_s10 }
  0x98   : > { %v910_v41 = vpop.permute.xlu0 %909 }
  0x99   : > { %v958_v40 = vpop.permute.xlu1 %957  ;;  %v1280_v8 = vsel %vm379_vm0, %v2383_v32, %v910_v41 }
  0x9a   : > { %1207 = vrot.lane.b32.xlu0 %v689_v25, %s2198_s15  ;;  %v1327_v17 = vsel %vm1323_vm4, %v1280_v8, %v958_v40  ;;  %v862_v40 = vld [vmem:[#allocation2 + $0x112] sm:$0xff]  ;;  %v770_v8 = vld [vmem:[#allocation2 + $0x140] sm:$0xff] }
  0x9b   : > { %1209 = vrot.lane.b32.xlu1 %v834_v39, %s2198_s15 }
  0x9c   : > { %v1004_v45 = vpop.permute.xlu0 %1003 }
  0x9d   : > { %v1006_v42 = vpop.permute.xlu1 %1005  ;;  %v1358_v9 = vsel %vm1356_vm5, %v1325_v5, %v1004_v45  ;;  %v624_v45 = vld [vmem:[#allocation2 + $0x120] sm:$0xff] }
  0x9e   : > { %1255 = vrot.lane.b32.xlu0 %v737_v28, %s2199_s16  ;;  %v1360_v19 = vsel %vm1356_vm5, %v1327_v17, %v1006_v42 }
  0x9f   : > { %923 = vrot.lane.b32.xlu1 %v689_v25, %s2192_s28  ;;  %v814_v25 = vld [vmem:[#allocation2 + $0x111] sm:$0xff] }
  0xa0   : > { %v1052_v49 = vpop.permute.xlu0 %1051  ;;  %v836_v34 = vpack.c.bf16 %v814_v25, %v813_v24 }
  0xa1   : > { %v1054_v48 = vpop.permute.xlu1 %1053  ;;  %v1391_v11 = vsel %vm1389_vm6, %v1358_v9, %v1052_v49 }
  0xa2   : > { %1257 = vrot.lane.b32.xlu0 %v882_v46, %s2199_s16  ;;  %v1393_v1 = vsel %vm1389_vm6, %v1360_v19, %v1054_v48  ;;  %v818_v19 = vld [vmem:[#allocation2 + $0x141] sm:$0xff] }
  0xa3   : > { %925 = vrot.lane.b32.xlu1 %v834_v39, %s2192_s28 }
  0xa4   : > { %v1100_v57 = vpop.permute.xlu0 %1099 }
  0xa5   : > { %v1102_v55 = vpop.permute.xlu1 %1101  ;;  %v1424_v13 = vsel %vm1422_vm7, %v1391_v11, %v1100_v57 }
  0xa6   : > { %971 = vrot.lane.b32.xlu0 %v737_v28, %s2193_s29  ;;  %v1426_v23 = vsel %vm1422_vm7, %v1393_v1, %v1102_v55 }
  0xa7   : > { %973 = vrot.lane.b32.xlu1 %v882_v46, %s2193_s29 }
  0xa8   : > { %v1148_v63 = vpop.permute.xlu0 %1147 }
  0xa9   : > { %v1150_v61 = vpop.permute.xlu1 %1149  ;;  %v1457_v32 = vsel %vm1455_vm8, %v1424_v13, %v1148_v63 }
  0xaa   : > { %1019 = vrot.lane.b32.xlu0 %v2538_v35, %s2194_s30  ;;  %v1459_v26 = vsel %vm1455_vm8, %v1426_v23, %v1150_v61 }
  0xab   : > { %1021 = vrot.lane.b32.xlu1 %v2551_v58, %s2194_s30 }
  0xac   : > { %v1196_v10 = vpop.permute.xlu0 %1195 }
  0xad   : > { %v1198_v7 = vpop.permute.xlu1 %1197  ;;  %v1490_v20 = vsel %vm1488_vm9, %v1457_v32, %v1196_v10 }
  0xae   : > { %1067 = vrot.lane.b32.xlu0 %v834_v39, %s2195_s6  ;;  %v1492_v28 = vsel %vm1488_vm9, %v1459_v26, %v1198_v7  ;;  %v861_v39 = vld [vmem:[#allocation2 + $0x10a] sm:$0xff]  ;;  %v769_v7 = vld [vmem:[#allocation2 + $0x138] sm:$0xff] }
  0xaf   : > { %1069 = vrot.lane.b32.xlu1 %v691_v0, %s2195_s6  ;;  %v884_v42 = vpack.c.bf16 %v862_v40, %v861_v39  ;;  %v2618_v17 = vpack.c.bf16 %v770_v8, %v769_v7  ;;  %v629_v39 = vld [vmem:[#allocation2 + $0x158] sm:$0xff] }
  0xb0   : > { %v1244_v21 = vpop.permute.xlu0 %1243 }
  0xb1   : > { %v912_v18 = vpop.permute.xlu1 %911  ;;  %v1523_v22 = vsel %vm1521_vm10, %v1490_v20, %v1244_v21 }
  0xb2   : > { %1115 = vrot.lane.b32.xlu0 %v882_v46, %s2196_s7  ;;  %2123 = vmatprep.mubr.msk.bf16.mxu0 %vm1574_vm11, %v1523_v22  ;;  %v625_v46 = vld [vmem:[#allocation2 + $0x128] sm:$0xff]  ;;  %v1283_v57 = vsel %vm379_vm0, %v2378_v29, %v912_v18  ;;  %v817_v18 = vld [vmem:[#allocation2 + $0x139] sm:$0xff] }
  0xb3   : > { %1117 = vrot.lane.b32.xlu1 %v739_v12, %s2196_s7  ;;  %v2594_v50 = vpack.c.bf16 %v625_v46, %v624_v45  ;;  %v838_v24 = vpack.c.bf16 %v818_v19, %v817_v18 }
  0xb4   : > { %v1246_v30 = vpop.permute.xlu0 %1245 }
  0xb5   : > { %v914_v27 = vpop.permute.xlu1 %913  ;;  %v1525_v31 = vsel %vm1521_vm10, %v1492_v28, %v1246_v30  ;;  %v865_v28 = vld [vmem:[#allocation2 + $0x13a] sm:$0xff]  ;;  %v866_v30 = vld [vmem:[#allocation2 + $0x142] sm:$0xff] }
  0xb6   : > { %1163 = vrot.lane.b32.xlu0 %v2551_v58, %s2197_s10  ;;  %2124 = vmatmul.mubr.msk.bf16.vlgmr.msra.gmra.mrb[0].mxu0 %vm1574_vm11, %v1525_v31  ;;  %v1286_v5 = vsel %vm379_vm0, %v2402_v47, %v914_v27 }
  0xb7   : > { %1165 = vrot.lane.b32.xlu1 %v2574_v2, %s2197_s10 }
  0xb8   : > { %v960_v37 = vpop.permute.xlu0 %959 }
  0xb9   : > { %v962_v36 = vpop.permute.xlu1 %961  ;;  %v1329_v61 = vsel %vm1323_vm4, %v1283_v57, %v960_v37 }
  0xba   : > { %1211 = vrot.lane.b32.xlu0 %v691_v0, %s2198_s15  ;;  %v1331_v9 = vsel %vm1323_vm4, %v1286_v5, %v962_v36 }
  0xbb   : > { %1213 = vrot.lane.b32.xlu1 %v836_v34, %s2198_s15 }
  0xbc   : > { %v1008_v41 = vpop.permute.xlu0 %1007 }
  0xbd   : > { %v1010_v38 = vpop.permute.xlu1 %1009  ;;  %v1362_v63 = vsel %vm1356_vm5, %v1329_v61, %v1008_v41 }
  0xbe   : > { %1259 = vrot.lane.b32.xlu0 %v739_v12, %s2199_s16 }
  0xbf   : > { %927 = vrot.lane.b32.xlu1 %v691_v0, %s2192_s28 }
  0xc0   : > { %v1056_v44 = vpop.permute.xlu0 %1055 }
  0xc1   : > { %v1058_v43 = vpop.permute.xlu1 %1057  ;;  %v1395_v3 = vsel %vm1389_vm6, %v1362_v63, %v1056_v44  ;;  %v677_v44 = vld [vmem:[#allocation2 + $0x159] sm:$0xff]  ;;  %v774_v63 = vld [vmem:[#allocation2 + $0x170] sm:$0xff] }
  0xc2   : > { %1261 = vrot.lane.b32.xlu0 %v884_v42, %s2199_s16 }
  0xc3   : > { %929 = vrot.lane.b32.xlu1 %v836_v34, %s2192_s28 }
  0xc4   : > { %v1104_v49 = vpop.permute.xlu0 %1103 }
  0xc5   : > { %v1106_v48 = vpop.permute.xlu1 %1105  ;;  %v1428_v29 = vsel %vm1422_vm7, %v1395_v3, %v1104_v49 }
  0xc6   : > { %975 = vrot.lane.b32.xlu0 %v739_v12, %s2193_s29  ;;  %v1364_v12 = vsel %vm1356_vm5, %v1331_v9, %v1010_v38  ;;  %v628_v38 = vld [vmem:[#allocation2 + $0x150] sm:$0xff] }
  0xc7   : > { %977 = vrot.lane.b32.xlu1 %v884_v42, %s2193_s29  ;;  %v1397_v16 = vsel %vm1389_vm6, %v1364_v12, %v1058_v43  ;;  %v676_v43 = vld [vmem:[#allocation2 + $0x151] sm:$0xff] }
  0xc8   : > { %v1152_v55 = vpop.permute.xlu0 %1151  ;;  %v1430_v32 = vsel %vm1422_vm7, %v1397_v16, %v1106_v48  ;;  %v695_v48 = vpack.c.bf16 %v677_v44, %v676_v43  ;;  %v822_v12 = vld [vmem:[#allocation2 + $0x171] sm:$0xff]  ;;  %v728_v43 = vld [vmem:[#allocation2 + $0x182] sm:$0xff] }
  0xc9   : > { %v1154_v54 = vpop.permute.xlu1 %1153  ;;  %v1461_v10 = vsel %vm1455_vm8, %v1428_v29, %v1152_v55  ;;  %v729_v44 = vld [vmem:[#allocation2 + $0x18a] sm:$0xff] }
  0xca   : > { %1023 = vrot.lane.b32.xlu0 %v2574_v2, %s2194_s30  ;;  %v1463_v20 = vsel %vm1455_vm8, %v1430_v32, %v1154_v54  ;;  %v745_v53 = vpack.c.bf16 %v729_v44, %v728_v43 }
  0xcb   : > { %1025 = vrot.lane.b32.xlu1 %v2594_v50, %s2194_s30 }
  0xcc   : > { %v1200_v0 = vpop.permute.xlu0 %1199 }
  0xcd   : > { %v1202_v62 = vpop.permute.xlu1 %1201  ;;  %v1494_v13 = vsel %vm1488_vm9, %v1461_v10, %v1200_v0 }
  0xce   : > { %1071 = vrot.lane.b32.xlu0 %v836_v34, %s2195_s6  ;;  %v1496_v1 = vsel %vm1488_vm9, %v1463_v20, %v1202_v62  ;;  %v886_v34 = vpack.c.bf16 %v866_v30, %v865_v28  ;;  %v773_v62 = vld [vmem:[#allocation2 + $0x168] sm:$0xff] }
  0xcf   : > { %1073 = vrot.lane.b32.xlu1 %v693_v56, %s2195_s6  ;;  %v2662_v9 = vpack.c.bf16 %v774_v63, %v773_v62  ;;  %v633_v28 = vld [vmem:[#allocation2 + $0x188] sm:$0xff] }
  0xd0   : > { %v1248_v15 = vpop.permute.xlu0 %1247 }
  0xd1   : > { %v916_v11 = vpop.permute.xlu1 %915  ;;  %v1527_v47 = vsel %vm1521_vm10, %v1494_v13, %v1248_v15 }
  0xd2   : > { %1119 = vrot.lane.b32.xlu0 %v884_v42, %s2196_s7  ;;  %2127 = vmatprep.mubr.msk.bf16.mxu0 %vm1574_vm11, %v1527_v47  ;;  %v2638_v42 = vpack.c.bf16 %v629_v39, %v628_v38  ;;  %v1289_v49 = vsel %vm379_vm0, %v2449_v14, %v916_v11  ;;  %v821_v11 = vld [vmem:[#allocation2 + $0x169] sm:$0xff] }
  0xd3   : > { %1121 = vrot.lane.b32.xlu1 %v741_v4, %s2196_s7  ;;  %v840_v18 = vpack.c.bf16 %v822_v12, %v821_v11  ;;  %v873_v12 = vld [vmem:[#allocation2 + $0x19a] sm:$0xff] }
  0xd4   : > { %v1250_v22 = vpop.permute.xlu0 %1249 }
  0xd5   : > { %v918_v21 = vpop.permute.xlu1 %917  ;;  %v1529_v23 = vsel %vm1521_vm10, %v1496_v1, %v1250_v22  ;;  %v869_v1 = vld [vmem:[#allocation2 + $0x16a] sm:$0xff]  ;;  %v870_v22 = vld [vmem:[#allocation2 + $0x172] sm:$0xff] }
  0xd6   : > { %1167 = vrot.lane.b32.xlu0 %v2594_v50, %s2197_s10  ;;  %2128 = vmatmul.mubr.msk.bf16.gmra.mrb[4].mxu0 %vm1574_vm11, %v1529_v23  ;;  %v1292_v61 = vsel %vm379_vm0, %v2469_v33, %v918_v21 }
  0xd7   : > { %1169 = vrot.lane.b32.xlu1 %v2618_v17, %s2197_s10 }
  0xd8   : > { %v964_v26 = vpop.permute.xlu0 %963 }
  0xd9   : > { %v966_v25 = vpop.permute.xlu1 %965  ;;  %v1333_v54 = vsel %vm1323_vm4, %v1289_v49, %v964_v26 }
  0xda   : > { %1215 = vrot.lane.b32.xlu0 %v693_v56, %s2198_s15  ;;  %v1335_v0 = vsel %vm1323_vm4, %v1292_v61, %v966_v25 }
  0xdb   : > { %1217 = vrot.lane.b32.xlu1 %v838_v24, %s2198_s15 }
  0xdc   : > { %v1012_v31 = vpop.permute.xlu0 %1011 }
  0xdd   : > { %v1014_v27 = vpop.permute.xlu1 %1013 }
  0xde   : > { %1263 = vrot.lane.b32.xlu0 %v741_v4, %s2199_s16  ;;  %v1368_v5 = vsel %vm1356_vm5, %v1335_v0, %v1014_v27  ;;  %v632_v27 = vld [vmem:[#allocation2 + $0x180] sm:$0xff] }
  0xdf   : > { %931 = vrot.lane.b32.xlu1 %v693_v56, %s2192_s28  ;;  %v1366_v56 = vsel %vm1356_vm5, %v1333_v54, %v1012_v31 }
  0xe0   : > { %v1060_v37 = vpop.permute.xlu0 %1059 }
  0xe1   : > { %v1062_v36 = vpop.permute.xlu1 %1061  ;;  %v1399_v59 = vsel %vm1389_vm6, %v1366_v56, %v1060_v37  ;;  %v681_v37 = vld [vmem:[#allocation2 + $0x189] sm:$0xff]  ;;  %v778_v56 = vld [vmem:[#allocation2 + $0x1a0] sm:$0xff] }
  0xe2   : > { %1265 = vrot.lane.b32.xlu0 %v886_v34, %s2199_s16  ;;  %v1401_v8 = vsel %vm1389_vm6, %v1368_v5, %v1062_v36  ;;  %v680_v36 = vld [vmem:[#allocation2 + $0x181] sm:$0xff] }
  0xe3   : > { %933 = vrot.lane.b32.xlu1 %v838_v24, %s2192_s28  ;;  %v826_v5 = vld [vmem:[#allocation2 + $0x1a1] sm:$0xff] }
  0xe4   : > { %v1108_v41 = vpop.permute.xlu0 %1107 }
  0xe5   : > { %v1110_v40 = vpop.permute.xlu1 %1109  ;;  %v1432_v14 = vsel %vm1422_vm7, %v1399_v59, %v1108_v41 }
  0xe6   : > { %979 = vrot.lane.b32.xlu0 %v741_v4, %s2193_s29  ;;  %v1434_v10 = vsel %vm1422_vm7, %v1401_v8, %v1110_v40  ;;  %v697_v40 = vpack.c.bf16 %v681_v37, %v680_v36 }
  0xe7   : > { %981 = vrot.lane.b32.xlu1 %v886_v34, %s2193_s29 }
  0xe8   : > { %v1156_v46 = vpop.permute.xlu0 %1155 }
  0xe9   : > { %v1158_v45 = vpop.permute.xlu1 %1157  ;;  %v1465_v3 = vsel %vm1455_vm8, %v1432_v14, %v1156_v46 }
  0xea   : > { %1027 = vrot.lane.b32.xlu0 %v2618_v17, %s2194_s30  ;;  %v1467_v13 = vsel %vm1455_vm8, %v1434_v10, %v1158_v45 }
  0xeb   : > { %1029 = vrot.lane.b32.xlu1 %v2638_v42, %s2194_s30 }
  0xec   : > { %v1204_v57 = vpop.permute.xlu0 %1203 }
  0xed   : > { %v1206_v55 = vpop.permute.xlu1 %1205  ;;  %v1498_v29 = vsel %vm1488_vm9, %v1465_v3, %v1204_v57 }
  0xee   : > { %1075 = vrot.lane.b32.xlu0 %v838_v24, %s2195_s6  ;;  %v1500_v16 = vsel %vm1488_vm9, %v1467_v13, %v1206_v55  ;;  %v888_v24 = vpack.c.bf16 %v870_v22, %v869_v1  ;;  %v777_v55 = vld [vmem:[#allocation2 + $0x198] sm:$0xff]  ;;  %v874_v13 = vld [vmem:[#allocation2 + $0x1a2] sm:$0xff] }
  0xef   : > { %1077 = vrot.lane.b32.xlu1 %v695_v48, %s2195_s6  ;;  %v794_v0 = vpack.c.bf16 %v778_v56, %v777_v55  ;;  %v475_v1 = vld [vmem:[#allocation2 + $0xc8] sm:$0xff] }
  0xf0   : > { %v1252_v7 = vpop.permute.xlu0 %1251 }
  0xf1   : > { %v920_v4 = vpop.permute.xlu1 %919  ;;  %v1531_v33 = vsel %vm1521_vm10, %v1498_v29, %v1252_v7 }
  0xf2   : > { %1123 = vrot.lane.b32.xlu0 %v886_v34, %s2196_s7  ;;  %2131 = vmatprep.mubr.msk.bf16.mxu0 %vm1574_vm11, %v1531_v33  ;;  %v649_v34 = vpack.c.bf16 %v633_v28, %v632_v27  ;;  %v1295_v41 = vsel %vm379_vm0, %v2491_v51, %v920_v4  ;;  %v825_v4 = vld [vmem:[#allocation2 + $0x199] sm:$0xff] }
  0xf3   : > { %1125 = vrot.lane.b32.xlu1 %v743_v60, %s2196_s7  ;;  %v842_v11 = vpack.c.bf16 %v826_v5, %v825_v4 }
  0xf4   : > { %v1254_v47 = vpop.permute.xlu0 %1253 }
  0xf5   : > { %v922_v15 = vpop.permute.xlu1 %921  ;;  %v1533_v32 = vsel %vm1521_vm10, %v1500_v16, %v1254_v47  ;;  %v890_v47 = vpack.c.bf16 %v874_v13, %v873_v12 }
  0xf6   : > { %1171 = vrot.lane.b32.xlu0 %v2638_v42, %s2197_s10  ;;  %2132 = vmatmul.mubr.msk.bf16.gmra.mrb[8].mxu0 %vm1574_vm11, %v1533_v32  ;;  %v1298_v54 = vsel %vm379_vm0, %v2509_v6, %v922_v15 }
  0xf7   : > { %1173 = vrot.lane.b32.xlu1 %v2662_v9, %s2197_s10 }
  0xf8   : > { %v968_v20 = vpop.permute.xlu0 %967 }
  0xf9   : > { %v970_v19 = vpop.permute.xlu1 %969  ;;  %v1337_v45 = vsel %vm1323_vm4, %v1295_v41, %v968_v20 }
  0xfa   : > { %1219 = vrot.lane.b32.xlu0 %v695_v48, %s2198_s15  ;;  %v1339_v57 = vsel %vm1323_vm4, %v1298_v54, %v970_v19 }
  0xfb   : > { %1221 = vrot.lane.b32.xlu1 %v840_v18, %s2198_s15 }
  0xfc   : > { %v1016_v23 = vpop.permute.xlu0 %1015 }
  0xfd   : > { %v1018_v21 = vpop.permute.xlu1 %1017 }
  0xfe   : > { %1267 = vrot.lane.b32.xlu0 %v743_v60, %s2199_s16  ;;  %v1372_v61 = vsel %vm1356_vm5, %v1339_v57, %v1018_v21  ;;  %v474_v21 = vld [vmem:[#allocation2 + $0xc0] sm:$0xff] }
  0xff   : > { %935 = vrot.lane.b32.xlu1 %v695_v48, %s2192_s28  ;;  %v1370_v48 = vsel %vm1356_vm5, %v1337_v45, %v1016_v23 }
 0x100   : > { %v1064_v26 = vpop.permute.xlu0 %1063 }
 0x101   : > { %v1066_v25 = vpop.permute.xlu1 %1065  ;;  %v1403_v52 = vsel %vm1389_vm6, %v1370_v48, %v1064_v26 }
 0x102   : > { %1269 = vrot.lane.b32.xlu0 %v888_v24, %s2199_s16  ;;  %v1405_v63 = vsel %vm1389_vm6, %v1372_v61, %v1066_v25 }
 0x103   : > { %937 = vrot.lane.b32.xlu1 %v840_v18, %s2192_s28 }
 0x104   : > { %v1112_v31 = vpop.permute.xlu0 %1111 }
 0x105   : > { %v1114_v30 = vpop.permute.xlu1 %1113  ;;  %v1436_v51 = vsel %vm1422_vm7, %v1403_v52, %v1112_v31 }
 0x106   : > { %983 = vrot.lane.b32.xlu0 %v743_v60, %s2193_s29  ;;  %v1438_v3 = vsel %vm1422_vm7, %v1405_v63, %v1114_v30 }
 0x107   : > { %985 = vrot.lane.b32.xlu1 %v888_v24, %s2193_s29 }
 0x108   : > { %v1160_v39 = vpop.permute.xlu0 %1159 }
 0x109   : > { %v1162_v38 = vpop.permute.xlu1 %1161  ;;  %v1469_v59 = vsel %vm1455_vm8, %v1436_v51, %v1160_v39 }
 0x10a   : > { %1031 = vrot.lane.b32.xlu0 %v2662_v9, %s2194_s30  ;;  %v1471_v29 = vsel %vm1455_vm8, %v1438_v3, %v1162_v38 }
 0x10b   : > { %1033 = vrot.lane.b32.xlu1 %v649_v34, %s2194_s30 }
 0x10c   : > { %v1208_v49 = vpop.permute.xlu0 %1207 }
 0x10d   : > { %v1210_v46 = vpop.permute.xlu1 %1209  ;;  %v1502_v14 = vsel %vm1488_vm9, %v1469_v59, %v1208_v49 }
 0x10e   : > { %1079 = vrot.lane.b32.xlu0 %v840_v18, %s2195_s6  ;;  %v1504_v8 = vsel %vm1488_vm9, %v1471_v29, %v1210_v46 }
 0x10f   : > { %1081 = vrot.lane.b32.xlu1 %v697_v40, %s2195_s6 }
 0x110   : > { %v1256_v62 = vpop.permute.xlu0 %1255 }
 0x111   : > { %v924_v60 = vpop.permute.xlu1 %923  ;;  %v1535_v6 = vsel %vm1521_vm10, %v1502_v14, %v1256_v62 }
 0x112   : > { %1127 = vrot.lane.b32.xlu0 %v888_v24, %s2196_s7  ;;  %2135 = vmatprep.mubr.msk.bf16.mxu0 %vm1574_vm11, %v1535_v6  ;;  %v498_v24 = vpack.c.bf16 %v475_v1, %v474_v21 }
 0x113   : > { %1129 = vrot.lane.b32.xlu1 %v745_v53, %s2196_s7 }
 0x114   : > { %v1258_v33 = vpop.permute.xlu0 %1257  ;;  %v1301_v27 = vsel %vm379_vm0, %v498_v24, %v924_v60 }
 0x115   : > { %v926_v7 = vpop.permute.xlu1 %925  ;;  %v1537_v10 = vsel %vm1521_vm10, %v1504_v8, %v1258_v33 }
 0x116   : > { %1175 = vrot.lane.b32.xlu0 %v649_v34, %s2197_s10  ;;  %2136 = vmatmul.mubr.msk.bf16.gmra.mrb[12].mxu0 %vm1574_vm11, %v1537_v10  ;;  %v1304_v37 = vsel %vm379_vm0, %v2538_v35, %v926_v7 }
 0x117   : > { %1177 = vrot.lane.b32.xlu1 %v794_v0, %s2197_s10 }
 0x118   : > { %v972_v16 = vpop.permute.xlu0 %971 }
 0x119   : > { %v974_v15 = vpop.permute.xlu1 %973  ;;  %v1341_v28 = vsel %vm1323_vm4, %v1301_v27, %v972_v16 }
 0x11a   : > { %1223 = vrot.lane.b32.xlu0 %v697_v40, %s2198_s15  ;;  %v1343_v39 = vsel %vm1323_vm4, %v1304_v37, %v974_v15 }
 0x11b   : > { %1225 = vrot.lane.b32.xlu1 %v842_v11, %s2198_s15 }
 0x11c   : > { %v1020_v18 = vpop.permute.xlu0 %1019 }
 0x11d   : > { %v1022_v32 = vpop.permute.xlu1 %1021  ;;  %v1374_v31 = vsel %vm1356_vm5, %v1341_v28, %v1020_v18 }
 0x11e   : > { %1271 = vrot.lane.b32.xlu0 %v745_v53, %s2199_s16  ;;  %v1376_v43 = vsel %vm1356_vm5, %v1343_v39, %v1022_v32 }
 0x11f   : > { %1273 = vrot.lane.b32.xlu1 %v890_v47, %s2199_s16 }
 0x120   : > { %v1068_v20 = vpop.permute.xlu0 %1067 }
 0x121   : > { %v1070_v19 = vpop.permute.xlu1 %1069  ;;  %v1407_v36 = vsel %vm1389_vm6, %v1374_v31, %v1068_v20 }
 0x122   : > { %v1409_v46 = vsel %vm1389_vm6, %v1376_v43, %v1070_v19 }
 0x124   : > { %v1116_v23 = vpop.permute.xlu0 %1115 }
 0x125   : > { %v1118_v22 = vpop.permute.xlu1 %1117  ;;  %v1440_v38 = vsel %vm1422_vm7, %v1407_v36, %v1116_v23 }
 0x126   : > { %v1442_v49 = vsel %vm1422_vm7, %v1409_v46, %v1118_v22 }
 0x128   : > { %v1164_v26 = vpop.permute.xlu0 %1163 }
 0x129   : > { %v1166_v25 = vpop.permute.xlu1 %1165  ;;  %v1473_v40 = vsel %vm1455_vm8, %v1440_v38, %v1164_v26 }
 0x12a   : > { %v1475_v35 = vsel %vm1455_vm8, %v1442_v49, %v1166_v25 }
 0x12c   : > { %v1212_v34 = vpop.permute.xlu0 %1211 }
 0x12d   : > { %v1214_v30 = vpop.permute.xlu1 %1213  ;;  %v1506_v44 = vsel %vm1488_vm9, %v1473_v40, %v1212_v34 }
 0x12e   : > { %v1508_v53 = vsel %vm1488_vm9, %v1475_v35, %v1214_v30 }
 0x130   : > { %v1260_v45 = vpop.permute.xlu0 %1259 }
 0x131   : > { %v928_v41 = vpop.permute.xlu1 %927  ;;  %v1539_v48 = vsel %vm1521_vm10, %v1506_v44, %v1260_v45 }
 0x132   : > { %2139 = vmatprep.mubr.msk.bf16.mxu1 %vm1574_vm11, %v1539_v48  ;;  %v1307_v0 = vsel %vm379_vm0, %v2551_v58, %v928_v41 }
 0x134   : > { %v1262_v54 = vpop.permute.xlu0 %1261 }
 0x135   : > { %v930_v52 = vpop.permute.xlu1 %929  ;;  %v1541_v51 = vsel %vm1521_vm10, %v1508_v53, %v1262_v54 }
 0x136   : > { %2140 = vmatmul.mubr.msk.bf16.vlgmr.msra.gmra.mrb[0].mxu1 %vm1574_vm11, %v1541_v51  ;;  %v1310_v8 = vsel %vm379_vm0, %v2574_v2, %v930_v52 }
 0x138   : > { %v976_v56 = vpop.permute.xlu0 %975 }
 0x139   : > { %v978_v55 = vpop.permute.xlu1 %977  ;;  %v1345_v3 = vsel %vm1323_vm4, %v1307_v0, %v976_v56 }
 0x13a   : > { %v1347_v10 = vsel %vm1323_vm4, %v1310_v8, %v978_v55 }
 0x13c   : > { %v1024_v59 = vpop.permute.xlu0 %1023 }
 0x13d   : > { %v1026_v57 = vpop.permute.xlu1 %1025  ;;  %v1378_v5 = vsel %vm1356_vm5, %v1345_v3, %v1024_v59 }
 0x13e   : > { %v1380_v58 = vsel %vm1356_vm5, %v1347_v10, %v1026_v57 }
 0x140   : > { %v1072_v61 = vpop.permute.xlu0 %1071 }
 0x141   : > { %v1074_v60 = vpop.permute.xlu1 %1073  ;;  %v1411_v7 = vsel %vm1389_vm6, %v1378_v5, %v1072_v61 }
 0x142   : > { %v1413_v16 = vsel %vm1389_vm6, %v1380_v58, %v1074_v60 }
 0x144   : > { %v1120_v62 = vpop.permute.xlu0 %1119 }
 0x145   : > { %v1122_v14 = vpop.permute.xlu1 %1121  ;;  %v1444_v33 = vsel %vm1422_vm7, %v1411_v7, %v1120_v62 }
 0x146   : > { %v1446_v32 = vsel %vm1422_vm7, %v1413_v16, %v1122_v14 }
 0x148   : > { %v1168_v6 = vpop.permute.xlu0 %1167 }
 0x149   : > { %v1170_v63 = vpop.permute.xlu1 %1169  ;;  %v1477_v11 = vsel %vm1455_vm8, %v1444_v33, %v1168_v6 }
 0x14a   : > { %v1479_v2 = vsel %vm1455_vm8, %v1446_v32, %v1170_v63 }
 0x14c   : > { %v1216_v29 = vpop.permute.xlu0 %1215 }
 0x14d   : > { %v1218_v4 = vpop.permute.xlu1 %1217  ;;  %v1510_v13 = vsel %vm1488_vm9, %v1477_v11, %v1216_v29 }
 0x14e   : > { %v1512_v19 = vsel %vm1488_vm9, %v1479_v2, %v1218_v4 }
 0x150   : > { %v1264_v15 = vpop.permute.xlu0 %1263 }
 0x151   : > { %v932_v12 = vpop.permute.xlu1 %931  ;;  %v1543_v47 = vsel %vm1521_vm10, %v1510_v13, %v1264_v15 }
 0x152   : > { %2143 = vmatprep.mubr.msk.bf16.mxu1 %vm1574_vm11, %v1543_v47  ;;  %v1313_v34 = vsel %vm379_vm0, %v2594_v50, %v932_v12 }
 0x154   : > { %v1266_v20 = vpop.permute.xlu0 %1265 }
 0x155   : > { %v934_v18 = vpop.permute.xlu1 %933  ;;  %v1545_v21 = vsel %vm1521_vm10, %v1512_v19, %v1266_v20 }
 0x156   : > { %2144 = vmatmul.mubr.msk.bf16.gmra.mrb[4].mxu1 %vm1574_vm11, %v1545_v21  ;;  %v1316_v41 = vsel %vm379_vm0, %v2618_v17, %v934_v18 }
 0x158   : > { %v980_v22 = vpop.permute.xlu0 %979 }
 0x159   : > { %v982_v1 = vpop.permute.xlu1 %981  ;;  %v1349_v36 = vsel %vm1323_vm4, %v1313_v34, %v980_v22 }
 0x15a   : > { %v1351_v44 = vsel %vm1323_vm4, %v1316_v41, %v982_v1 }
 0x15c   : > { %v1028_v24 = vpop.permute.xlu0 %1027 }
 0x15d   : > { %v1030_v23 = vpop.permute.xlu1 %1029  ;;  %v1382_v38 = vsel %vm1356_vm5, %v1349_v36, %v1028_v24 }
 0x15e   : > { %v1384_v50 = vsel %vm1356_vm5, %v1351_v44, %v1030_v23 }
 0x160   : > { %v1076_v26 = vpop.permute.xlu0 %1075 }
 0x161   : > { %v1078_v25 = vpop.permute.xlu1 %1077  ;;  %v1415_v40 = vsel %vm1389_vm6, %v1382_v38, %v1076_v26 }
 0x162   : > { %v1417_v35 = vsel %vm1389_vm6, %v1384_v50, %v1078_v25 }
 0x164   : > { %v1124_v28 = vpop.permute.xlu0 %1123 }
 0x165   : > { %v1126_v27 = vpop.permute.xlu1 %1125  ;;  %v1448_v43 = vsel %vm1422_vm7, %v1415_v40, %v1124_v28 }
 0x166   : > { %v1450_v53 = vsel %vm1422_vm7, %v1417_v35, %v1126_v27 }
 0x168   : > { %v1172_v31 = vpop.permute.xlu0 %1171 }
 0x169   : > { %v1174_v30 = vpop.permute.xlu1 %1173  ;;  %v1481_v45 = vsel %vm1455_vm8, %v1448_v43, %v1172_v31 }
 0x16a   : > { %v1483_v17 = vsel %vm1455_vm8, %v1450_v53, %v1174_v30 }
 0x16c   : > { %v1220_v39 = vpop.permute.xlu0 %1219 }
 0x16d   : > { %v1222_v37 = vpop.permute.xlu1 %1221  ;;  %v1514_v48 = vsel %vm1488_vm9, %v1481_v45, %v1220_v39 }
 0x16e   : > { %v1516_v51 = vsel %vm1488_vm9, %v1483_v17, %v1222_v37 }
 0x170   : > { %v1268_v49 = vpop.permute.xlu0 %1267 }
 0x171   : > { %v936_v46 = vpop.permute.xlu1 %935  ;;  %v1547_v52 = vsel %vm1521_vm10, %v1514_v48, %v1268_v49 }
 0x172   : > { %2147 = vmatprep.mubr.msk.bf16.mxu1 %vm1574_vm11, %v1547_v52  ;;  %v1319_v3 = vsel %vm379_vm0, %v2638_v42, %v936_v46 }
 0x174   : > { %v1270_v55 = vpop.permute.xlu0 %1269 }
 0x175   : > { %v938_v54 = vpop.permute.xlu1 %937  ;;  %v1549_v56 = vsel %vm1521_vm10, %v1516_v51, %v1270_v55 }
 0x176   : > { %2148 = vmatmul.mubr.msk.bf16.gmra.mrb[8].mxu1 %vm1574_vm11, %v1549_v56  ;;  %v1322_v4 = vsel %vm379_vm0, %v2662_v9, %v938_v54 }
 0x178   : > { %v984_v59 = vpop.permute.xlu0 %983 }
 0x179   : > { %v986_v57 = vpop.permute.xlu1 %985  ;;  %v1353_v7 = vsel %vm1323_vm4, %v1319_v3, %v984_v59 }
 0x17a   : > { %v1355_v29 = vsel %vm1323_vm4, %v1322_v4, %v986_v57 }
 0x17c   : > { %v1032_v61 = vpop.permute.xlu0 %1031 }
 0x17d   : > { %v1034_v60 = vpop.permute.xlu1 %1033  ;;  %v1386_v10 = vsel %vm1356_vm5, %v1353_v7, %v1032_v61 }
 0x17e   : > { %v1388_v33 = vsel %vm1356_vm5, %v1355_v29, %v1034_v60 }
 0x180   : > { %v1080_v62 = vpop.permute.xlu0 %1079 }
 0x181   : > { %v1082_v14 = vpop.permute.xlu1 %1081  ;;  %v1419_v12 = vsel %vm1389_vm6, %v1386_v10, %v1080_v62 }
 0x182   : > { %v1421_v42 = vsel %vm1389_vm6, %v1388_v33, %v1082_v14 }
 0x184   : > { %v1128_v6 = vpop.permute.xlu0 %1127 }
 0x185   : > { %v1130_v63 = vpop.permute.xlu1 %1129  ;;  %v1452_v16 = vsel %vm1422_vm7, %v1419_v12, %v1128_v6 }
 0x186   : > { %v1454_v15 = vsel %vm1422_vm7, %v1421_v42, %v1130_v63 }
 0x188   : > { %v1176_v5 = vpop.permute.xlu0 %1175 }
 0x189   : > { %v1178_v0 = vpop.permute.xlu1 %1177  ;;  %v2125_v8 = vpop.f32.mrb[0].mxu0  ;;  %v1485_v1 = vsel %vm1455_vm8, %v1452_v16, %v1176_v5 }
 0x18a   : > { %1774 = vst.msk [vmem:[%s2780_s22 + $0x10] sm:$0xff] %vm379_vm0, %v2125_v8  ;;  %v1645_v11 = vpop.f32.mrb[1].mxu0  ;;  %v1875_v2 = vmul.f32 %v2125_v8, %v2125_v8  ;;  %v1487_v21 = vsel %vm1455_vm8, %v1454_v15, %v1178_v0  ;;  %v1807_v22 = vsel %vm379_vm0, %v2125_v8, 0.0 }
 0x18b   : > { %1772 = vst.msk [vmem:[%s2780_s22] sm:$0xff] %vm379_vm0, %v1645_v11  ;;  %v1873_v9 = vmul.f32 %v1645_v11, %v1645_v11  ;;  %v2126_v58 = vpop.f32.mrb[2].mxu0  ;;  %v1804_v18 = vsel %vm379_vm0, %v1645_v11, 0.0 }
 0x18c   : > { %1775 = vst.msk [vmem:[%s2780_s22 + $0x18] sm:$0xff] %vm379_vm0, %v2126_v58  ;;  %v1224_v47 = vpop.permute.xlu0 %1223  ;;  %v1648_v32 = vpop.f32.mrb[3].mxu0  ;;  %v1876_v25 = vmul.f32 %v2126_v58, %v2126_v58  ;;  %v1908_v38 = vsel %vm379_vm0, %v1875_v2, 0.0  ;;  %v1809_v39 = vsel %vm379_vm0, %v2126_v58, 0.0 }
 0x18d   : > { %v1226_v13 = vpop.permute.xlu1 %1225  ;;  %1773 = vst.msk [vmem:[%s2780_s22 + $0x8] sm:$0xff] %vm379_vm0, %v1648_v32  ;;  %v1805_v19 = vsel %vm379_vm0, %v1648_v32, 0.0  ;;  %v1874_v20 = vmul.f32 %v1648_v32, %v1648_v32  ;;  %v1905_v24 = vsel %vm379_vm0, %v1873_v9, 0.0  ;;  %v1518_v30 = vsel %vm1488_vm9, %v1485_v1, %v1224_v47 }
 0x18e   : > { %v1806_v23 = vadd.f32 %v1805_v19, %v1804_v18  ;;  %v1520_v26 = vsel %vm1488_vm9, %v1487_v21, %v1226_v13  ;;  %v1910_v44 = vsel %vm379_vm0, %v1876_v25, 0.0 }
 0x18f   : > { %v1906_v27 = vsel %vm379_vm0, %v1874_v20, 0.0 }
 0x190   : > { %v1808_v31 = vadd.f32 %v1807_v22, %v1806_v23  ;;  %v1907_v34 = vadd.f32 %v1906_v27, %v1905_v24  ;;  %v1272_v37 = vpop.permute.xlu0 %1271 }
 0x191   : > { %v1274_v28 = vpop.permute.xlu1 %1273  ;;  %v1551_v40 = vsel %vm1521_vm10, %v1518_v30, %v1272_v37 }
 0x192   : > { %v1553_v36 = vsel %vm1521_vm10, %v1520_v26, %v1274_v28  ;;  %v1909_v41 = vadd.f32 %v1908_v38, %v1907_v34  ;;  %2151 = vmatprep.mubr.msk.bf16.mxu1 %vm1574_vm11, %v1551_v40  ;;  %v1810_v43 = vadd.f32 %v1809_v39, %v1808_v31 }
 0x193   : > { %2152 = vmatmul.mubr.msk.bf16.gmra.mrb[12].mxu1 %vm1574_vm11, %v1553_v36 }
 0x194   : > { %v1911_v45 = vadd.f32 %v1910_v44, %v1909_v41 }
 0x1a9   : > { %v2129_v46 = vpop.f32.mrb[4].mxu0 }
 0x1aa   : > { %1778 = vst.msk [vmem:[%s2780_s22 + $0x30] sm:$0xff] %vm379_vm0, %v2129_v46  ;;  %v1661_v50 = vpop.f32.mrb[5].mxu0  ;;  %v1879_v17 = vmul.f32 %v2129_v46, %v2129_v46  ;;  %v1815_v59 = vsel %vm379_vm0, %v2129_v46, 0.0 }
 0x1ab   : > { %1776 = vst.msk [vmem:[%s2780_s22 + $0x20] sm:$0xff] %vm379_vm0, %v1661_v50  ;;  %v1811_v48 = vsel %vm379_vm0, %v1661_v50, 0.0  ;;  %v1877_v49 = vmul.f32 %v1661_v50, %v1661_v50  ;;  %v2130_v35 = vpop.f32.mrb[6].mxu0 }
 0x1ac   : > { %v1812_v52 = vadd.f32 %v1811_v48, %v1810_v43  ;;  %1779 = vst.msk [vmem:[%s2780_s22 + $0x38] sm:$0xff] %vm379_vm0, %v2130_v35  ;;  %v1664_v53 = vpop.f32.mrb[7].mxu0  ;;  %v1880_v60 = vmul.f32 %v2130_v35, %v2130_v35  ;;  %v1916_v63 = vsel %vm379_vm0, %v1879_v17, 0.0  ;;  %v1817_v6 = vsel %vm379_vm0, %v2130_v35, 0.0 }
 0x1ad   : > { %v1912_v54 = vsel %vm379_vm0, %v1877_v49, 0.0  ;;  %1777 = vst.msk [vmem:[%s2780_s22 + $0x28] sm:$0xff] %vm379_vm0, %v1664_v53  ;;  %v1813_v51 = vsel %vm379_vm0, %v1664_v53, 0.0  ;;  %v1878_v55 = vmul.f32 %v1664_v53, %v1664_v53 }
 0x1ae   : > { %v1913_v56 = vadd.f32 %v1912_v54, %v1911_v45  ;;  %v1814_v57 = vadd.f32 %v1813_v51, %v1812_v52  ;;  %v1918_v4 = vsel %vm379_vm0, %v1880_v60, 0.0 }
 0x1af   : > { %v1914_v61 = vsel %vm379_vm0, %v1878_v55, 0.0 }
 0x1b0   : > { %v1816_v14 = vadd.f32 %v1815_v59, %v1814_v57  ;;  %v1915_v62 = vadd.f32 %v1914_v61, %v1913_v56 }
 0x1b2   : > { %v1917_v0 = vadd.f32 %v1916_v63, %v1915_v62  ;;  %v1818_v3 = vadd.f32 %v1817_v6, %v1816_v14 }
 0x1b4   : > { %v1919_v5 = vadd.f32 %v1918_v4, %v1917_v0 }
 0x1c9   : > { %v2133_v29 = vpop.f32.mrb[8].mxu0 }
 0x1ca   : > { %1782 = vst.msk [vmem:[%s2780_s22 + $0x50] sm:$0xff] %vm379_vm0, %v2133_v29  ;;  %v1677_v7 = vpop.f32.mrb[9].mxu0  ;;  %v1883_v12 = vmul.f32 %v2133_v29, %v2133_v29  ;;  %v1823_v47 = vsel %vm379_vm0, %v2133_v29, 0.0 }
 0x1cb   : > { %1780 = vst.msk [vmem:[%s2780_s22 + $0x40] sm:$0xff] %vm379_vm0, %v1677_v7  ;;  %v1819_v8 = vsel %vm379_vm0, %v1677_v7, 0.0  ;;  %v1881_v33 = vmul.f32 %v1677_v7, %v1677_v7  ;;  %v2134_v10 = vpop.f32.mrb[10].mxu0 }
 0x1cc   : > { %v1820_v11 = vadd.f32 %v1819_v8, %v1818_v3  ;;  %1783 = vst.msk [vmem:[%s2780_s22 + $0x58] sm:$0xff] %vm379_vm0, %v2134_v10  ;;  %v1680_v42 = vpop.f32.mrb[11].mxu0  ;;  %v1884_v32 = vmul.f32 %v2134_v10, %v2134_v10  ;;  %v1924_v20 = vsel %vm379_vm0, %v1883_v12, 0.0  ;;  %v1825_v21 = vsel %vm379_vm0, %v2134_v10, 0.0 }
 0x1cd   : > { %v1920_v9 = vsel %vm379_vm0, %v1881_v33, 0.0  ;;  %1781 = vst.msk [vmem:[%s2780_s22 + $0x48] sm:$0xff] %vm379_vm0, %v1680_v42  ;;  %v1821_v58 = vsel %vm379_vm0, %v1680_v42, 0.0  ;;  %v1882_v13 = vmul.f32 %v1680_v42, %v1680_v42 }
 0x1ce   : > { %v1921_v15 = vadd.f32 %v1920_v9, %v1919_v5  ;;  %v1822_v16 = vadd.f32 %v1821_v58, %v1820_v11  ;;  %v1926_v23 = vsel %vm379_vm0, %v1884_v32, 0.0 }
 0x1cf   : > { %v1922_v2 = vsel %vm379_vm0, %v1882_v13, 0.0 }
 0x1d0   : > { %v1824_v18 = vadd.f32 %v1823_v47, %v1822_v16  ;;  %v1923_v19 = vadd.f32 %v1922_v2, %v1921_v15 }
 0x1d2   : > { %v1925_v1 = vadd.f32 %v1924_v20, %v1923_v19  ;;  %v1826_v22 = vadd.f32 %v1825_v21, %v1824_v18 }
 0x1d4   : > { %v1927_v24 = vadd.f32 %v1926_v23, %v1925_v1 }
 0x1e9   : > { %v2137_v25 = vpop.f32.mrb[12].mxu0 }
 0x1ea   : > { %1786 = vst.msk [vmem:[%s2780_s22 + $0x70] sm:$0xff] %vm379_vm0, %v2137_v25  ;;  %v1693_v26 = vpop.f32.mrb[13].mxu0  ;;  %v1887_v36 = vmul.f32 %v2137_v25, %v2137_v25  ;;  %v1831_v43 = vsel %vm379_vm0, %v2137_v25, 0.0 }
 0x1eb   : > { %1784 = vst.msk [vmem:[%s2780_s22 + $0x60] sm:$0xff] %vm379_vm0, %v1693_v26  ;;  %v1827_v27 = vsel %vm379_vm0, %v1693_v26, 0.0  ;;  %v1885_v28 = vmul.f32 %v1693_v26, %v1693_v26  ;;  %v2138_v30 = vpop.f32.mrb[14].mxu0 }
 0x1ec   : > { %v1828_v31 = vadd.f32 %v1827_v27, %v1826_v22  ;;  %1787 = vst.msk [vmem:[%s2780_s22 + $0x78] sm:$0xff] %vm379_vm0, %v2138_v30  ;;  %v1696_v34 = vpop.f32.mrb[15].mxu0  ;;  %v1888_v44 = vmul.f32 %v2138_v30, %v2138_v30  ;;  %v1932_v48 = vsel %vm379_vm0, %v1887_v36, 0.0  ;;  %v1833_v49 = vsel %vm379_vm0, %v2138_v30, 0.0 }
 0x1ed   : > { %v1928_v37 = vsel %vm379_vm0, %v1885_v28, 0.0  ;;  %1785 = vst.msk [vmem:[%s2780_s22 + $0x68] sm:$0xff] %vm379_vm0, %v1696_v34  ;;  %v1829_v38 = vsel %vm379_vm0, %v1696_v34, 0.0  ;;  %v1886_v39 = vmul.f32 %v1696_v34, %v1696_v34 }
 0x1ee   : > { %v1929_v40 = vadd.f32 %v1928_v37, %v1927_v24  ;;  %v1830_v41 = vadd.f32 %v1829_v38, %v1828_v31  ;;  %v1934_v53 = vsel %vm379_vm0, %v1888_v44, 0.0 }
 0x1ef   : > { %v1930_v45 = vsel %vm379_vm0, %v1886_v39, 0.0 }
 0x1f0   : > { %v1832_v46 = vadd.f32 %v1831_v43, %v1830_v41  ;;  %v1931_v50 = vadd.f32 %v1930_v45, %v1929_v40 }
 0x1f2   : > { %v1933_v35 = vadd.f32 %v1932_v48, %v1931_v50  ;;  %v1834_v52 = vadd.f32 %v1833_v49, %v1832_v46 }
 0x1f4   : > { %v1935_v17 = vadd.f32 %v1934_v53, %v1933_v35 }
 0x209   : > { %v2141_v54 = vpop.f32.mrb[0].mxu1 }
 0x20a   : > { %1790 = vst.msk [vmem:[%s2780_s22 + $0x90] sm:$0xff] %vm379_vm0, %v2141_v54  ;;  %v1709_v51 = vpop.f32.mrb[1].mxu1  ;;  %v1891_v61 = vmul.f32 %v2141_v54, %v2141_v54  ;;  %v1839_v3 = vsel %vm379_vm0, %v2141_v54, 0.0 }
 0x20b   : > { %1788 = vst.msk [vmem:[%s2780_s22 + $0x80] sm:$0xff] %vm379_vm0, %v1709_v51  ;;  %v1835_v55 = vsel %vm379_vm0, %v1709_v51, 0.0  ;;  %v1889_v56 = vmul.f32 %v1709_v51, %v1709_v51  ;;  %v2142_v57 = vpop.f32.mrb[2].mxu1 }
 0x20c   : > { %v1836_v59 = vadd.f32 %v1835_v55, %v1834_v52  ;;  %1791 = vst.msk [vmem:[%s2780_s22 + $0x98] sm:$0xff] %vm379_vm0, %v2142_v57  ;;  %v1712_v60 = vpop.f32.mrb[3].mxu1  ;;  %v1892_v4 = vmul.f32 %v2142_v57, %v2142_v57  ;;  %v1940_v8 = vsel %vm379_vm0, %v1891_v61, 0.0  ;;  %v1841_v33 = vsel %vm379_vm0, %v2142_v57, 0.0 }
 0x20d   : > { %v1936_v14 = vsel %vm379_vm0, %v1889_v56, 0.0  ;;  %1789 = vst.msk [vmem:[%s2780_s22 + $0x88] sm:$0xff] %vm379_vm0, %v1712_v60  ;;  %v1837_v62 = vsel %vm379_vm0, %v1712_v60, 0.0  ;;  %v1890_v63 = vmul.f32 %v1712_v60, %v1712_v60 }
 0x20e   : > { %v1937_v6 = vadd.f32 %v1936_v14, %v1935_v17  ;;  %v1838_v0 = vadd.f32 %v1837_v62, %v1836_v59  ;;  %v1942_v42 = vsel %vm379_vm0, %v1892_v4, 0.0 }
 0x20f   : > { %v1938_v5 = vsel %vm379_vm0, %v1890_v63, 0.0 }
 0x210   : > { %v1840_v29 = vadd.f32 %v1839_v3, %v1838_v0  ;;  %v1939_v7 = vadd.f32 %v1938_v5, %v1937_v6 }
 0x212   : > { %v1941_v10 = vadd.f32 %v1940_v8, %v1939_v7  ;;  %v1842_v11 = vadd.f32 %v1841_v33, %v1840_v29 }
 0x214   : > { %v1943_v12 = vadd.f32 %v1942_v42, %v1941_v10 }
 0x229   : > { %v2145_v9 = vpop.f32.mrb[4].mxu1 }
 0x22a   : > { %1794 = vst.msk [vmem:[%s2780_s22 + $0xb0] sm:$0xff] %vm379_vm0, %v2145_v9  ;;  %v1725_v58 = vpop.f32.mrb[5].mxu1  ;;  %v1895_v2 = vmul.f32 %v2145_v9, %v2145_v9  ;;  %v1847_v22 = vsel %vm379_vm0, %v2145_v9, 0.0 }
 0x22b   : > { %1792 = vst.msk [vmem:[%s2780_s22 + $0xa0] sm:$0xff] %vm379_vm0, %v1725_v58  ;;  %v1843_v13 = vsel %vm379_vm0, %v1725_v58, 0.0  ;;  %v1893_v15 = vmul.f32 %v1725_v58, %v1725_v58  ;;  %v2146_v16 = vpop.f32.mrb[6].mxu1 }
 0x22c   : > { %v1844_v47 = vadd.f32 %v1843_v13, %v1842_v11  ;;  %1795 = vst.msk [vmem:[%s2780_s22 + $0xb8] sm:$0xff] %vm379_vm0, %v2146_v16  ;;  %v1728_v32 = vpop.f32.mrb[7].mxu1  ;;  %v1896_v23 = vmul.f32 %v2146_v16, %v2146_v16  ;;  %v1948_v27 = vsel %vm379_vm0, %v1895_v2, 0.0  ;;  %v1849_v28 = vsel %vm379_vm0, %v2146_v16, 0.0 }
 0x22d   : > { %v1944_v18 = vsel %vm379_vm0, %v1893_v15, 0.0  ;;  %1793 = vst.msk [vmem:[%s2780_s22 + $0xa8] sm:$0xff] %vm379_vm0, %v1728_v32  ;;  %v1845_v19 = vsel %vm379_vm0, %v1728_v32, 0.0  ;;  %v1894_v20 = vmul.f32 %v1728_v32, %v1728_v32 }
 0x22e   : > { %v1945_v21 = vadd.f32 %v1944_v18, %v1943_v12  ;;  %v1846_v1 = vadd.f32 %v1845_v19, %v1844_v47  ;;  %v1950_v34 = vsel %vm379_vm0, %v1896_v23, 0.0 }
 0x22f   : > { %v1946_v24 = vsel %vm379_vm0, %v1894_v20, 0.0 }
 0x230   : > { %v1848_v25 = vadd.f32 %v1847_v22, %v1846_v1  ;;  %v1947_v26 = vadd.f32 %v1946_v24, %v1945_v21 }
 0x232   : > { %v1949_v30 = vadd.f32 %v1948_v27, %v1947_v26  ;;  %v1850_v31 = vadd.f32 %v1849_v28, %v1848_v25 }
 0x234   : > { %v1951_v36 = vadd.f32 %v1950_v34, %v1949_v30 }
 0x249   : > { %v2149_v37 = vpop.f32.mrb[8].mxu1 }
 0x24a   : > { %1798 = vst.msk [vmem:[%s2780_s22 + $0xd0] sm:$0xff] %vm379_vm0, %v2149_v37  ;;  %v1741_v38 = vpop.f32.mrb[9].mxu1  ;;  %v1899_v45 = vmul.f32 %v2149_v37, %v2149_v37  ;;  %v1855_v52 = vsel %vm379_vm0, %v2149_v37, 0.0 }
 0x24b   : > { %1796 = vst.msk [vmem:[%s2780_s22 + $0xc0] sm:$0xff] %vm379_vm0, %v1741_v38  ;;  %v1851_v39 = vsel %vm379_vm0, %v1741_v38, 0.0  ;;  %v1897_v40 = vmul.f32 %v1741_v38, %v1741_v38  ;;  %v2150_v41 = vpop.f32.mrb[10].mxu1 }
 0x24c   : > { %v1852_v43 = vadd.f32 %v1851_v39, %v1850_v31  ;;  %1799 = vst.msk [vmem:[%s2780_s22 + $0xd8] sm:$0xff] %vm379_vm0, %v2150_v41  ;;  %v1744_v44 = vpop.f32.mrb[11].mxu1  ;;  %v1900_v53 = vmul.f32 %v2150_v41, %v2150_v41  ;;  %v1956_v55 = vsel %vm379_vm0, %v1899_v45, 0.0  ;;  %v1857_v56 = vsel %vm379_vm0, %v2150_v41, 0.0 }
 0x24d   : > { %v1952_v46 = vsel %vm379_vm0, %v1897_v40, 0.0  ;;  %1797 = vst.msk [vmem:[%s2780_s22 + $0xc8] sm:$0xff] %vm379_vm0, %v1744_v44  ;;  %v1853_v50 = vsel %vm379_vm0, %v1744_v44, 0.0  ;;  %v1898_v48 = vmul.f32 %v1744_v44, %v1744_v44 }
 0x24e   : > { %v1953_v49 = vadd.f32 %v1952_v46, %v1951_v36  ;;  %v1854_v35 = vadd.f32 %v1853_v50, %v1852_v43  ;;  %v1958_v60 = vsel %vm379_vm0, %v1900_v53, 0.0 }
 0x24f   : > { %v1954_v17 = vsel %vm379_vm0, %v1898_v48, 0.0 }
 0x250   : > { %v1856_v54 = vadd.f32 %v1855_v52, %v1854_v35  ;;  %v1955_v51 = vadd.f32 %v1954_v17, %v1953_v49 }
 0x252   : > { %v1957_v57 = vadd.f32 %v1956_v55, %v1955_v51  ;;  %v1858_v59 = vadd.f32 %v1857_v56, %v1856_v54 }
 0x254   : > { %v1959_v61 = vadd.f32 %v1958_v60, %v1957_v57 }
 0x266   : > { %v2153_v14 = vpop.f32.mrb[12].mxu1 }
 0x267   : > { %1802 = vst.msk [vmem:[%s2780_s22 + $0xf0] sm:$0xff] %vm379_vm0, %v2153_v14  ;;  %v1757_v62 = vpop.f32.mrb[13].mxu1  ;;  %v1903_v5 = vmul.f32 %v2153_v14, %v2153_v14  ;;  %v1863_v11 = vsel %vm379_vm0, %v2153_v14, 0.0 }
 0x268   : > { %1800 = vst.msk [vmem:[%s2780_s22 + $0xe0] sm:$0xff] %vm379_vm0, %v1757_v62  ;;  %v1859_v63 = vsel %vm379_vm0, %v1757_v62, 0.0  ;;  %v1901_v6 = vmul.f32 %v1757_v62, %v1757_v62  ;;  %v2154_v0 = vpop.f32.mrb[14].mxu1 }
 0x269   : > { %v1860_v3 = vadd.f32 %v1859_v63, %v1858_v59  ;;  %1803 = vst.msk [vmem:[%s2780_s22 + $0xf8] sm:$0xff] %vm379_vm0, %v2154_v0  ;;  %v1760_v4 = vpop.f32.mrb[15].mxu1  ;;  %v1904_v42 = vmul.f32 %v2154_v0, %v2154_v0  ;;  %v1964_v13 = vsel %vm379_vm0, %v1903_v5, 0.0  ;;  %v1865_v15 = vsel %vm379_vm0, %v2154_v0, 0.0 }
 0x26a   : > { %v1960_v29 = vsel %vm379_vm0, %v1901_v6, 0.0  ;;  %1801 = vst.msk [vmem:[%s2780_s22 + $0xe8] sm:$0xff] %vm379_vm0, %v1760_v4  ;;  %v1861_v7 = vsel %vm379_vm0, %v1760_v4, 0.0  ;;  %v1902_v8 = vmul.f32 %v1760_v4, %v1760_v4 }
 0x26b   : > { %v1961_v33 = vadd.f32 %v1960_v29, %v1959_v61  ;;  %v1862_v10 = vadd.f32 %v1861_v7, %v1860_v3  ;;  %v1966_v32 = vsel %vm379_vm0, %v1904_v42, 0.0 }
 0x26c   : > { %v1962_v12 = vsel %vm379_vm0, %v1902_v8, 0.0 }
 0x26d   : > { %v1864_v9 = vadd.f32 %v1863_v11, %v1862_v10  ;;  %v1963_v58 = vadd.f32 %v1962_v12, %v1961_v33 }
 0x26f   : > { %v1866_v16 = vadd.f32 %v1865_v15, %v1864_v9  ;;  %v1965_v47 = vadd.f32 %v1964_v13, %v1963_v58 }
 0x271   : > { %v1867_v2 = vrot.slane %v1866_v16, 4  ;;  %v1967_v18 = vadd.f32 %v1966_v32, %v1965_v47 }
 0x273   : > { %v1868_v19 = vadd.f32 %v1867_v2, %v1866_v16  ;;  %v1968_v20 = vrot.slane %v1967_v18, 4 }
 0x275   : > { %v1869_v21 = vrot.slane %v1868_v19, 2  ;;  %v1969_v1 = vadd.f32 %v1968_v20, %v1967_v18 }
 0x277   : > { %v1870_v22 = vadd.f32 %v1869_v21, %v1868_v19  ;;  %v1970_v23 = vrot.slane %v1969_v1, 2 }
 0x279   : > { %v1871_v24 = vrot.slane %v1870_v22, 1  ;;  %v1971_v25 = vadd.f32 %v1970_v23, %v1969_v1 }
 0x27b   : > { %v1972_v26 = vrot.slane %v1971_v25, 1  ;;  %v1872_v27 = vadd.f32 %v1871_v24, %v1870_v22 }
 0x27d   : > { %v1973_v28 = vadd.f32 %v1972_v26, %v1971_v25 }
 0x27f   : > { %v1975_v30 = vsel %vm1974_vm12, %v1872_v27, %v1973_v28 }
 0x280   : > { %1976 = vst.msk [vmem:[%s235_s25] sm:$0x3] %vm382_vm1, %v1975_v30 }
 0x281 PF: > { %s16_s18 = sadd.s32 1, %s2189_s18  }
 0x282   : > { %p13_p4 = scmp.ge.s32.totalorder %s16_s18, 4  }
 0x284   :  { %15 = sbr.rel (!%p13_p4) target bundleno = 1 (0x1), region = 81 }

</bundles_post_ra>
